<compile_context>
chip_gen: v5e
topology: v5e:2x2
jax: 0.10.0
libtpu: 0.0.40
codegen_flags: <defaults>
</compile_context>

<pallas_src>
from functools import partial

import jax
import jax.numpy as jnp
from jax.experimental import pallas as pl
from jax.experimental.pallas import tpu as pltpu


# --------------------------- in-kernel building blocks --------------------------- #

def _conv3x3_relu(x, w_ref, b_ref, mask_ref, img_w, *, residual=None):
    """relu(conv3x3_same(x) [+ residual]) in channel-major layout.

    x:        (Cin, L) f32, L = Bt*H*W, lane p = b*H*W + i*W + j.
    w_ref:    (9, Cout, Cin) ref, tap t = (ddh+1)*3 + (ddw+1)
              (== torch weight.permute(2, 3, 0, 1).reshape(9, Cout, Cin)).
    b_ref:    (Cout, 1) ref.
    mask_ref: (9, 1, L) ref; precomputed per-tap validity masks (zero where the
              source pixel p + ddh*W + ddw falls outside its own image).
    Each tap: lane roll (XLU) + constant-mask multiply (VPU) + MXU matmul.
    """
    cin, L = x.shape
    acc = None
    t = 0
    for ddh in (-1, 0, 1):
        for ddw in (-1, 0, 1):
            d = ddh * img_w + ddw
            if ddh == 0 and ddw == 0:
                src = x                                       # center tap: no mask
            else:
                src = pltpu.roll(x, shift=(-d) % L, axis=1) * mask_ref[t]
            wt = w_ref[t]                                     # (Cout, Cin)
            if cin == 1:
                contrib = wt * src                            # (Cout,1)*(1,L) outer
            else:
                contrib = jnp.dot(wt, src, preferred_element_type=jnp.float32)
            acc = contrib if acc is None else acc + contrib
            t += 1
    out = acc + b_ref[...]                                    # (Cout,1) lane-broadcast
    if residual is not None:
        out = out + residual
    return jnp.maximum(out, 0.0)


def _maxpool2x2(x, sel_ref, img_w):
    """nn.MaxPool2d(2) on channel-major (C, L) -> (C, L // 4).

    Tree-max of each 2x2 window into its top-left lane (2 rolls + 2 maxes), then one
    precomputed one-hot downselect matmul.  Selected lanes always have even row/col,
    so wrapped / cross-image lanes from the rolls are never read.
    """
    L = x.shape[1]
    m = jnp.maximum(x, pltpu.roll(x, shift=L - 1, axis=1))        # max(x[p], x[p+1])
    m = jnp.maximum(m, pltpu.roll(m, shift=L - img_w, axis=1))    # ... and next row
    return jnp.dot(m, sel_ref[...], preferred_element_type=jnp.float32)


def _fc_softmax(z, wfc_ref, bfc_ref, *, p2, bt):
    """softmax(flatten_per_image(z) @ Wfc + b) for the Bt packed images.

    z:       (C2, Bt*P2) pooled features, lane q = b*P2 + p (p = i*(W//4) + j).
    wfc_ref: (P2, C2, K) ref; wfc[p, c, k] == torch fc.weight[k, c*P2 + p]
             (NCHW flatten order).
    bfc_ref: (1, K) ref.
    Returns a list of Bt probability rows of shape (1, K).
    """
    c2 = z.shape[0]
    k = bfc_ref.shape[-1]
    rows = []
    for b in range(bt):
        t = jnp.zeros((c2, k), jnp.float32)
        for p in range(p2):                                   # P2 = 16, unrolled
            q = b * p2 + p
            t = t + z[:, q:q + 1] * wfc_ref[p]                # (C2,1) * (C2,K)
        logits = jnp.sum(t, axis=0, keepdims=True) + bfc_ref[...]   # (1, K)
        mx = jnp.max(logits, axis=-1, keepdims=True)
        e = jnp.exp(logits - mx)
        rows.append(e / jnp.sum(e, axis=-1, keepdims=True))   # exact softmax
    return rows


def _net1_kernel(x_ref, mask1_ref, mask2_ref, sel1_ref, sel2_ref,
                 c1w, c1b, w11, b11, w12, b12,
                 c2w, c2b, w21, b21, w22, b22,
                 fcw, fcb, o_ref, *, img, bt):
    """Whole Net1 forward for Bt packed images; all intermediates stay in VMEM."""
    x = x_ref[0]                                              # (Cin, Bt*img*img)
    a = _conv3x3_relu(x, c1w, c1b, mask1_ref, img)            # conv1 + relu
    r = _conv3x3_relu(a, w11, b11, mask1_ref, img)            # rb1.conv1 + relu
    a = _conv3x3_relu(r, w12, b12, mask1_ref, img, residual=a)  # rb1.conv2 + id + relu
    a = _maxpool2x2(a, sel1_ref, img)
    img2 = img // 2
    a = _conv3x3_relu(a, c2w, c2b, mask2_ref, img2)           # conv2 + relu
    r = _conv3x3_relu(a, w21, b21, mask2_ref, img2)           # rb2.conv1 + relu
    a = _conv3x3_relu(r, w22, b22, mask2_ref, img2, residual=a)  # rb2.conv2 + id + relu
    a = _maxpool2x2(a, sel2_ref, img2)                        # (2NF, Bt*(img//4)**2)
    probs = _fc_softmax(a, fcw, fcb, p2=(img // 4) ** 2, bt=bt)
    for b in range(bt):
        o_ref[:, b:b + 1, :] = probs[b][None]
    # TODO(synk): nn.Dropout(0.5) is declared in Net1.__init__ but never applied in
    # forward(), so it is intentionally not implemented.


# ----------------------------- precomputed constants ------------------------------ #

def _conv_tap_masks(h, w, bt):
    """(9, 1, Bt*h*w) f32 validity masks, tap t = (ddh+1)*3 + (ddw+1)."""
    hw = h * w
    p = jnp.arange(bt * hw, dtype=jnp.int32) % hw
    i, j = p // w, p % w
    masks = []
    for ddh in (-1, 0, 1):
        for ddw in (-1, 0, 1):
            ok = ((i + ddh >= 0) & (i + ddh < h) &
                  (j + ddw >= 0) & (j + ddw < w))
            masks.append(ok.astype(jnp.float32))
    return jnp.stack(masks, axis=0).reshape(9, 1, bt * hw)


def _pool_select(h, w, bt):
    """(Bt*h*w, Bt*(h//2)*(w//2)) one-hot downselect: picks the top-left lane of
    every 2x2 window, block-diagonal over the Bt packed images."""
    ho, wo = h // 2, w // 2
    hw, hwo = h * w, ho * wo
    q = jnp.arange(bt * hwo, dtype=jnp.int32)
    b, r = q // hwo, q % hwo
    i, j = r // wo, r % wo
    src = b * hw + (2 * i) * w + (2 * j)
    return jnp.zeros((bt * hw, bt * hwo), jnp.float32).at[src, q].set(1.0)


# ------------------------------------ wrapper ------------------------------------ #

def _const_spec(arr):
    """Whole-array block with a constant index map -> DMA'd once, stays resident."""
    return pl.BlockSpec(arr.shape, lambda g, _n=arr.ndim: (0,) * _n)


def net1_forward(x_nchw, params, *, images_per_block=2):
    n, cin, h, w = x_nchw.shape
    assert h == w and h % 4 == 0, "kernel assumes square images divisible by 4"
    bt = images_per_block
    assert n % bt == 0, "batch must be divisible by images_per_block"
    nb = n // bt
    hw = h * w
    k = params["fc_b"].shape[-1]

    # Single cheap layout transform at the kernel boundary:
    # NCHW -> (nb, Cin, Bt*H*W), Bt images packed along the lane axis.
    x = x_nchw.reshape(nb, bt, cin, hw).transpose(0, 2, 1, 3).reshape(nb, cin, bt * hw)

    # Host-precomputed constants (boundary masks + pool downselects).
    mask1 = _conv_tap_masks(h, w, bt)
    mask2 = _conv_tap_masks(h // 2, w // 2, bt)
    sel1 = _pool_select(h, w, bt)
    sel2 = _pool_select(h // 2, w // 2, bt)

    const_args = [
        mask1, mask2, sel1, sel2,
        params["conv1_w"], params["conv1_b"],
        params["rb1_c1_w"], params["rb1_c1_b"],
        params["rb1_c2_w"], params["rb1_c2_b"],
        params["conv2_w"], params["conv2_b"],
        params["rb2_c1_w"], params["rb2_c1_b"],
        params["rb2_c2_w"], params["rb2_c2_b"],
        params["fc_w"], params["fc_b"],
    ]
    in_specs = [pl.BlockSpec((1, cin, bt * hw), lambda g: (g, 0, 0))]
    in_specs += [_const_spec(a) for a in const_args]

    out = pl.pallas_call(
        partial(_net1_kernel, img=h, bt=bt),
        grid=(nb,),
        in_specs=in_specs,
        out_specs=pl.BlockSpec((1, bt, k), lambda g: (g, 0, 0)),
        out_shape=jax.ShapeDtypeStruct((nb, bt, k), jnp.float32),
        compiler_params=pltpu.CompilerParams(
            dimension_semantics=("parallel",)),   # v7x: shard grid steps over 2 TCs
    )(x, *const_args)
    return out.reshape(n, k)


# ----------------------------- deterministic params ------------------------------ #

def init_params(key, *, num_classes, num_channels, img_size, num_filters):
    """PyTorch-style U(-1/sqrt(fan_in), 1/sqrt(fan_in)) init, stored directly in the
    kernel's layouts:
      conv w: (9, Cout, Cin), tap t = kh*3 + kw  (== torch w.permute(2,3,0,1).reshape)
      conv b: (Cout, 1)
      fc   w: (P2, C2, K), P2 = (img//4)**2; fc_w[p, c, k] == torch fc.weight[k, c*P2+p]
      fc   b: (1, K)
    """
    def conv_init(kk, cin, cout):
        kw_, kb_ = jax.random.split(kk)
        bound = 1.0 / (9.0 * cin) ** 0.5
        wgt = jax.random.uniform(kw_, (9, cout, cin), jnp.float32, -bound, bound)
        bia = jax.random.uniform(kb_, (cout, 1), jnp.float32, -bound, bound)
        return wgt, bia

    def fc_init(kk, p2, c2, nk):
        kw_, kb_ = jax.random.split(kk)
        bound = 1.0 / float(p2 * c2) ** 0.5
        wgt = jax.random.uniform(kw_, (p2, c2, nk), jnp.float32, -bound, bound)
        bia = jax.random.uniform(kb_, (1, nk), jnp.float32, -bound, bound)
        return wgt, bia

    ks = jax.random.split(key, 7)
    nf, nf2 = num_filters, num_filters * 2
    p = {}
    p["conv1_w"], p["conv1_b"] = conv_init(ks[0], num_channels, nf)
    p["rb1_c1_w"], p["rb1_c1_b"] = conv_init(ks[1], nf, nf)
    p["rb1_c2_w"], p["rb1_c2_b"] = conv_init(ks[2], nf, nf)
    p["conv2_w"], p["conv2_b"] = conv_init(ks[3], nf, nf2)
    p["rb2_c1_w"], p["rb2_c1_b"] = conv_init(ks[4], nf2, nf2)
    p["rb2_c2_w"], p["rb2_c2_b"] = conv_init(ks[5], nf2, nf2)
    p2 = (img_size // 4) * (img_size // 4)
    p["fc_w"], p["fc_b"] = fc_init(ks[6], p2, nf2, num_classes)
    return p


# -------------------------------------- main ------------------------------------- #

if __name__ == "__main__":
    NUM_CLASSES, NUM_CHANNELS, IMG_SIZE, NUM_FILTERS = 10, 1, 16, 8
    BATCH, IMAGES_PER_BLOCK = 8, 2      # grid = 4 steps (even -> both v7x TCs busy)

    key = jax.random.PRNGKey(0)
    kx, kp = jax.random.split(key)
    x = jax.random.normal(kx, (BATCH, NUM_CHANNELS, IMG_SIZE, IMG_SIZE), jnp.float32)
    params = init_params(kp, num_classes=NUM_CLASSES, num_channels=NUM_CHANNELS,
                         img_size=IMG_SIZE, num_filters=NUM_FILTERS)

    fwd = jax.jit(partial(net1_forward, images_per_block=IMAGES_PER_BLOCK))
    probs = jax.block_until_ready(fwd(x, params))

    assert probs.shape == (BATCH, NUM_CLASSES), probs.shape
    assert bool(jnp.all(jnp.isfinite(probs)))
    assert bool(jnp.allclose(jnp.sum(probs, axis=1), 1.0, atol=1e-5))
    print("KERNEL_OK")
</pallas_src>

<mosaic_0001>
module attributes {stable_mosaic.version = 11 : i64} {
  func.func @_net1_kernel(%arg0: i32, %arg1: memref<1x1x512xf32, #tpu.memory_space<vmem>>, %arg2: memref<9x1x512xf32, #tpu.memory_space<vmem>>, %arg3: memref<9x1x128xf32, #tpu.memory_space<vmem>>, %arg4: memref<512x128xf32, #tpu.memory_space<vmem>>, %arg5: memref<128x32xf32, #tpu.memory_space<vmem>>, %arg6: memref<9x8x1xf32, #tpu.memory_space<vmem>>, %arg7: memref<8x1xf32, #tpu.memory_space<vmem>>, %arg8: memref<9x8x8xf32, #tpu.memory_space<vmem>>, %arg9: memref<8x1xf32, #tpu.memory_space<vmem>>, %arg10: memref<9x8x8xf32, #tpu.memory_space<vmem>>, %arg11: memref<8x1xf32, #tpu.memory_space<vmem>>, %arg12: memref<9x16x8xf32, #tpu.memory_space<vmem>>, %arg13: memref<16x1xf32, #tpu.memory_space<vmem>>, %arg14: memref<9x16x16xf32, #tpu.memory_space<vmem>>, %arg15: memref<16x1xf32, #tpu.memory_space<vmem>>, %arg16: memref<9x16x16xf32, #tpu.memory_space<vmem>>, %arg17: memref<16x1xf32, #tpu.memory_space<vmem>>, %arg18: memref<16x16x10xf32, #tpu.memory_space<vmem>>, %arg19: memref<1x10xf32, #tpu.memory_space<vmem>>, %arg20: memref<1x2x10xf32, #tpu.memory_space<vmem>>) attributes {dimension_semantics = [#tpu.dimension_semantics<parallel>], iteration_bounds = array<i64: 4>, scalar_prefetch = 0 : i64, scratch_operands = 0 : i64, tpu.core_type = #tpu.core_type<tc>, window_params = [{transform_indices = @transform_0, window_bounds = array<i64: 1, 1, 512>}, {pipeline_mode = #tpu.pipeline_mode<synchronous>, transform_indices = @transform_1, window_bounds = array<i64: 9, 1, 512>}, {pipeline_mode = #tpu.pipeline_mode<synchronous>, transform_indices = @transform_2, window_bounds = array<i64: 9, 1, 128>}, {pipeline_mode = #tpu.pipeline_mode<synchronous>, transform_indices = @transform_3, window_bounds = array<i64: 512, 128>}, {pipeline_mode = #tpu.pipeline_mode<synchronous>, transform_indices = @transform_4, window_bounds = array<i64: 128, 32>}, {pipeline_mode = #tpu.pipeline_mode<synchronous>, transform_indices = @transform_5, window_bounds = array<i64: 9, 8, 1>}, {pipeline_mode = #tpu.pipeline_mode<synchronous>, transform_indices = @transform_6, window_bounds = array<i64: 8, 1>}, {pipeline_mode = #tpu.pipeline_mode<synchronous>, transform_indices = @transform_7, window_bounds = array<i64: 9, 8, 8>}, {pipeline_mode = #tpu.pipeline_mode<synchronous>, transform_indices = @transform_8, window_bounds = array<i64: 8, 1>}, {pipeline_mode = #tpu.pipeline_mode<synchronous>, transform_indices = @transform_9, window_bounds = array<i64: 9, 8, 8>}, {pipeline_mode = #tpu.pipeline_mode<synchronous>, transform_indices = @transform_10, window_bounds = array<i64: 8, 1>}, {pipeline_mode = #tpu.pipeline_mode<synchronous>, transform_indices = @transform_11, window_bounds = array<i64: 9, 16, 8>}, {pipeline_mode = #tpu.pipeline_mode<synchronous>, transform_indices = @transform_12, window_bounds = array<i64: 16, 1>}, {pipeline_mode = #tpu.pipeline_mode<synchronous>, transform_indices = @transform_13, window_bounds = array<i64: 9, 16, 16>}, {pipeline_mode = #tpu.pipeline_mode<synchronous>, transform_indices = @transform_14, window_bounds = array<i64: 16, 1>}, {pipeline_mode = #tpu.pipeline_mode<synchronous>, transform_indices = @transform_15, window_bounds = array<i64: 9, 16, 16>}, {pipeline_mode = #tpu.pipeline_mode<synchronous>, transform_indices = @transform_16, window_bounds = array<i64: 16, 1>}, {pipeline_mode = #tpu.pipeline_mode<synchronous>, transform_indices = @transform_17, window_bounds = array<i64: 16, 16, 10>}, {pipeline_mode = #tpu.pipeline_mode<synchronous>, transform_indices = @transform_18, window_bounds = array<i64: 1, 10>}, {transform_indices = @transform_19, window_bounds = array<i64: 1, 2, 10>}]} {
    %c0 = arith.constant 0 : index
    %c0_0 = arith.constant 0 : index
    %c0_1 = arith.constant 0 : index
    %0 = vector.load %arg1[%c0, %c0_0, %c0_1] : memref<1x1x512xf32, #tpu.memory_space<vmem>>, vector<1x1x512xf32>
    %1 = vector.shape_cast %0 : vector<1x1x512xf32> to vector<1x512xf32>
    %c17_i32 = arith.constant 17 : i32
    %2 = tpu.dynamic_rotate %1 by %c17_i32 dim 1 : vector<1x512xf32>, i32 -> vector<1x512xf32>
    %c0_2 = arith.constant 0 : index
    %c0_3 = arith.constant 0 : index
    %c0_4 = arith.constant 0 : index
    %3 = vector.load %arg2[%c0_2, %c0_3, %c0_4] : memref<9x1x512xf32, #tpu.memory_space<vmem>>, vector<1x1x512xf32>
    %4 = vector.shape_cast %3 : vector<1x1x512xf32> to vector<1x512xf32>
    %5 = arith.mulf %2, %4 : vector<1x512xf32>
    %c0_5 = arith.constant 0 : index
    %c0_6 = arith.constant 0 : index
    %c0_7 = arith.constant 0 : index
    %6 = vector.load %arg6[%c0_5, %c0_6, %c0_7] : memref<9x8x1xf32, #tpu.memory_space<vmem>>, vector<1x8x1xf32>
    %7 = vector.shape_cast %6 : vector<1x8x1xf32> to vector<8x1xf32>
    %8 = vector.broadcast %7 : vector<8x1xf32> to vector<8x512xf32>
    %9 = vector.broadcast %5 : vector<1x512xf32> to vector<8x512xf32>
    %10 = arith.mulf %8, %9 : vector<8x512xf32>
    %c16_i32 = arith.constant 16 : i32
    %11 = tpu.dynamic_rotate %1 by %c16_i32 dim 1 : vector<1x512xf32>, i32 -> vector<1x512xf32>
    %c1 = arith.constant 1 : index
    %c0_8 = arith.constant 0 : index
    %c0_9 = arith.constant 0 : index
    %12 = vector.load %arg2[%c1, %c0_8, %c0_9] : memref<9x1x512xf32, #tpu.memory_space<vmem>>, vector<1x1x512xf32>
    %13 = vector.shape_cast %12 : vector<1x1x512xf32> to vector<1x512xf32>
    %14 = arith.mulf %11, %13 : vector<1x512xf32>
    %c1_10 = arith.constant 1 : index
    %c0_11 = arith.constant 0 : index
    %c0_12 = arith.constant 0 : index
    %15 = vector.load %arg6[%c1_10, %c0_11, %c0_12] : memref<9x8x1xf32, #tpu.memory_space<vmem>>, vector<1x8x1xf32>
    %16 = vector.shape_cast %15 : vector<1x8x1xf32> to vector<8x1xf32>
    %17 = vector.broadcast %16 : vector<8x1xf32> to vector<8x512xf32>
    %18 = vector.broadcast %14 : vector<1x512xf32> to vector<8x512xf32>
    %19 = arith.mulf %17, %18 : vector<8x512xf32>
    %20 = arith.addf %10, %19 : vector<8x512xf32>
    %c15_i32 = arith.constant 15 : i32
    %21 = tpu.dynamic_rotate %1 by %c15_i32 dim 1 : vector<1x512xf32>, i32 -> vector<1x512xf32>
    %c2 = arith.constant 2 : index
    %c0_13 = arith.constant 0 : index
    %c0_14 = arith.constant 0 : index
    %22 = vector.load %arg2[%c2, %c0_13, %c0_14] : memref<9x1x512xf32, #tpu.memory_space<vmem>>, vector<1x1x512xf32>
    %23 = vector.shape_cast %22 : vector<1x1x512xf32> to vector<1x512xf32>
    %24 = arith.mulf %21, %23 : vector<1x512xf32>
    %c2_15 = arith.constant 2 : index
    %c0_16 = arith.constant 0 : index
    %c0_17 = arith.constant 0 : index
    %25 = vector.load %arg6[%c2_15, %c0_16, %c0_17] : memref<9x8x1xf32, #tpu.memory_space<vmem>>, vector<1x8x1xf32>
    %26 = vector.shape_cast %25 : vector<1x8x1xf32> to vector<8x1xf32>
    %27 = vector.broadcast %26 : vector<8x1xf32> to vector<8x512xf32>
    %28 = vector.broadcast %24 : vector<1x512xf32> to vector<8x512xf32>
    %29 = arith.mulf %27, %28 : vector<8x512xf32>
    %30 = arith.addf %20, %29 : vector<8x512xf32>
    %c1_i32 = arith.constant 1 : i32
    %31 = tpu.dynamic_rotate %1 by %c1_i32 dim 1 : vector<1x512xf32>, i32 -> vector<1x512xf32>
    %c3 = arith.constant 3 : index
    %c0_18 = arith.constant 0 : index
    %c0_19 = arith.constant 0 : index
    %32 = vector.load %arg2[%c3, %c0_18, %c0_19] : memref<9x1x512xf32, #tpu.memory_space<vmem>>, vector<1x1x512xf32>
    %33 = vector.shape_cast %32 : vector<1x1x512xf32> to vector<1x512xf32>
    %34 = arith.mulf %31, %33 : vector<1x512xf32>
    %c3_20 = arith.constant 3 : index
    %c0_21 = arith.constant 0 : index
    %c0_22 = arith.constant 0 : index
    %35 = vector.load %arg6[%c3_20, %c0_21, %c0_22] : memref<9x8x1xf32, #tpu.memory_space<vmem>>, vector<1x8x1xf32>
    %36 = vector.shape_cast %35 : vector<1x8x1xf32> to vector<8x1xf32>
    %37 = vector.broadcast %36 : vector<8x1xf32> to vector<8x512xf32>
    %38 = vector.broadcast %34 : vector<1x512xf32> to vector<8x512xf32>
    %39 = arith.mulf %37, %38 : vector<8x512xf32>
    %40 = arith.addf %30, %39 : vector<8x512xf32>
    %c4 = arith.constant 4 : index
    %c0_23 = arith.constant 0 : index
    %c0_24 = arith.constant 0 : index
    %41 = vector.load %arg6[%c4, %c0_23, %c0_24] : memref<9x8x1xf32, #tpu.memory_space<vmem>>, vector<1x8x1xf32>
    %42 = vector.shape_cast %41 : vector<1x8x1xf32> to vector<8x1xf32>
    %43 = vector.broadcast %42 : vector<8x1xf32> to vector<8x512xf32>
    %44 = vector.broadcast %1 : vector<1x512xf32> to vector<8x512xf32>
    %45 = arith.mulf %43, %44 : vector<8x512xf32>
    %46 = arith.addf %40, %45 : vector<8x512xf32>
    %c511_i32 = arith.constant 511 : i32
    %47 = tpu.dynamic_rotate %1 by %c511_i32 dim 1 : vector<1x512xf32>, i32 -> vector<1x512xf32>
    %c5 = arith.constant 5 : index
    %c0_25 = arith.constant 0 : index
    %c0_26 = arith.constant 0 : index
    %48 = vector.load %arg2[%c5, %c0_25, %c0_26] : memref<9x1x512xf32, #tpu.memory_space<vmem>>, vector<1x1x512xf32>
    %49 = vector.shape_cast %48 : vector<1x1x512xf32> to vector<1x512xf32>
    %50 = arith.mulf %47, %49 : vector<1x512xf32>
    %c5_27 = arith.constant 5 : index
    %c0_28 = arith.constant 0 : index
    %c0_29 = arith.constant 0 : index
    %51 = vector.load %arg6[%c5_27, %c0_28, %c0_29] : memref<9x8x1xf32, #tpu.memory_space<vmem>>, vector<1x8x1xf32>
    %52 = vector.shape_cast %51 : vector<1x8x1xf32> to vector<8x1xf32>
    %53 = vector.broadcast %52 : vector<8x1xf32> to vector<8x512xf32>
    %54 = vector.broadcast %50 : vector<1x512xf32> to vector<8x512xf32>
    %55 = arith.mulf %53, %54 : vector<8x512xf32>
    %56 = arith.addf %46, %55 : vector<8x512xf32>
    %c497_i32 = arith.constant 497 : i32
    %57 = tpu.dynamic_rotate %1 by %c497_i32 dim 1 : vector<1x512xf32>, i32 -> vector<1x512xf32>
    %c6 = arith.constant 6 : index
    %c0_30 = arith.constant 0 : index
    %c0_31 = arith.constant 0 : index
    %58 = vector.load %arg2[%c6, %c0_30, %c0_31] : memref<9x1x512xf32, #tpu.memory_space<vmem>>, vector<1x1x512xf32>
    %59 = vector.shape_cast %58 : vector<1x1x512xf32> to vector<1x512xf32>
    %60 = arith.mulf %57, %59 : vector<1x512xf32>
    %c6_32 = arith.constant 6 : index
    %c0_33 = arith.constant 0 : index
    %c0_34 = arith.constant 0 : index
    %61 = vector.load %arg6[%c6_32, %c0_33, %c0_34] : memref<9x8x1xf32, #tpu.memory_space<vmem>>, vector<1x8x1xf32>
    %62 = vector.shape_cast %61 : vector<1x8x1xf32> to vector<8x1xf32>
    %63 = vector.broadcast %62 : vector<8x1xf32> to vector<8x512xf32>
    %64 = vector.broadcast %60 : vector<1x512xf32> to vector<8x512xf32>
    %65 = arith.mulf %63, %64 : vector<8x512xf32>
    %66 = arith.addf %56, %65 : vector<8x512xf32>
    %c496_i32 = arith.constant 496 : i32
    %67 = tpu.dynamic_rotate %1 by %c496_i32 dim 1 : vector<1x512xf32>, i32 -> vector<1x512xf32>
    %c7 = arith.constant 7 : index
    %c0_35 = arith.constant 0 : index
    %c0_36 = arith.constant 0 : index
    %68 = vector.load %arg2[%c7, %c0_35, %c0_36] : memref<9x1x512xf32, #tpu.memory_space<vmem>>, vector<1x1x512xf32>
    %69 = vector.shape_cast %68 : vector<1x1x512xf32> to vector<1x512xf32>
    %70 = arith.mulf %67, %69 : vector<1x512xf32>
    %c7_37 = arith.constant 7 : index
    %c0_38 = arith.constant 0 : index
    %c0_39 = arith.constant 0 : index
    %71 = vector.load %arg6[%c7_37, %c0_38, %c0_39] : memref<9x8x1xf32, #tpu.memory_space<vmem>>, vector<1x8x1xf32>
    %72 = vector.shape_cast %71 : vector<1x8x1xf32> to vector<8x1xf32>
    %73 = vector.broadcast %72 : vector<8x1xf32> to vector<8x512xf32>
    %74 = vector.broadcast %70 : vector<1x512xf32> to vector<8x512xf32>
    %75 = arith.mulf %73, %74 : vector<8x512xf32>
    %76 = arith.addf %66, %75 : vector<8x512xf32>
    %c495_i32 = arith.constant 495 : i32
    %77 = tpu.dynamic_rotate %1 by %c495_i32 dim 1 : vector<1x512xf32>, i32 -> vector<1x512xf32>
    %c8 = arith.constant 8 : index
    %c0_40 = arith.constant 0 : index
    %c0_41 = arith.constant 0 : index
    %78 = vector.load %arg2[%c8, %c0_40, %c0_41] : memref<9x1x512xf32, #tpu.memory_space<vmem>>, vector<1x1x512xf32>
    %79 = vector.shape_cast %78 : vector<1x1x512xf32> to vector<1x512xf32>
    %80 = arith.mulf %77, %79 : vector<1x512xf32>
    %c8_42 = arith.constant 8 : index
    %c0_43 = arith.constant 0 : index
    %c0_44 = arith.constant 0 : index
    %81 = vector.load %arg6[%c8_42, %c0_43, %c0_44] : memref<9x8x1xf32, #tpu.memory_space<vmem>>, vector<1x8x1xf32>
    %82 = vector.shape_cast %81 : vector<1x8x1xf32> to vector<8x1xf32>
    %83 = vector.broadcast %82 : vector<8x1xf32> to vector<8x512xf32>
    %84 = vector.broadcast %80 : vector<1x512xf32> to vector<8x512xf32>
    %85 = arith.mulf %83, %84 : vector<8x512xf32>
    %86 = arith.addf %76, %85 : vector<8x512xf32>
    %c0_45 = arith.constant 0 : index
    %c0_46 = arith.constant 0 : index
    %87 = vector.load %arg7[%c0_45, %c0_46] : memref<8x1xf32, #tpu.memory_space<vmem>>, vector<8x1xf32>
    %88 = vector.broadcast %87 : vector<8x1xf32> to vector<8x512xf32>
    %89 = arith.addf %86, %88 : vector<8x512xf32>
    %cst = arith.constant 0.000000e+00 : f32
    %90 = vector.broadcast %cst : f32 to vector<8x512xf32>
    %91 = arith.maximumf %89, %90 : vector<8x512xf32>
    %c17_i32_47 = arith.constant 17 : i32
    %92 = tpu.dynamic_rotate %91 by %c17_i32_47 dim 1 : vector<8x512xf32>, i32 -> vector<8x512xf32>
    %c0_48 = arith.constant 0 : index
    %c0_49 = arith.constant 0 : index
    %c0_50 = arith.constant 0 : index
    %93 = vector.load %arg2[%c0_48, %c0_49, %c0_50] : memref<9x1x512xf32, #tpu.memory_space<vmem>>, vector<1x1x512xf32>
    %94 = vector.shape_cast %93 : vector<1x1x512xf32> to vector<1x512xf32>
    %95 = vector.broadcast %94 : vector<1x512xf32> to vector<8x512xf32>
    %96 = arith.mulf %92, %95 : vector<8x512xf32>
    %c0_51 = arith.constant 0 : index
    %c0_52 = arith.constant 0 : index
    %c0_53 = arith.constant 0 : index
    %97 = vector.load %arg8[%c0_51, %c0_52, %c0_53] : memref<9x8x8xf32, #tpu.memory_space<vmem>>, vector<1x8x8xf32>
    %98 = vector.shape_cast %97 : vector<1x8x8xf32> to vector<8x8xf32>
    %cst_54 = arith.constant dense<0.000000e+00> : vector<8x512xf32>
    %99 = tpu.matmul %98, %96, %cst_54 {dimension_numbers = #tpu.dot_dimension_numbers<[1], [0], [0], [1], [0, 0, 1, 1], [], []>} : vector<8x8xf32>, vector<8x512xf32>, vector<8x512xf32> -> vector<8x512xf32>
    %c16_i32_55 = arith.constant 16 : i32
    %100 = tpu.dynamic_rotate %91 by %c16_i32_55 dim 1 : vector<8x512xf32>, i32 -> vector<8x512xf32>
    %c1_56 = arith.constant 1 : index
    %c0_57 = arith.constant 0 : index
    %c0_58 = arith.constant 0 : index
    %101 = vector.load %arg2[%c1_56, %c0_57, %c0_58] : memref<9x1x512xf32, #tpu.memory_space<vmem>>, vector<1x1x512xf32>
    %102 = vector.shape_cast %101 : vector<1x1x512xf32> to vector<1x512xf32>
    %103 = vector.broadcast %102 : vector<1x512xf32> to vector<8x512xf32>
    %104 = arith.mulf %100, %103 : vector<8x512xf32>
    %c1_59 = arith.constant 1 : index
    %c0_60 = arith.constant 0 : index
    %c0_61 = arith.constant 0 : index
    %105 = vector.load %arg8[%c1_59, %c0_60, %c0_61] : memref<9x8x8xf32, #tpu.memory_space<vmem>>, vector<1x8x8xf32>
    %106 = vector.shape_cast %105 : vector<1x8x8xf32> to vector<8x8xf32>
    %cst_62 = arith.constant dense<0.000000e+00> : vector<8x512xf32>
    %107 = tpu.matmul %106, %104, %cst_62 {dimension_numbers = #tpu.dot_dimension_numbers<[1], [0], [0], [1], [0, 0, 1, 1], [], []>} : vector<8x8xf32>, vector<8x512xf32>, vector<8x512xf32> -> vector<8x512xf32>
    %108 = arith.addf %99, %107 : vector<8x512xf32>
    %c15_i32_63 = arith.constant 15 : i32
    %109 = tpu.dynamic_rotate %91 by %c15_i32_63 dim 1 : vector<8x512xf32>, i32 -> vector<8x512xf32>
    %c2_64 = arith.constant 2 : index
    %c0_65 = arith.constant 0 : index
    %c0_66 = arith.constant 0 : index
    %110 = vector.load %arg2[%c2_64, %c0_65, %c0_66] : memref<9x1x512xf32, #tpu.memory_space<vmem>>, vector<1x1x512xf32>
    %111 = vector.shape_cast %110 : vector<1x1x512xf32> to vector<1x512xf32>
    %112 = vector.broadcast %111 : vector<1x512xf32> to vector<8x512xf32>
    %113 = arith.mulf %109, %112 : vector<8x512xf32>
    %c2_67 = arith.constant 2 : index
    %c0_68 = arith.constant 0 : index
    %c0_69 = arith.constant 0 : index
    %114 = vector.load %arg8[%c2_67, %c0_68, %c0_69] : memref<9x8x8xf32, #tpu.memory_space<vmem>>, vector<1x8x8xf32>
    %115 = vector.shape_cast %114 : vector<1x8x8xf32> to vector<8x8xf32>
    %cst_70 = arith.constant dense<0.000000e+00> : vector<8x512xf32>
    %116 = tpu.matmul %115, %113, %cst_70 {dimension_numbers = #tpu.dot_dimension_numbers<[1], [0], [0], [1], [0, 0, 1, 1], [], []>} : vector<8x8xf32>, vector<8x512xf32>, vector<8x512xf32> -> vector<8x512xf32>
    %117 = arith.addf %108, %116 : vector<8x512xf32>
    %c1_i32_71 = arith.constant 1 : i32
    %118 = tpu.dynamic_rotate %91 by %c1_i32_71 dim 1 : vector<8x512xf32>, i32 -> vector<8x512xf32>
    %c3_72 = arith.constant 3 : index
    %c0_73 = arith.constant 0 : index
    %c0_74 = arith.constant 0 : index
    %119 = vector.load %arg2[%c3_72, %c0_73, %c0_74] : memref<9x1x512xf32, #tpu.memory_space<vmem>>, vector<1x1x512xf32>
    %120 = vector.shape_cast %119 : vector<1x1x512xf32> to vector<1x512xf32>
    %121 = vector.broadcast %120 : vector<1x512xf32> to vector<8x512xf32>
    %122 = arith.mulf %118, %121 : vector<8x512xf32>
    %c3_75 = arith.constant 3 : index
    %c0_76 = arith.constant 0 : index
    %c0_77 = arith.constant 0 : index
    %123 = vector.load %arg8[%c3_75, %c0_76, %c0_77] : memref<9x8x8xf32, #tpu.memory_space<vmem>>, vector<1x8x8xf32>
    %124 = vector.shape_cast %123 : vector<1x8x8xf32> to vector<8x8xf32>
    %cst_78 = arith.constant dense<0.000000e+00> : vector<8x512xf32>
    %125 = tpu.matmul %124, %122, %cst_78 {dimension_numbers = #tpu.dot_dimension_numbers<[1], [0], [0], [1], [0, 0, 1, 1], [], []>} : vector<8x8xf32>, vector<8x512xf32>, vector<8x512xf32> -> vector<8x512xf32>
    %126 = arith.addf %117, %125 : vector<8x512xf32>
    %c4_79 = arith.constant 4 : index
    %c0_80 = arith.constant 0 : index
    %c0_81 = arith.constant 0 : index
    %127 = vector.load %arg8[%c4_79, %c0_80, %c0_81] : memref<9x8x8xf32, #tpu.memory_space<vmem>>, vector<1x8x8xf32>
    %128 = vector.shape_cast %127 : vector<1x8x8xf32> to vector<8x8xf32>
    %cst_82 = arith.constant dense<0.000000e+00> : vector<8x512xf32>
    %129 = tpu.matmul %128, %91, %cst_82 {dimension_numbers = #tpu.dot_dimension_numbers<[1], [0], [0], [1], [0, 0, 1, 1], [], []>} : vector<8x8xf32>, vector<8x512xf32>, vector<8x512xf32> -> vector<8x512xf32>
    %130 = arith.addf %126, %129 : vector<8x512xf32>
    %c511_i32_83 = arith.constant 511 : i32
    %131 = tpu.dynamic_rotate %91 by %c511_i32_83 dim 1 : vector<8x512xf32>, i32 -> vector<8x512xf32>
    %c5_84 = arith.constant 5 : index
    %c0_85 = arith.constant 0 : index
    %c0_86 = arith.constant 0 : index
    %132 = vector.load %arg2[%c5_84, %c0_85, %c0_86] : memref<9x1x512xf32, #tpu.memory_space<vmem>>, vector<1x1x512xf32>
    %133 = vector.shape_cast %132 : vector<1x1x512xf32> to vector<1x512xf32>
    %134 = vector.broadcast %133 : vector<1x512xf32> to vector<8x512xf32>
    %135 = arith.mulf %131, %134 : vector<8x512xf32>
    %c5_87 = arith.constant 5 : index
    %c0_88 = arith.constant 0 : index
    %c0_89 = arith.constant 0 : index
    %136 = vector.load %arg8[%c5_87, %c0_88, %c0_89] : memref<9x8x8xf32, #tpu.memory_space<vmem>>, vector<1x8x8xf32>
    %137 = vector.shape_cast %136 : vector<1x8x8xf32> to vector<8x8xf32>
    %cst_90 = arith.constant dense<0.000000e+00> : vector<8x512xf32>
    %138 = tpu.matmul %137, %135, %cst_90 {dimension_numbers = #tpu.dot_dimension_numbers<[1], [0], [0], [1], [0, 0, 1, 1], [], []>} : vector<8x8xf32>, vector<8x512xf32>, vector<8x512xf32> -> vector<8x512xf32>
    %139 = arith.addf %130, %138 : vector<8x512xf32>
    %c497_i32_91 = arith.constant 497 : i32
    %140 = tpu.dynamic_rotate %91 by %c497_i32_91 dim 1 : vector<8x512xf32>, i32 -> vector<8x512xf32>
    %c6_92 = arith.constant 6 : index
    %c0_93 = arith.constant 0 : index
    %c0_94 = arith.constant 0 : index
    %141 = vector.load %arg2[%c6_92, %c0_93, %c0_94] : memref<9x1x512xf32, #tpu.memory_space<vmem>>, vector<1x1x512xf32>
    %142 = vector.shape_cast %141 : vector<1x1x512xf32> to vector<1x512xf32>
    %143 = vector.broadcast %142 : vector<1x512xf32> to vector<8x512xf32>
    %144 = arith.mulf %140, %143 : vector<8x512xf32>
    %c6_95 = arith.constant 6 : index
    %c0_96 = arith.constant 0 : index
    %c0_97 = arith.constant 0 : index
    %145 = vector.load %arg8[%c6_95, %c0_96, %c0_97] : memref<9x8x8xf32, #tpu.memory_space<vmem>>, vector<1x8x8xf32>
    %146 = vector.shape_cast %145 : vector<1x8x8xf32> to vector<8x8xf32>
    %cst_98 = arith.constant dense<0.000000e+00> : vector<8x512xf32>
    %147 = tpu.matmul %146, %144, %cst_98 {dimension_numbers = #tpu.dot_dimension_numbers<[1], [0], [0], [1], [0, 0, 1, 1], [], []>} : vector<8x8xf32>, vector<8x512xf32>, vector<8x512xf32> -> vector<8x512xf32>
    %148 = arith.addf %139, %147 : vector<8x512xf32>
    %c496_i32_99 = arith.constant 496 : i32
    %149 = tpu.dynamic_rotate %91 by %c496_i32_99 dim 1 : vector<8x512xf32>, i32 -> vector<8x512xf32>
    %c7_100 = arith.constant 7 : index
    %c0_101 = arith.constant 0 : index
    %c0_102 = arith.constant 0 : index
    %150 = vector.load %arg2[%c7_100, %c0_101, %c0_102] : memref<9x1x512xf32, #tpu.memory_space<vmem>>, vector<1x1x512xf32>
    %151 = vector.shape_cast %150 : vector<1x1x512xf32> to vector<1x512xf32>
    %152 = vector.broadcast %151 : vector<1x512xf32> to vector<8x512xf32>
    %153 = arith.mulf %149, %152 : vector<8x512xf32>
    %c7_103 = arith.constant 7 : index
    %c0_104 = arith.constant 0 : index
    %c0_105 = arith.constant 0 : index
    %154 = vector.load %arg8[%c7_103, %c0_104, %c0_105] : memref<9x8x8xf32, #tpu.memory_space<vmem>>, vector<1x8x8xf32>
    %155 = vector.shape_cast %154 : vector<1x8x8xf32> to vector<8x8xf32>
    %cst_106 = arith.constant dense<0.000000e+00> : vector<8x512xf32>
    %156 = tpu.matmul %155, %153, %cst_106 {dimension_numbers = #tpu.dot_dimension_numbers<[1], [0], [0], [1], [0, 0, 1, 1], [], []>} : vector<8x8xf32>, vector<8x512xf32>, vector<8x512xf32> -> vector<8x512xf32>
    %157 = arith.addf %148, %156 : vector<8x512xf32>
    %c495_i32_107 = arith.constant 495 : i32
    %158 = tpu.dynamic_rotate %91 by %c495_i32_107 dim 1 : vector<8x512xf32>, i32 -> vector<8x512xf32>
    %c8_108 = arith.constant 8 : index
    %c0_109 = arith.constant 0 : index
    %c0_110 = arith.constant 0 : index
    %159 = vector.load %arg2[%c8_108, %c0_109, %c0_110] : memref<9x1x512xf32, #tpu.memory_space<vmem>>, vector<1x1x512xf32>
    %160 = vector.shape_cast %159 : vector<1x1x512xf32> to vector<1x512xf32>
    %161 = vector.broadcast %160 : vector<1x512xf32> to vector<8x512xf32>
    %162 = arith.mulf %158, %161 : vector<8x512xf32>
    %c8_111 = arith.constant 8 : index
    %c0_112 = arith.constant 0 : index
    %c0_113 = arith.constant 0 : index
    %163 = vector.load %arg8[%c8_111, %c0_112, %c0_113] : memref<9x8x8xf32, #tpu.memory_space<vmem>>, vector<1x8x8xf32>
    %164 = vector.shape_cast %163 : vector<1x8x8xf32> to vector<8x8xf32>
    %cst_114 = arith.constant dense<0.000000e+00> : vector<8x512xf32>
    %165 = tpu.matmul %164, %162, %cst_114 {dimension_numbers = #tpu.dot_dimension_numbers<[1], [0], [0], [1], [0, 0, 1, 1], [], []>} : vector<8x8xf32>, vector<8x512xf32>, vector<8x512xf32> -> vector<8x512xf32>
    %166 = arith.addf %157, %165 : vector<8x512xf32>
    %c0_115 = arith.constant 0 : index
    %c0_116 = arith.constant 0 : index
    %167 = vector.load %arg9[%c0_115, %c0_116] : memref<8x1xf32, #tpu.memory_space<vmem>>, vector<8x1xf32>
    %168 = vector.broadcast %167 : vector<8x1xf32> to vector<8x512xf32>
    %169 = arith.addf %166, %168 : vector<8x512xf32>
    %cst_117 = arith.constant 0.000000e+00 : f32
    %170 = vector.broadcast %cst_117 : f32 to vector<8x512xf32>
    %171 = arith.maximumf %169, %170 : vector<8x512xf32>
    %c17_i32_118 = arith.constant 17 : i32
    %172 = tpu.dynamic_rotate %171 by %c17_i32_118 dim 1 : vector<8x512xf32>, i32 -> vector<8x512xf32>
    %c0_119 = arith.constant 0 : index
    %c0_120 = arith.constant 0 : index
    %c0_121 = arith.constant 0 : index
    %173 = vector.load %arg2[%c0_119, %c0_120, %c0_121] : memref<9x1x512xf32, #tpu.memory_space<vmem>>, vector<1x1x512xf32>
    %174 = vector.shape_cast %173 : vector<1x1x512xf32> to vector<1x512xf32>
    %175 = vector.broadcast %174 : vector<1x512xf32> to vector<8x512xf32>
    %176 = arith.mulf %172, %175 : vector<8x512xf32>
    %c0_122 = arith.constant 0 : index
    %c0_123 = arith.constant 0 : index
    %c0_124 = arith.constant 0 : index
    %177 = vector.load %arg10[%c0_122, %c0_123, %c0_124] : memref<9x8x8xf32, #tpu.memory_space<vmem>>, vector<1x8x8xf32>
    %178 = vector.shape_cast %177 : vector<1x8x8xf32> to vector<8x8xf32>
    %cst_125 = arith.constant dense<0.000000e+00> : vector<8x512xf32>
    %179 = tpu.matmul %178, %176, %cst_125 {dimension_numbers = #tpu.dot_dimension_numbers<[1], [0], [0], [1], [0, 0, 1, 1], [], []>} : vector<8x8xf32>, vector<8x512xf32>, vector<8x512xf32> -> vector<8x512xf32>
    %c16_i32_126 = arith.constant 16 : i32
    %180 = tpu.dynamic_rotate %171 by %c16_i32_126 dim 1 : vector<8x512xf32>, i32 -> vector<8x512xf32>
    %c1_127 = arith.constant 1 : index
    %c0_128 = arith.constant 0 : index
    %c0_129 = arith.constant 0 : index
    %181 = vector.load %arg2[%c1_127, %c0_128, %c0_129] : memref<9x1x512xf32, #tpu.memory_space<vmem>>, vector<1x1x512xf32>
    %182 = vector.shape_cast %181 : vector<1x1x512xf32> to vector<1x512xf32>
    %183 = vector.broadcast %182 : vector<1x512xf32> to vector<8x512xf32>
    %184 = arith.mulf %180, %183 : vector<8x512xf32>
    %c1_130 = arith.constant 1 : index
    %c0_131 = arith.constant 0 : index
    %c0_132 = arith.constant 0 : index
    %185 = vector.load %arg10[%c1_130, %c0_131, %c0_132] : memref<9x8x8xf32, #tpu.memory_space<vmem>>, vector<1x8x8xf32>
    %186 = vector.shape_cast %185 : vector<1x8x8xf32> to vector<8x8xf32>
    %cst_133 = arith.constant dense<0.000000e+00> : vector<8x512xf32>
    %187 = tpu.matmul %186, %184, %cst_133 {dimension_numbers = #tpu.dot_dimension_numbers<[1], [0], [0], [1], [0, 0, 1, 1], [], []>} : vector<8x8xf32>, vector<8x512xf32>, vector<8x512xf32> -> vector<8x512xf32>
    %188 = arith.addf %179, %187 : vector<8x512xf32>
    %c15_i32_134 = arith.constant 15 : i32
    %189 = tpu.dynamic_rotate %171 by %c15_i32_134 dim 1 : vector<8x512xf32>, i32 -> vector<8x512xf32>
    %c2_135 = arith.constant 2 : index
    %c0_136 = arith.constant 0 : index
    %c0_137 = arith.constant 0 : index
    %190 = vector.load %arg2[%c2_135, %c0_136, %c0_137] : memref<9x1x512xf32, #tpu.memory_space<vmem>>, vector<1x1x512xf32>
    %191 = vector.shape_cast %190 : vector<1x1x512xf32> to vector<1x512xf32>
    %192 = vector.broadcast %191 : vector<1x512xf32> to vector<8x512xf32>
    %193 = arith.mulf %189, %192 : vector<8x512xf32>
    %c2_138 = arith.constant 2 : index
    %c0_139 = arith.constant 0 : index
    %c0_140 = arith.constant 0 : index
    %194 = vector.load %arg10[%c2_138, %c0_139, %c0_140] : memref<9x8x8xf32, #tpu.memory_space<vmem>>, vector<1x8x8xf32>
    %195 = vector.shape_cast %194 : vector<1x8x8xf32> to vector<8x8xf32>
    %cst_141 = arith.constant dense<0.000000e+00> : vector<8x512xf32>
    %196 = tpu.matmul %195, %193, %cst_141 {dimension_numbers = #tpu.dot_dimension_numbers<[1], [0], [0], [1], [0, 0, 1, 1], [], []>} : vector<8x8xf32>, vector<8x512xf32>, vector<8x512xf32> -> vector<8x512xf32>
    %197 = arith.addf %188, %196 : vector<8x512xf32>
    %c1_i32_142 = arith.constant 1 : i32
    %198 = tpu.dynamic_rotate %171 by %c1_i32_142 dim 1 : vector<8x512xf32>, i32 -> vector<8x512xf32>
    %c3_143 = arith.constant 3 : index
    %c0_144 = arith.constant 0 : index
    %c0_145 = arith.constant 0 : index
    %199 = vector.load %arg2[%c3_143, %c0_144, %c0_145] : memref<9x1x512xf32, #tpu.memory_space<vmem>>, vector<1x1x512xf32>
    %200 = vector.shape_cast %199 : vector<1x1x512xf32> to vector<1x512xf32>
    %201 = vector.broadcast %200 : vector<1x512xf32> to vector<8x512xf32>
    %202 = arith.mulf %198, %201 : vector<8x512xf32>
    %c3_146 = arith.constant 3 : index
    %c0_147 = arith.constant 0 : index
    %c0_148 = arith.constant 0 : index
    %203 = vector.load %arg10[%c3_146, %c0_147, %c0_148] : memref<9x8x8xf32, #tpu.memory_space<vmem>>, vector<1x8x8xf32>
    %204 = vector.shape_cast %203 : vector<1x8x8xf32> to vector<8x8xf32>
    %cst_149 = arith.constant dense<0.000000e+00> : vector<8x512xf32>
    %205 = tpu.matmul %204, %202, %cst_149 {dimension_numbers = #tpu.dot_dimension_numbers<[1], [0], [0], [1], [0, 0, 1, 1], [], []>} : vector<8x8xf32>, vector<8x512xf32>, vector<8x512xf32> -> vector<8x512xf32>
    %206 = arith.addf %197, %205 : vector<8x512xf32>
    %c4_150 = arith.constant 4 : index
    %c0_151 = arith.constant 0 : index
    %c0_152 = arith.constant 0 : index
    %207 = vector.load %arg10[%c4_150, %c0_151, %c0_152] : memref<9x8x8xf32, #tpu.memory_space<vmem>>, vector<1x8x8xf32>
    %208 = vector.shape_cast %207 : vector<1x8x8xf32> to vector<8x8xf32>
    %cst_153 = arith.constant dense<0.000000e+00> : vector<8x512xf32>
    %209 = tpu.matmul %208, %171, %cst_153 {dimension_numbers = #tpu.dot_dimension_numbers<[1], [0], [0], [1], [0, 0, 1, 1], [], []>} : vector<8x8xf32>, vector<8x512xf32>, vector<8x512xf32> -> vector<8x512xf32>
    %210 = arith.addf %206, %209 : vector<8x512xf32>
    %c511_i32_154 = arith.constant 511 : i32
    %211 = tpu.dynamic_rotate %171 by %c511_i32_154 dim 1 : vector<8x512xf32>, i32 -> vector<8x512xf32>
    %c5_155 = arith.constant 5 : index
    %c0_156 = arith.constant 0 : index
    %c0_157 = arith.constant 0 : index
    %212 = vector.load %arg2[%c5_155, %c0_156, %c0_157] : memref<9x1x512xf32, #tpu.memory_space<vmem>>, vector<1x1x512xf32>
    %213 = vector.shape_cast %212 : vector<1x1x512xf32> to vector<1x512xf32>
    %214 = vector.broadcast %213 : vector<1x512xf32> to vector<8x512xf32>
    %215 = arith.mulf %211, %214 : vector<8x512xf32>
    %c5_158 = arith.constant 5 : index
    %c0_159 = arith.constant 0 : index
    %c0_160 = arith.constant 0 : index
    %216 = vector.load %arg10[%c5_158, %c0_159, %c0_160] : memref<9x8x8xf32, #tpu.memory_space<vmem>>, vector<1x8x8xf32>
    %217 = vector.shape_cast %216 : vector<1x8x8xf32> to vector<8x8xf32>
    %cst_161 = arith.constant dense<0.000000e+00> : vector<8x512xf32>
    %218 = tpu.matmul %217, %215, %cst_161 {dimension_numbers = #tpu.dot_dimension_numbers<[1], [0], [0], [1], [0, 0, 1, 1], [], []>} : vector<8x8xf32>, vector<8x512xf32>, vector<8x512xf32> -> vector<8x512xf32>
    %219 = arith.addf %210, %218 : vector<8x512xf32>
    %c497_i32_162 = arith.constant 497 : i32
    %220 = tpu.dynamic_rotate %171 by %c497_i32_162 dim 1 : vector<8x512xf32>, i32 -> vector<8x512xf32>
    %c6_163 = arith.constant 6 : index
    %c0_164 = arith.constant 0 : index
    %c0_165 = arith.constant 0 : index
    %221 = vector.load %arg2[%c6_163, %c0_164, %c0_165] : memref<9x1x512xf32, #tpu.memory_space<vmem>>, vector<1x1x512xf32>
    %222 = vector.shape_cast %221 : vector<1x1x512xf32> to vector<1x512xf32>
    %223 = vector.broadcast %222 : vector<1x512xf32> to vector<8x512xf32>
    %224 = arith.mulf %220, %223 : vector<8x512xf32>
    %c6_166 = arith.constant 6 : index
    %c0_167 = arith.constant 0 : index
    %c0_168 = arith.constant 0 : index
    %225 = vector.load %arg10[%c6_166, %c0_167, %c0_168] : memref<9x8x8xf32, #tpu.memory_space<vmem>>, vector<1x8x8xf32>
    %226 = vector.shape_cast %225 : vector<1x8x8xf32> to vector<8x8xf32>
    %cst_169 = arith.constant dense<0.000000e+00> : vector<8x512xf32>
    %227 = tpu.matmul %226, %224, %cst_169 {dimension_numbers = #tpu.dot_dimension_numbers<[1], [0], [0], [1], [0, 0, 1, 1], [], []>} : vector<8x8xf32>, vector<8x512xf32>, vector<8x512xf32> -> vector<8x512xf32>
    %228 = arith.addf %219, %227 : vector<8x512xf32>
    %c496_i32_170 = arith.constant 496 : i32
    %229 = tpu.dynamic_rotate %171 by %c496_i32_170 dim 1 : vector<8x512xf32>, i32 -> vector<8x512xf32>
    %c7_171 = arith.constant 7 : index
    %c0_172 = arith.constant 0 : index
    %c0_173 = arith.constant 0 : index
    %230 = vector.load %arg2[%c7_171, %c0_172, %c0_173] : memref<9x1x512xf32, #tpu.memory_space<vmem>>, vector<1x1x512xf32>
    %231 = vector.shape_cast %230 : vector<1x1x512xf32> to vector<1x512xf32>
    %232 = vector.broadcast %231 : vector<1x512xf32> to vector<8x512xf32>
    %233 = arith.mulf %229, %232 : vector<8x512xf32>
    %c7_174 = arith.constant 7 : index
    %c0_175 = arith.constant 0 : index
    %c0_176 = arith.constant 0 : index
    %234 = vector.load %arg10[%c7_174, %c0_175, %c0_176] : memref<9x8x8xf32, #tpu.memory_space<vmem>>, vector<1x8x8xf32>
    %235 = vector.shape_cast %234 : vector<1x8x8xf32> to vector<8x8xf32>
    %cst_177 = arith.constant dense<0.000000e+00> : vector<8x512xf32>
    %236 = tpu.matmul %235, %233, %cst_177 {dimension_numbers = #tpu.dot_dimension_numbers<[1], [0], [0], [1], [0, 0, 1, 1], [], []>} : vector<8x8xf32>, vector<8x512xf32>, vector<8x512xf32> -> vector<8x512xf32>
    %237 = arith.addf %228, %236 : vector<8x512xf32>
    %c495_i32_178 = arith.constant 495 : i32
    %238 = tpu.dynamic_rotate %171 by %c495_i32_178 dim 1 : vector<8x512xf32>, i32 -> vector<8x512xf32>
    %c8_179 = arith.constant 8 : index
    %c0_180 = arith.constant 0 : index
    %c0_181 = arith.constant 0 : index
    %239 = vector.load %arg2[%c8_179, %c0_180, %c0_181] : memref<9x1x512xf32, #tpu.memory_space<vmem>>, vector<1x1x512xf32>
    %240 = vector.shape_cast %239 : vector<1x1x512xf32> to vector<1x512xf32>
    %241 = vector.broadcast %240 : vector<1x512xf32> to vector<8x512xf32>
    %242 = arith.mulf %238, %241 : vector<8x512xf32>
    %c8_182 = arith.constant 8 : index
    %c0_183 = arith.constant 0 : index
    %c0_184 = arith.constant 0 : index
    %243 = vector.load %arg10[%c8_182, %c0_183, %c0_184] : memref<9x8x8xf32, #tpu.memory_space<vmem>>, vector<1x8x8xf32>
    %244 = vector.shape_cast %243 : vector<1x8x8xf32> to vector<8x8xf32>
    %cst_185 = arith.constant dense<0.000000e+00> : vector<8x512xf32>
    %245 = tpu.matmul %244, %242, %cst_185 {dimension_numbers = #tpu.dot_dimension_numbers<[1], [0], [0], [1], [0, 0, 1, 1], [], []>} : vector<8x8xf32>, vector<8x512xf32>, vector<8x512xf32> -> vector<8x512xf32>
    %246 = arith.addf %237, %245 : vector<8x512xf32>
    %c0_186 = arith.constant 0 : index
    %c0_187 = arith.constant 0 : index
    %247 = vector.load %arg11[%c0_186, %c0_187] : memref<8x1xf32, #tpu.memory_space<vmem>>, vector<8x1xf32>
    %248 = vector.broadcast %247 : vector<8x1xf32> to vector<8x512xf32>
    %249 = arith.addf %246, %248 : vector<8x512xf32>
    %250 = arith.addf %249, %91 : vector<8x512xf32>
    %cst_188 = arith.constant 0.000000e+00 : f32
    %251 = vector.broadcast %cst_188 : f32 to vector<8x512xf32>
    %252 = arith.maximumf %250, %251 : vector<8x512xf32>
    %c511_i32_189 = arith.constant 511 : i32
    %253 = tpu.dynamic_rotate %252 by %c511_i32_189 dim 1 : vector<8x512xf32>, i32 -> vector<8x512xf32>
    %254 = arith.maximumf %252, %253 : vector<8x512xf32>
    %c496_i32_190 = arith.constant 496 : i32
    %255 = tpu.dynamic_rotate %254 by %c496_i32_190 dim 1 : vector<8x512xf32>, i32 -> vector<8x512xf32>
    %256 = arith.maximumf %254, %255 : vector<8x512xf32>
    %c0_191 = arith.constant 0 : index
    %c0_192 = arith.constant 0 : index
    %257 = vector.load %arg4[%c0_191, %c0_192] : memref<512x128xf32, #tpu.memory_space<vmem>>, vector<512x128xf32>
    %cst_193 = arith.constant dense<0.000000e+00> : vector<8x128xf32>
    %258 = tpu.matmul %256, %257, %cst_193 {dimension_numbers = #tpu.dot_dimension_numbers<[1], [0], [0], [1], [0, 0, 1, 1], [], []>} : vector<8x512xf32>, vector<512x128xf32>, vector<8x128xf32> -> vector<8x128xf32>
    %c9_i32 = arith.constant 9 : i32
    %259 = tpu.dynamic_rotate %258 by %c9_i32 dim 1 : vector<8x128xf32>, i32 -> vector<8x128xf32>
    %c0_194 = arith.constant 0 : index
    %c0_195 = arith.constant 0 : index
    %c0_196 = arith.constant 0 : index
    %260 = vector.load %arg3[%c0_194, %c0_195, %c0_196] : memref<9x1x128xf32, #tpu.memory_space<vmem>>, vector<1x1x128xf32>
    %261 = vector.shape_cast %260 : vector<1x1x128xf32> to vector<1x128xf32>
    %262 = vector.broadcast %261 : vector<1x128xf32> to vector<8x128xf32>
    %263 = arith.mulf %259, %262 : vector<8x128xf32>
    %c0_197 = arith.constant 0 : index
    %c0_198 = arith.constant 0 : index
    %c0_199 = arith.constant 0 : index
    %264 = vector.load %arg12[%c0_197, %c0_198, %c0_199] : memref<9x16x8xf32, #tpu.memory_space<vmem>>, vector<1x16x8xf32>
    %265 = vector.shape_cast %264 : vector<1x16x8xf32> to vector<16x8xf32>
    %cst_200 = arith.constant dense<0.000000e+00> : vector<16x128xf32>
    %266 = tpu.matmul %265, %263, %cst_200 {dimension_numbers = #tpu.dot_dimension_numbers<[1], [0], [0], [1], [0, 0, 1, 1], [], []>} : vector<16x8xf32>, vector<8x128xf32>, vector<16x128xf32> -> vector<16x128xf32>
    %c8_i32 = arith.constant 8 : i32
    %267 = tpu.dynamic_rotate %258 by %c8_i32 dim 1 : vector<8x128xf32>, i32 -> vector<8x128xf32>
    %c1_201 = arith.constant 1 : index
    %c0_202 = arith.constant 0 : index
    %c0_203 = arith.constant 0 : index
    %268 = vector.load %arg3[%c1_201, %c0_202, %c0_203] : memref<9x1x128xf32, #tpu.memory_space<vmem>>, vector<1x1x128xf32>
    %269 = vector.shape_cast %268 : vector<1x1x128xf32> to vector<1x128xf32>
    %270 = vector.broadcast %269 : vector<1x128xf32> to vector<8x128xf32>
    %271 = arith.mulf %267, %270 : vector<8x128xf32>
    %c1_204 = arith.constant 1 : index
    %c0_205 = arith.constant 0 : index
    %c0_206 = arith.constant 0 : index
    %272 = vector.load %arg12[%c1_204, %c0_205, %c0_206] : memref<9x16x8xf32, #tpu.memory_space<vmem>>, vector<1x16x8xf32>
    %273 = vector.shape_cast %272 : vector<1x16x8xf32> to vector<16x8xf32>
    %cst_207 = arith.constant dense<0.000000e+00> : vector<16x128xf32>
    %274 = tpu.matmul %273, %271, %cst_207 {dimension_numbers = #tpu.dot_dimension_numbers<[1], [0], [0], [1], [0, 0, 1, 1], [], []>} : vector<16x8xf32>, vector<8x128xf32>, vector<16x128xf32> -> vector<16x128xf32>
    %275 = arith.addf %266, %274 : vector<16x128xf32>
    %c7_i32 = arith.constant 7 : i32
    %276 = tpu.dynamic_rotate %258 by %c7_i32 dim 1 : vector<8x128xf32>, i32 -> vector<8x128xf32>
    %c2_208 = arith.constant 2 : index
    %c0_209 = arith.constant 0 : index
    %c0_210 = arith.constant 0 : index
    %277 = vector.load %arg3[%c2_208, %c0_209, %c0_210] : memref<9x1x128xf32, #tpu.memory_space<vmem>>, vector<1x1x128xf32>
    %278 = vector.shape_cast %277 : vector<1x1x128xf32> to vector<1x128xf32>
    %279 = vector.broadcast %278 : vector<1x128xf32> to vector<8x128xf32>
    %280 = arith.mulf %276, %279 : vector<8x128xf32>
    %c2_211 = arith.constant 2 : index
    %c0_212 = arith.constant 0 : index
    %c0_213 = arith.constant 0 : index
    %281 = vector.load %arg12[%c2_211, %c0_212, %c0_213] : memref<9x16x8xf32, #tpu.memory_space<vmem>>, vector<1x16x8xf32>
    %282 = vector.shape_cast %281 : vector<1x16x8xf32> to vector<16x8xf32>
    %cst_214 = arith.constant dense<0.000000e+00> : vector<16x128xf32>
    %283 = tpu.matmul %282, %280, %cst_214 {dimension_numbers = #tpu.dot_dimension_numbers<[1], [0], [0], [1], [0, 0, 1, 1], [], []>} : vector<16x8xf32>, vector<8x128xf32>, vector<16x128xf32> -> vector<16x128xf32>
    %284 = arith.addf %275, %283 : vector<16x128xf32>
    %c1_i32_215 = arith.constant 1 : i32
    %285 = tpu.dynamic_rotate %258 by %c1_i32_215 dim 1 : vector<8x128xf32>, i32 -> vector<8x128xf32>
    %c3_216 = arith.constant 3 : index
    %c0_217 = arith.constant 0 : index
    %c0_218 = arith.constant 0 : index
    %286 = vector.load %arg3[%c3_216, %c0_217, %c0_218] : memref<9x1x128xf32, #tpu.memory_space<vmem>>, vector<1x1x128xf32>
    %287 = vector.shape_cast %286 : vector<1x1x128xf32> to vector<1x128xf32>
    %288 = vector.broadcast %287 : vector<1x128xf32> to vector<8x128xf32>
    %289 = arith.mulf %285, %288 : vector<8x128xf32>
    %c3_219 = arith.constant 3 : index
    %c0_220 = arith.constant 0 : index
    %c0_221 = arith.constant 0 : index
    %290 = vector.load %arg12[%c3_219, %c0_220, %c0_221] : memref<9x16x8xf32, #tpu.memory_space<vmem>>, vector<1x16x8xf32>
    %291 = vector.shape_cast %290 : vector<1x16x8xf32> to vector<16x8xf32>
    %cst_222 = arith.constant dense<0.000000e+00> : vector<16x128xf32>
    %292 = tpu.matmul %291, %289, %cst_222 {dimension_numbers = #tpu.dot_dimension_numbers<[1], [0], [0], [1], [0, 0, 1, 1], [], []>} : vector<16x8xf32>, vector<8x128xf32>, vector<16x128xf32> -> vector<16x128xf32>
    %293 = arith.addf %284, %292 : vector<16x128xf32>
    %c4_223 = arith.constant 4 : index
    %c0_224 = arith.constant 0 : index
    %c0_225 = arith.constant 0 : index
    %294 = vector.load %arg12[%c4_223, %c0_224, %c0_225] : memref<9x16x8xf32, #tpu.memory_space<vmem>>, vector<1x16x8xf32>
    %295 = vector.shape_cast %294 : vector<1x16x8xf32> to vector<16x8xf32>
    %cst_226 = arith.constant dense<0.000000e+00> : vector<16x128xf32>
    %296 = tpu.matmul %295, %258, %cst_226 {dimension_numbers = #tpu.dot_dimension_numbers<[1], [0], [0], [1], [0, 0, 1, 1], [], []>} : vector<16x8xf32>, vector<8x128xf32>, vector<16x128xf32> -> vector<16x128xf32>
    %297 = arith.addf %293, %296 : vector<16x128xf32>
    %c127_i32 = arith.constant 127 : i32
    %298 = tpu.dynamic_rotate %258 by %c127_i32 dim 1 : vector<8x128xf32>, i32 -> vector<8x128xf32>
    %c5_227 = arith.constant 5 : index
    %c0_228 = arith.constant 0 : index
    %c0_229 = arith.constant 0 : index
    %299 = vector.load %arg3[%c5_227, %c0_228, %c0_229] : memref<9x1x128xf32, #tpu.memory_space<vmem>>, vector<1x1x128xf32>
    %300 = vector.shape_cast %299 : vector<1x1x128xf32> to vector<1x128xf32>
    %301 = vector.broadcast %300 : vector<1x128xf32> to vector<8x128xf32>
    %302 = arith.mulf %298, %301 : vector<8x128xf32>
    %c5_230 = arith.constant 5 : index
    %c0_231 = arith.constant 0 : index
    %c0_232 = arith.constant 0 : index
    %303 = vector.load %arg12[%c5_230, %c0_231, %c0_232] : memref<9x16x8xf32, #tpu.memory_space<vmem>>, vector<1x16x8xf32>
    %304 = vector.shape_cast %303 : vector<1x16x8xf32> to vector<16x8xf32>
    %cst_233 = arith.constant dense<0.000000e+00> : vector<16x128xf32>
    %305 = tpu.matmul %304, %302, %cst_233 {dimension_numbers = #tpu.dot_dimension_numbers<[1], [0], [0], [1], [0, 0, 1, 1], [], []>} : vector<16x8xf32>, vector<8x128xf32>, vector<16x128xf32> -> vector<16x128xf32>
    %306 = arith.addf %297, %305 : vector<16x128xf32>
    %c121_i32 = arith.constant 121 : i32
    %307 = tpu.dynamic_rotate %258 by %c121_i32 dim 1 : vector<8x128xf32>, i32 -> vector<8x128xf32>
    %c6_234 = arith.constant 6 : index
    %c0_235 = arith.constant 0 : index
    %c0_236 = arith.constant 0 : index
    %308 = vector.load %arg3[%c6_234, %c0_235, %c0_236] : memref<9x1x128xf32, #tpu.memory_space<vmem>>, vector<1x1x128xf32>
    %309 = vector.shape_cast %308 : vector<1x1x128xf32> to vector<1x128xf32>
    %310 = vector.broadcast %309 : vector<1x128xf32> to vector<8x128xf32>
    %311 = arith.mulf %307, %310 : vector<8x128xf32>
    %c6_237 = arith.constant 6 : index
    %c0_238 = arith.constant 0 : index
    %c0_239 = arith.constant 0 : index
    %312 = vector.load %arg12[%c6_237, %c0_238, %c0_239] : memref<9x16x8xf32, #tpu.memory_space<vmem>>, vector<1x16x8xf32>
    %313 = vector.shape_cast %312 : vector<1x16x8xf32> to vector<16x8xf32>
    %cst_240 = arith.constant dense<0.000000e+00> : vector<16x128xf32>
    %314 = tpu.matmul %313, %311, %cst_240 {dimension_numbers = #tpu.dot_dimension_numbers<[1], [0], [0], [1], [0, 0, 1, 1], [], []>} : vector<16x8xf32>, vector<8x128xf32>, vector<16x128xf32> -> vector<16x128xf32>
    %315 = arith.addf %306, %314 : vector<16x128xf32>
    %c120_i32 = arith.constant 120 : i32
    %316 = tpu.dynamic_rotate %258 by %c120_i32 dim 1 : vector<8x128xf32>, i32 -> vector<8x128xf32>
    %c7_241 = arith.constant 7 : index
    %c0_242 = arith.constant 0 : index
    %c0_243 = arith.constant 0 : index
    %317 = vector.load %arg3[%c7_241, %c0_242, %c0_243] : memref<9x1x128xf32, #tpu.memory_space<vmem>>, vector<1x1x128xf32>
    %318 = vector.shape_cast %317 : vector<1x1x128xf32> to vector<1x128xf32>
    %319 = vector.broadcast %318 : vector<1x128xf32> to vector<8x128xf32>
    %320 = arith.mulf %316, %319 : vector<8x128xf32>
    %c7_244 = arith.constant 7 : index
    %c0_245 = arith.constant 0 : index
    %c0_246 = arith.constant 0 : index
    %321 = vector.load %arg12[%c7_244, %c0_245, %c0_246] : memref<9x16x8xf32, #tpu.memory_space<vmem>>, vector<1x16x8xf32>
    %322 = vector.shape_cast %321 : vector<1x16x8xf32> to vector<16x8xf32>
    %cst_247 = arith.constant dense<0.000000e+00> : vector<16x128xf32>
    %323 = tpu.matmul %322, %320, %cst_247 {dimension_numbers = #tpu.dot_dimension_numbers<[1], [0], [0], [1], [0, 0, 1, 1], [], []>} : vector<16x8xf32>, vector<8x128xf32>, vector<16x128xf32> -> vector<16x128xf32>
    %324 = arith.addf %315, %323 : vector<16x128xf32>
    %c119_i32 = arith.constant 119 : i32
    %325 = tpu.dynamic_rotate %258 by %c119_i32 dim 1 : vector<8x128xf32>, i32 -> vector<8x128xf32>
    %c8_248 = arith.constant 8 : index
    %c0_249 = arith.constant 0 : index
    %c0_250 = arith.constant 0 : index
    %326 = vector.load %arg3[%c8_248, %c0_249, %c0_250] : memref<9x1x128xf32, #tpu.memory_space<vmem>>, vector<1x1x128xf32>
    %327 = vector.shape_cast %326 : vector<1x1x128xf32> to vector<1x128xf32>
    %328 = vector.broadcast %327 : vector<1x128xf32> to vector<8x128xf32>
    %329 = arith.mulf %325, %328 : vector<8x128xf32>
    %c8_251 = arith.constant 8 : index
    %c0_252 = arith.constant 0 : index
    %c0_253 = arith.constant 0 : index
    %330 = vector.load %arg12[%c8_251, %c0_252, %c0_253] : memref<9x16x8xf32, #tpu.memory_space<vmem>>, vector<1x16x8xf32>
    %331 = vector.shape_cast %330 : vector<1x16x8xf32> to vector<16x8xf32>
    %cst_254 = arith.constant dense<0.000000e+00> : vector<16x128xf32>
    %332 = tpu.matmul %331, %329, %cst_254 {dimension_numbers = #tpu.dot_dimension_numbers<[1], [0], [0], [1], [0, 0, 1, 1], [], []>} : vector<16x8xf32>, vector<8x128xf32>, vector<16x128xf32> -> vector<16x128xf32>
    %333 = arith.addf %324, %332 : vector<16x128xf32>
    %c0_255 = arith.constant 0 : index
    %c0_256 = arith.constant 0 : index
    %334 = vector.load %arg13[%c0_255, %c0_256] : memref<16x1xf32, #tpu.memory_space<vmem>>, vector<16x1xf32>
    %335 = vector.broadcast %334 : vector<16x1xf32> to vector<16x128xf32>
    %336 = arith.addf %333, %335 : vector<16x128xf32>
    %cst_257 = arith.constant 0.000000e+00 : f32
    %337 = vector.broadcast %cst_257 : f32 to vector<16x128xf32>
    %338 = arith.maximumf %336, %337 : vector<16x128xf32>
    %c9_i32_258 = arith.constant 9 : i32
    %339 = tpu.dynamic_rotate %338 by %c9_i32_258 dim 1 : vector<16x128xf32>, i32 -> vector<16x128xf32>
    %c0_259 = arith.constant 0 : index
    %c0_260 = arith.constant 0 : index
    %c0_261 = arith.constant 0 : index
    %340 = vector.load %arg3[%c0_259, %c0_260, %c0_261] : memref<9x1x128xf32, #tpu.memory_space<vmem>>, vector<1x1x128xf32>
    %341 = vector.shape_cast %340 : vector<1x1x128xf32> to vector<1x128xf32>
    %342 = vector.broadcast %341 : vector<1x128xf32> to vector<16x128xf32>
    %343 = arith.mulf %339, %342 : vector<16x128xf32>
    %c0_262 = arith.constant 0 : index
    %c0_263 = arith.constant 0 : index
    %c0_264 = arith.constant 0 : index
    %344 = vector.load %arg14[%c0_262, %c0_263, %c0_264] : memref<9x16x16xf32, #tpu.memory_space<vmem>>, vector<1x16x16xf32>
    %345 = vector.shape_cast %344 : vector<1x16x16xf32> to vector<16x16xf32>
    %cst_265 = arith.constant dense<0.000000e+00> : vector<16x128xf32>
    %346 = tpu.matmul %345, %343, %cst_265 {dimension_numbers = #tpu.dot_dimension_numbers<[1], [0], [0], [1], [0, 0, 1, 1], [], []>} : vector<16x16xf32>, vector<16x128xf32>, vector<16x128xf32> -> vector<16x128xf32>
    %c8_i32_266 = arith.constant 8 : i32
    %347 = tpu.dynamic_rotate %338 by %c8_i32_266 dim 1 : vector<16x128xf32>, i32 -> vector<16x128xf32>
    %c1_267 = arith.constant 1 : index
    %c0_268 = arith.constant 0 : index
    %c0_269 = arith.constant 0 : index
    %348 = vector.load %arg3[%c1_267, %c0_268, %c0_269] : memref<9x1x128xf32, #tpu.memory_space<vmem>>, vector<1x1x128xf32>
    %349 = vector.shape_cast %348 : vector<1x1x128xf32> to vector<1x128xf32>
    %350 = vector.broadcast %349 : vector<1x128xf32> to vector<16x128xf32>
    %351 = arith.mulf %347, %350 : vector<16x128xf32>
    %c1_270 = arith.constant 1 : index
    %c0_271 = arith.constant 0 : index
    %c0_272 = arith.constant 0 : index
    %352 = vector.load %arg14[%c1_270, %c0_271, %c0_272] : memref<9x16x16xf32, #tpu.memory_space<vmem>>, vector<1x16x16xf32>
    %353 = vector.shape_cast %352 : vector<1x16x16xf32> to vector<16x16xf32>
    %cst_273 = arith.constant dense<0.000000e+00> : vector<16x128xf32>
    %354 = tpu.matmul %353, %351, %cst_273 {dimension_numbers = #tpu.dot_dimension_numbers<[1], [0], [0], [1], [0, 0, 1, 1], [], []>} : vector<16x16xf32>, vector<16x128xf32>, vector<16x128xf32> -> vector<16x128xf32>
    %355 = arith.addf %346, %354 : vector<16x128xf32>
    %c7_i32_274 = arith.constant 7 : i32
    %356 = tpu.dynamic_rotate %338 by %c7_i32_274 dim 1 : vector<16x128xf32>, i32 -> vector<16x128xf32>
    %c2_275 = arith.constant 2 : index
    %c0_276 = arith.constant 0 : index
    %c0_277 = arith.constant 0 : index
    %357 = vector.load %arg3[%c2_275, %c0_276, %c0_277] : memref<9x1x128xf32, #tpu.memory_space<vmem>>, vector<1x1x128xf32>
    %358 = vector.shape_cast %357 : vector<1x1x128xf32> to vector<1x128xf32>
    %359 = vector.broadcast %358 : vector<1x128xf32> to vector<16x128xf32>
    %360 = arith.mulf %356, %359 : vector<16x128xf32>
    %c2_278 = arith.constant 2 : index
    %c0_279 = arith.constant 0 : index
    %c0_280 = arith.constant 0 : index
    %361 = vector.load %arg14[%c2_278, %c0_279, %c0_280] : memref<9x16x16xf32, #tpu.memory_space<vmem>>, vector<1x16x16xf32>
    %362 = vector.shape_cast %361 : vector<1x16x16xf32> to vector<16x16xf32>
    %cst_281 = arith.constant dense<0.000000e+00> : vector<16x128xf32>
    %363 = tpu.matmul %362, %360, %cst_281 {dimension_numbers = #tpu.dot_dimension_numbers<[1], [0], [0], [1], [0, 0, 1, 1], [], []>} : vector<16x16xf32>, vector<16x128xf32>, vector<16x128xf32> -> vector<16x128xf32>
    %364 = arith.addf %355, %363 : vector<16x128xf32>
    %c1_i32_282 = arith.constant 1 : i32
    %365 = tpu.dynamic_rotate %338 by %c1_i32_282 dim 1 : vector<16x128xf32>, i32 -> vector<16x128xf32>
    %c3_283 = arith.constant 3 : index
    %c0_284 = arith.constant 0 : index
    %c0_285 = arith.constant 0 : index
    %366 = vector.load %arg3[%c3_283, %c0_284, %c0_285] : memref<9x1x128xf32, #tpu.memory_space<vmem>>, vector<1x1x128xf32>
    %367 = vector.shape_cast %366 : vector<1x1x128xf32> to vector<1x128xf32>
    %368 = vector.broadcast %367 : vector<1x128xf32> to vector<16x128xf32>
    %369 = arith.mulf %365, %368 : vector<16x128xf32>
    %c3_286 = arith.constant 3 : index
    %c0_287 = arith.constant 0 : index
    %c0_288 = arith.constant 0 : index
    %370 = vector.load %arg14[%c3_286, %c0_287, %c0_288] : memref<9x16x16xf32, #tpu.memory_space<vmem>>, vector<1x16x16xf32>
    %371 = vector.shape_cast %370 : vector<1x16x16xf32> to vector<16x16xf32>
    %cst_289 = arith.constant dense<0.000000e+00> : vector<16x128xf32>
    %372 = tpu.matmul %371, %369, %cst_289 {dimension_numbers = #tpu.dot_dimension_numbers<[1], [0], [0], [1], [0, 0, 1, 1], [], []>} : vector<16x16xf32>, vector<16x128xf32>, vector<16x128xf32> -> vector<16x128xf32>
    %373 = arith.addf %364, %372 : vector<16x128xf32>
    %c4_290 = arith.constant 4 : index
    %c0_291 = arith.constant 0 : index
    %c0_292 = arith.constant 0 : index
    %374 = vector.load %arg14[%c4_290, %c0_291, %c0_292] : memref<9x16x16xf32, #tpu.memory_space<vmem>>, vector<1x16x16xf32>
    %375 = vector.shape_cast %374 : vector<1x16x16xf32> to vector<16x16xf32>
    %cst_293 = arith.constant dense<0.000000e+00> : vector<16x128xf32>
    %376 = tpu.matmul %375, %338, %cst_293 {dimension_numbers = #tpu.dot_dimension_numbers<[1], [0], [0], [1], [0, 0, 1, 1], [], []>} : vector<16x16xf32>, vector<16x128xf32>, vector<16x128xf32> -> vector<16x128xf32>
    %377 = arith.addf %373, %376 : vector<16x128xf32>
    %c127_i32_294 = arith.constant 127 : i32
    %378 = tpu.dynamic_rotate %338 by %c127_i32_294 dim 1 : vector<16x128xf32>, i32 -> vector<16x128xf32>
    %c5_295 = arith.constant 5 : index
    %c0_296 = arith.constant 0 : index
    %c0_297 = arith.constant 0 : index
    %379 = vector.load %arg3[%c5_295, %c0_296, %c0_297] : memref<9x1x128xf32, #tpu.memory_space<vmem>>, vector<1x1x128xf32>
    %380 = vector.shape_cast %379 : vector<1x1x128xf32> to vector<1x128xf32>
    %381 = vector.broadcast %380 : vector<1x128xf32> to vector<16x128xf32>
    %382 = arith.mulf %378, %381 : vector<16x128xf32>
    %c5_298 = arith.constant 5 : index
    %c0_299 = arith.constant 0 : index
    %c0_300 = arith.constant 0 : index
    %383 = vector.load %arg14[%c5_298, %c0_299, %c0_300] : memref<9x16x16xf32, #tpu.memory_space<vmem>>, vector<1x16x16xf32>
    %384 = vector.shape_cast %383 : vector<1x16x16xf32> to vector<16x16xf32>
    %cst_301 = arith.constant dense<0.000000e+00> : vector<16x128xf32>
    %385 = tpu.matmul %384, %382, %cst_301 {dimension_numbers = #tpu.dot_dimension_numbers<[1], [0], [0], [1], [0, 0, 1, 1], [], []>} : vector<16x16xf32>, vector<16x128xf32>, vector<16x128xf32> -> vector<16x128xf32>
    %386 = arith.addf %377, %385 : vector<16x128xf32>
    %c121_i32_302 = arith.constant 121 : i32
    %387 = tpu.dynamic_rotate %338 by %c121_i32_302 dim 1 : vector<16x128xf32>, i32 -> vector<16x128xf32>
    %c6_303 = arith.constant 6 : index
    %c0_304 = arith.constant 0 : index
    %c0_305 = arith.constant 0 : index
    %388 = vector.load %arg3[%c6_303, %c0_304, %c0_305] : memref<9x1x128xf32, #tpu.memory_space<vmem>>, vector<1x1x128xf32>
    %389 = vector.shape_cast %388 : vector<1x1x128xf32> to vector<1x128xf32>
    %390 = vector.broadcast %389 : vector<1x128xf32> to vector<16x128xf32>
    %391 = arith.mulf %387, %390 : vector<16x128xf32>
    %c6_306 = arith.constant 6 : index
    %c0_307 = arith.constant 0 : index
    %c0_308 = arith.constant 0 : index
    %392 = vector.load %arg14[%c6_306, %c0_307, %c0_308] : memref<9x16x16xf32, #tpu.memory_space<vmem>>, vector<1x16x16xf32>
    %393 = vector.shape_cast %392 : vector<1x16x16xf32> to vector<16x16xf32>
    %cst_309 = arith.constant dense<0.000000e+00> : vector<16x128xf32>
    %394 = tpu.matmul %393, %391, %cst_309 {dimension_numbers = #tpu.dot_dimension_numbers<[1], [0], [0], [1], [0, 0, 1, 1], [], []>} : vector<16x16xf32>, vector<16x128xf32>, vector<16x128xf32> -> vector<16x128xf32>
    %395 = arith.addf %386, %394 : vector<16x128xf32>
    %c120_i32_310 = arith.constant 120 : i32
    %396 = tpu.dynamic_rotate %338 by %c120_i32_310 dim 1 : vector<16x128xf32>, i32 -> vector<16x128xf32>
    %c7_311 = arith.constant 7 : index
    %c0_312 = arith.constant 0 : index
    %c0_313 = arith.constant 0 : index
    %397 = vector.load %arg3[%c7_311, %c0_312, %c0_313] : memref<9x1x128xf32, #tpu.memory_space<vmem>>, vector<1x1x128xf32>
    %398 = vector.shape_cast %397 : vector<1x1x128xf32> to vector<1x128xf32>
    %399 = vector.broadcast %398 : vector<1x128xf32> to vector<16x128xf32>
    %400 = arith.mulf %396, %399 : vector<16x128xf32>
    %c7_314 = arith.constant 7 : index
    %c0_315 = arith.constant 0 : index
    %c0_316 = arith.constant 0 : index
    %401 = vector.load %arg14[%c7_314, %c0_315, %c0_316] : memref<9x16x16xf32, #tpu.memory_space<vmem>>, vector<1x16x16xf32>
    %402 = vector.shape_cast %401 : vector<1x16x16xf32> to vector<16x16xf32>
    %cst_317 = arith.constant dense<0.000000e+00> : vector<16x128xf32>
    %403 = tpu.matmul %402, %400, %cst_317 {dimension_numbers = #tpu.dot_dimension_numbers<[1], [0], [0], [1], [0, 0, 1, 1], [], []>} : vector<16x16xf32>, vector<16x128xf32>, vector<16x128xf32> -> vector<16x128xf32>
    %404 = arith.addf %395, %403 : vector<16x128xf32>
    %c119_i32_318 = arith.constant 119 : i32
    %405 = tpu.dynamic_rotate %338 by %c119_i32_318 dim 1 : vector<16x128xf32>, i32 -> vector<16x128xf32>
    %c8_319 = arith.constant 8 : index
    %c0_320 = arith.constant 0 : index
    %c0_321 = arith.constant 0 : index
    %406 = vector.load %arg3[%c8_319, %c0_320, %c0_321] : memref<9x1x128xf32, #tpu.memory_space<vmem>>, vector<1x1x128xf32>
    %407 = vector.shape_cast %406 : vector<1x1x128xf32> to vector<1x128xf32>
    %408 = vector.broadcast %407 : vector<1x128xf32> to vector<16x128xf32>
    %409 = arith.mulf %405, %408 : vector<16x128xf32>
    %c8_322 = arith.constant 8 : index
    %c0_323 = arith.constant 0 : index
    %c0_324 = arith.constant 0 : index
    %410 = vector.load %arg14[%c8_322, %c0_323, %c0_324] : memref<9x16x16xf32, #tpu.memory_space<vmem>>, vector<1x16x16xf32>
    %411 = vector.shape_cast %410 : vector<1x16x16xf32> to vector<16x16xf32>
    %cst_325 = arith.constant dense<0.000000e+00> : vector<16x128xf32>
    %412 = tpu.matmul %411, %409, %cst_325 {dimension_numbers = #tpu.dot_dimension_numbers<[1], [0], [0], [1], [0, 0, 1, 1], [], []>} : vector<16x16xf32>, vector<16x128xf32>, vector<16x128xf32> -> vector<16x128xf32>
    %413 = arith.addf %404, %412 : vector<16x128xf32>
    %c0_326 = arith.constant 0 : index
    %c0_327 = arith.constant 0 : index
    %414 = vector.load %arg15[%c0_326, %c0_327] : memref<16x1xf32, #tpu.memory_space<vmem>>, vector<16x1xf32>
    %415 = vector.broadcast %414 : vector<16x1xf32> to vector<16x128xf32>
    %416 = arith.addf %413, %415 : vector<16x128xf32>
    %cst_328 = arith.constant 0.000000e+00 : f32
    %417 = vector.broadcast %cst_328 : f32 to vector<16x128xf32>
    %418 = arith.maximumf %416, %417 : vector<16x128xf32>
    %c9_i32_329 = arith.constant 9 : i32
    %419 = tpu.dynamic_rotate %418 by %c9_i32_329 dim 1 : vector<16x128xf32>, i32 -> vector<16x128xf32>
    %c0_330 = arith.constant 0 : index
    %c0_331 = arith.constant 0 : index
    %c0_332 = arith.constant 0 : index
    %420 = vector.load %arg3[%c0_330, %c0_331, %c0_332] : memref<9x1x128xf32, #tpu.memory_space<vmem>>, vector<1x1x128xf32>
    %421 = vector.shape_cast %420 : vector<1x1x128xf32> to vector<1x128xf32>
    %422 = vector.broadcast %421 : vector<1x128xf32> to vector<16x128xf32>
    %423 = arith.mulf %419, %422 : vector<16x128xf32>
    %c0_333 = arith.constant 0 : index
    %c0_334 = arith.constant 0 : index
    %c0_335 = arith.constant 0 : index
    %424 = vector.load %arg16[%c0_333, %c0_334, %c0_335] : memref<9x16x16xf32, #tpu.memory_space<vmem>>, vector<1x16x16xf32>
    %425 = vector.shape_cast %424 : vector<1x16x16xf32> to vector<16x16xf32>
    %cst_336 = arith.constant dense<0.000000e+00> : vector<16x128xf32>
    %426 = tpu.matmul %425, %423, %cst_336 {dimension_numbers = #tpu.dot_dimension_numbers<[1], [0], [0], [1], [0, 0, 1, 1], [], []>} : vector<16x16xf32>, vector<16x128xf32>, vector<16x128xf32> -> vector<16x128xf32>
    %c8_i32_337 = arith.constant 8 : i32
    %427 = tpu.dynamic_rotate %418 by %c8_i32_337 dim 1 : vector<16x128xf32>, i32 -> vector<16x128xf32>
    %c1_338 = arith.constant 1 : index
    %c0_339 = arith.constant 0 : index
    %c0_340 = arith.constant 0 : index
    %428 = vector.load %arg3[%c1_338, %c0_339, %c0_340] : memref<9x1x128xf32, #tpu.memory_space<vmem>>, vector<1x1x128xf32>
    %429 = vector.shape_cast %428 : vector<1x1x128xf32> to vector<1x128xf32>
    %430 = vector.broadcast %429 : vector<1x128xf32> to vector<16x128xf32>
    %431 = arith.mulf %427, %430 : vector<16x128xf32>
    %c1_341 = arith.constant 1 : index
    %c0_342 = arith.constant 0 : index
    %c0_343 = arith.constant 0 : index
    %432 = vector.load %arg16[%c1_341, %c0_342, %c0_343] : memref<9x16x16xf32, #tpu.memory_space<vmem>>, vector<1x16x16xf32>
    %433 = vector.shape_cast %432 : vector<1x16x16xf32> to vector<16x16xf32>
    %cst_344 = arith.constant dense<0.000000e+00> : vector<16x128xf32>
    %434 = tpu.matmul %433, %431, %cst_344 {dimension_numbers = #tpu.dot_dimension_numbers<[1], [0], [0], [1], [0, 0, 1, 1], [], []>} : vector<16x16xf32>, vector<16x128xf32>, vector<16x128xf32> -> vector<16x128xf32>
    %435 = arith.addf %426, %434 : vector<16x128xf32>
    %c7_i32_345 = arith.constant 7 : i32
    %436 = tpu.dynamic_rotate %418 by %c7_i32_345 dim 1 : vector<16x128xf32>, i32 -> vector<16x128xf32>
    %c2_346 = arith.constant 2 : index
    %c0_347 = arith.constant 0 : index
    %c0_348 = arith.constant 0 : index
    %437 = vector.load %arg3[%c2_346, %c0_347, %c0_348] : memref<9x1x128xf32, #tpu.memory_space<vmem>>, vector<1x1x128xf32>
    %438 = vector.shape_cast %437 : vector<1x1x128xf32> to vector<1x128xf32>
    %439 = vector.broadcast %438 : vector<1x128xf32> to vector<16x128xf32>
    %440 = arith.mulf %436, %439 : vector<16x128xf32>
    %c2_349 = arith.constant 2 : index
    %c0_350 = arith.constant 0 : index
    %c0_351 = arith.constant 0 : index
    %441 = vector.load %arg16[%c2_349, %c0_350, %c0_351] : memref<9x16x16xf32, #tpu.memory_space<vmem>>, vector<1x16x16xf32>
    %442 = vector.shape_cast %441 : vector<1x16x16xf32> to vector<16x16xf32>
    %cst_352 = arith.constant dense<0.000000e+00> : vector<16x128xf32>
    %443 = tpu.matmul %442, %440, %cst_352 {dimension_numbers = #tpu.dot_dimension_numbers<[1], [0], [0], [1], [0, 0, 1, 1], [], []>} : vector<16x16xf32>, vector<16x128xf32>, vector<16x128xf32> -> vector<16x128xf32>
    %444 = arith.addf %435, %443 : vector<16x128xf32>
    %c1_i32_353 = arith.constant 1 : i32
    %445 = tpu.dynamic_rotate %418 by %c1_i32_353 dim 1 : vector<16x128xf32>, i32 -> vector<16x128xf32>
    %c3_354 = arith.constant 3 : index
    %c0_355 = arith.constant 0 : index
    %c0_356 = arith.constant 0 : index
    %446 = vector.load %arg3[%c3_354, %c0_355, %c0_356] : memref<9x1x128xf32, #tpu.memory_space<vmem>>, vector<1x1x128xf32>
    %447 = vector.shape_cast %446 : vector<1x1x128xf32> to vector<1x128xf32>
    %448 = vector.broadcast %447 : vector<1x128xf32> to vector<16x128xf32>
    %449 = arith.mulf %445, %448 : vector<16x128xf32>
    %c3_357 = arith.constant 3 : index
    %c0_358 = arith.constant 0 : index
    %c0_359 = arith.constant 0 : index
    %450 = vector.load %arg16[%c3_357, %c0_358, %c0_359] : memref<9x16x16xf32, #tpu.memory_space<vmem>>, vector<1x16x16xf32>
    %451 = vector.shape_cast %450 : vector<1x16x16xf32> to vector<16x16xf32>
    %cst_360 = arith.constant dense<0.000000e+00> : vector<16x128xf32>
    %452 = tpu.matmul %451, %449, %cst_360 {dimension_numbers = #tpu.dot_dimension_numbers<[1], [0], [0], [1], [0, 0, 1, 1], [], []>} : vector<16x16xf32>, vector<16x128xf32>, vector<16x128xf32> -> vector<16x128xf32>
    %453 = arith.addf %444, %452 : vector<16x128xf32>
    %c4_361 = arith.constant 4 : index
    %c0_362 = arith.constant 0 : index
    %c0_363 = arith.constant 0 : index
    %454 = vector.load %arg16[%c4_361, %c0_362, %c0_363] : memref<9x16x16xf32, #tpu.memory_space<vmem>>, vector<1x16x16xf32>
    %455 = vector.shape_cast %454 : vector<1x16x16xf32> to vector<16x16xf32>
    %cst_364 = arith.constant dense<0.000000e+00> : vector<16x128xf32>
    %456 = tpu.matmul %455, %418, %cst_364 {dimension_numbers = #tpu.dot_dimension_numbers<[1], [0], [0], [1], [0, 0, 1, 1], [], []>} : vector<16x16xf32>, vector<16x128xf32>, vector<16x128xf32> -> vector<16x128xf32>
    %457 = arith.addf %453, %456 : vector<16x128xf32>
    %c127_i32_365 = arith.constant 127 : i32
    %458 = tpu.dynamic_rotate %418 by %c127_i32_365 dim 1 : vector<16x128xf32>, i32 -> vector<16x128xf32>
    %c5_366 = arith.constant 5 : index
    %c0_367 = arith.constant 0 : index
    %c0_368 = arith.constant 0 : index
    %459 = vector.load %arg3[%c5_366, %c0_367, %c0_368] : memref<9x1x128xf32, #tpu.memory_space<vmem>>, vector<1x1x128xf32>
    %460 = vector.shape_cast %459 : vector<1x1x128xf32> to vector<1x128xf32>
    %461 = vector.broadcast %460 : vector<1x128xf32> to vector<16x128xf32>
    %462 = arith.mulf %458, %461 : vector<16x128xf32>
    %c5_369 = arith.constant 5 : index
    %c0_370 = arith.constant 0 : index
    %c0_371 = arith.constant 0 : index
    %463 = vector.load %arg16[%c5_369, %c0_370, %c0_371] : memref<9x16x16xf32, #tpu.memory_space<vmem>>, vector<1x16x16xf32>
    %464 = vector.shape_cast %463 : vector<1x16x16xf32> to vector<16x16xf32>
    %cst_372 = arith.constant dense<0.000000e+00> : vector<16x128xf32>
    %465 = tpu.matmul %464, %462, %cst_372 {dimension_numbers = #tpu.dot_dimension_numbers<[1], [0], [0], [1], [0, 0, 1, 1], [], []>} : vector<16x16xf32>, vector<16x128xf32>, vector<16x128xf32> -> vector<16x128xf32>
    %466 = arith.addf %457, %465 : vector<16x128xf32>
    %c121_i32_373 = arith.constant 121 : i32
    %467 = tpu.dynamic_rotate %418 by %c121_i32_373 dim 1 : vector<16x128xf32>, i32 -> vector<16x128xf32>
    %c6_374 = arith.constant 6 : index
    %c0_375 = arith.constant 0 : index
    %c0_376 = arith.constant 0 : index
    %468 = vector.load %arg3[%c6_374, %c0_375, %c0_376] : memref<9x1x128xf32, #tpu.memory_space<vmem>>, vector<1x1x128xf32>
    %469 = vector.shape_cast %468 : vector<1x1x128xf32> to vector<1x128xf32>
    %470 = vector.broadcast %469 : vector<1x128xf32> to vector<16x128xf32>
    %471 = arith.mulf %467, %470 : vector<16x128xf32>
    %c6_377 = arith.constant 6 : index
    %c0_378 = arith.constant 0 : index
    %c0_379 = arith.constant 0 : index
    %472 = vector.load %arg16[%c6_377, %c0_378, %c0_379] : memref<9x16x16xf32, #tpu.memory_space<vmem>>, vector<1x16x16xf32>
    %473 = vector.shape_cast %472 : vector<1x16x16xf32> to vector<16x16xf32>
    %cst_380 = arith.constant dense<0.000000e+00> : vector<16x128xf32>
    %474 = tpu.matmul %473, %471, %cst_380 {dimension_numbers = #tpu.dot_dimension_numbers<[1], [0], [0], [1], [0, 0, 1, 1], [], []>} : vector<16x16xf32>, vector<16x128xf32>, vector<16x128xf32> -> vector<16x128xf32>
    %475 = arith.addf %466, %474 : vector<16x128xf32>
    %c120_i32_381 = arith.constant 120 : i32
    %476 = tpu.dynamic_rotate %418 by %c120_i32_381 dim 1 : vector<16x128xf32>, i32 -> vector<16x128xf32>
    %c7_382 = arith.constant 7 : index
    %c0_383 = arith.constant 0 : index
    %c0_384 = arith.constant 0 : index
    %477 = vector.load %arg3[%c7_382, %c0_383, %c0_384] : memref<9x1x128xf32, #tpu.memory_space<vmem>>, vector<1x1x128xf32>
    %478 = vector.shape_cast %477 : vector<1x1x128xf32> to vector<1x128xf32>
    %479 = vector.broadcast %478 : vector<1x128xf32> to vector<16x128xf32>
    %480 = arith.mulf %476, %479 : vector<16x128xf32>
    %c7_385 = arith.constant 7 : index
    %c0_386 = arith.constant 0 : index
    %c0_387 = arith.constant 0 : index
    %481 = vector.load %arg16[%c7_385, %c0_386, %c0_387] : memref<9x16x16xf32, #tpu.memory_space<vmem>>, vector<1x16x16xf32>
    %482 = vector.shape_cast %481 : vector<1x16x16xf32> to vector<16x16xf32>
    %cst_388 = arith.constant dense<0.000000e+00> : vector<16x128xf32>
    %483 = tpu.matmul %482, %480, %cst_388 {dimension_numbers = #tpu.dot_dimension_numbers<[1], [0], [0], [1], [0, 0, 1, 1], [], []>} : vector<16x16xf32>, vector<16x128xf32>, vector<16x128xf32> -> vector<16x128xf32>
    %484 = arith.addf %475, %483 : vector<16x128xf32>
    %c119_i32_389 = arith.constant 119 : i32
    %485 = tpu.dynamic_rotate %418 by %c119_i32_389 dim 1 : vector<16x128xf32>, i32 -> vector<16x128xf32>
    %c8_390 = arith.constant 8 : index
    %c0_391 = arith.constant 0 : index
    %c0_392 = arith.constant 0 : index
    %486 = vector.load %arg3[%c8_390, %c0_391, %c0_392] : memref<9x1x128xf32, #tpu.memory_space<vmem>>, vector<1x1x128xf32>
    %487 = vector.shape_cast %486 : vector<1x1x128xf32> to vector<1x128xf32>
    %488 = vector.broadcast %487 : vector<1x128xf32> to vector<16x128xf32>
    %489 = arith.mulf %485, %488 : vector<16x128xf32>
    %c8_393 = arith.constant 8 : index
    %c0_394 = arith.constant 0 : index
    %c0_395 = arith.constant 0 : index
    %490 = vector.load %arg16[%c8_393, %c0_394, %c0_395] : memref<9x16x16xf32, #tpu.memory_space<vmem>>, vector<1x16x16xf32>
    %491 = vector.shape_cast %490 : vector<1x16x16xf32> to vector<16x16xf32>
    %cst_396 = arith.constant dense<0.000000e+00> : vector<16x128xf32>
    %492 = tpu.matmul %491, %489, %cst_396 {dimension_numbers = #tpu.dot_dimension_numbers<[1], [0], [0], [1], [0, 0, 1, 1], [], []>} : vector<16x16xf32>, vector<16x128xf32>, vector<16x128xf32> -> vector<16x128xf32>
    %493 = arith.addf %484, %492 : vector<16x128xf32>
    %c0_397 = arith.constant 0 : index
    %c0_398 = arith.constant 0 : index
    %494 = vector.load %arg17[%c0_397, %c0_398] : memref<16x1xf32, #tpu.memory_space<vmem>>, vector<16x1xf32>
    %495 = vector.broadcast %494 : vector<16x1xf32> to vector<16x128xf32>
    %496 = arith.addf %493, %495 : vector<16x128xf32>
    %497 = arith.addf %496, %338 : vector<16x128xf32>
    %cst_399 = arith.constant 0.000000e+00 : f32
    %498 = vector.broadcast %cst_399 : f32 to vector<16x128xf32>
    %499 = arith.maximumf %497, %498 : vector<16x128xf32>
    %c127_i32_400 = arith.constant 127 : i32
    %500 = tpu.dynamic_rotate %499 by %c127_i32_400 dim 1 : vector<16x128xf32>, i32 -> vector<16x128xf32>
    %501 = arith.maximumf %499, %500 : vector<16x128xf32>
    %c120_i32_401 = arith.constant 120 : i32
    %502 = tpu.dynamic_rotate %501 by %c120_i32_401 dim 1 : vector<16x128xf32>, i32 -> vector<16x128xf32>
    %503 = arith.maximumf %501, %502 : vector<16x128xf32>
    %c0_402 = arith.constant 0 : index
    %c0_403 = arith.constant 0 : index
    %504 = vector.load %arg5[%c0_402, %c0_403] : memref<128x32xf32, #tpu.memory_space<vmem>>, vector<128x32xf32>
    %cst_404 = arith.constant dense<0.000000e+00> : vector<16x32xf32>
    %505 = tpu.matmul %503, %504, %cst_404 {dimension_numbers = #tpu.dot_dimension_numbers<[1], [0], [0], [1], [0, 0, 1, 1], [], []>} : vector<16x128xf32>, vector<128x32xf32>, vector<16x32xf32> -> vector<16x32xf32>
    %cst_405 = arith.constant 0.000000e+00 : f32
    %506 = vector.broadcast %cst_405 : f32 to vector<16x10xf32>
    %507 = vector.extract_strided_slice %505 {offsets = [0, 0], sizes = [16, 1], strides = [1, 1]} : vector<16x32xf32> to vector<16x1xf32>
    %c0_406 = arith.constant 0 : index
    %c0_407 = arith.constant 0 : index
    %c0_408 = arith.constant 0 : index
    %508 = vector.load %arg18[%c0_406, %c0_407, %c0_408] : memref<16x16x10xf32, #tpu.memory_space<vmem>>, vector<1x16x10xf32>
    %509 = vector.shape_cast %508 : vector<1x16x10xf32> to vector<16x10xf32>
    %510 = vector.broadcast %507 : vector<16x1xf32> to vector<16x10xf32>
    %511 = arith.mulf %510, %509 : vector<16x10xf32>
    %512 = arith.addf %506, %511 : vector<16x10xf32>
    %513 = vector.extract_strided_slice %505 {offsets = [0, 1], sizes = [16, 1], strides = [1, 1]} : vector<16x32xf32> to vector<16x1xf32>
    %c1_409 = arith.constant 1 : index
    %c0_410 = arith.constant 0 : index
    %c0_411 = arith.constant 0 : index
    %514 = vector.load %arg18[%c1_409, %c0_410, %c0_411] : memref<16x16x10xf32, #tpu.memory_space<vmem>>, vector<1x16x10xf32>
    %515 = vector.shape_cast %514 : vector<1x16x10xf32> to vector<16x10xf32>
    %516 = vector.broadcast %513 : vector<16x1xf32> to vector<16x10xf32>
    %517 = arith.mulf %516, %515 : vector<16x10xf32>
    %518 = arith.addf %512, %517 : vector<16x10xf32>
    %519 = vector.extract_strided_slice %505 {offsets = [0, 2], sizes = [16, 1], strides = [1, 1]} : vector<16x32xf32> to vector<16x1xf32>
    %c2_412 = arith.constant 2 : index
    %c0_413 = arith.constant 0 : index
    %c0_414 = arith.constant 0 : index
    %520 = vector.load %arg18[%c2_412, %c0_413, %c0_414] : memref<16x16x10xf32, #tpu.memory_space<vmem>>, vector<1x16x10xf32>
    %521 = vector.shape_cast %520 : vector<1x16x10xf32> to vector<16x10xf32>
    %522 = vector.broadcast %519 : vector<16x1xf32> to vector<16x10xf32>
    %523 = arith.mulf %522, %521 : vector<16x10xf32>
    %524 = arith.addf %518, %523 : vector<16x10xf32>
    %525 = vector.extract_strided_slice %505 {offsets = [0, 3], sizes = [16, 1], strides = [1, 1]} : vector<16x32xf32> to vector<16x1xf32>
    %c3_415 = arith.constant 3 : index
    %c0_416 = arith.constant 0 : index
    %c0_417 = arith.constant 0 : index
    %526 = vector.load %arg18[%c3_415, %c0_416, %c0_417] : memref<16x16x10xf32, #tpu.memory_space<vmem>>, vector<1x16x10xf32>
    %527 = vector.shape_cast %526 : vector<1x16x10xf32> to vector<16x10xf32>
    %528 = vector.broadcast %525 : vector<16x1xf32> to vector<16x10xf32>
    %529 = arith.mulf %528, %527 : vector<16x10xf32>
    %530 = arith.addf %524, %529 : vector<16x10xf32>
    %531 = vector.extract_strided_slice %505 {offsets = [0, 4], sizes = [16, 1], strides = [1, 1]} : vector<16x32xf32> to vector<16x1xf32>
    %c4_418 = arith.constant 4 : index
    %c0_419 = arith.constant 0 : index
    %c0_420 = arith.constant 0 : index
    %532 = vector.load %arg18[%c4_418, %c0_419, %c0_420] : memref<16x16x10xf32, #tpu.memory_space<vmem>>, vector<1x16x10xf32>
    %533 = vector.shape_cast %532 : vector<1x16x10xf32> to vector<16x10xf32>
    %534 = vector.broadcast %531 : vector<16x1xf32> to vector<16x10xf32>
    %535 = arith.mulf %534, %533 : vector<16x10xf32>
    %536 = arith.addf %530, %535 : vector<16x10xf32>
    %537 = vector.extract_strided_slice %505 {offsets = [0, 5], sizes = [16, 1], strides = [1, 1]} : vector<16x32xf32> to vector<16x1xf32>
    %c5_421 = arith.constant 5 : index
    %c0_422 = arith.constant 0 : index
    %c0_423 = arith.constant 0 : index
    %538 = vector.load %arg18[%c5_421, %c0_422, %c0_423] : memref<16x16x10xf32, #tpu.memory_space<vmem>>, vector<1x16x10xf32>
    %539 = vector.shape_cast %538 : vector<1x16x10xf32> to vector<16x10xf32>
    %540 = vector.broadcast %537 : vector<16x1xf32> to vector<16x10xf32>
    %541 = arith.mulf %540, %539 : vector<16x10xf32>
    %542 = arith.addf %536, %541 : vector<16x10xf32>
    %543 = vector.extract_strided_slice %505 {offsets = [0, 6], sizes = [16, 1], strides = [1, 1]} : vector<16x32xf32> to vector<16x1xf32>
    %c6_424 = arith.constant 6 : index
    %c0_425 = arith.constant 0 : index
    %c0_426 = arith.constant 0 : index
    %544 = vector.load %arg18[%c6_424, %c0_425, %c0_426] : memref<16x16x10xf32, #tpu.memory_space<vmem>>, vector<1x16x10xf32>
    %545 = vector.shape_cast %544 : vector<1x16x10xf32> to vector<16x10xf32>
    %546 = vector.broadcast %543 : vector<16x1xf32> to vector<16x10xf32>
    %547 = arith.mulf %546, %545 : vector<16x10xf32>
    %548 = arith.addf %542, %547 : vector<16x10xf32>
    %549 = vector.extract_strided_slice %505 {offsets = [0, 7], sizes = [16, 1], strides = [1, 1]} : vector<16x32xf32> to vector<16x1xf32>
    %c7_427 = arith.constant 7 : index
    %c0_428 = arith.constant 0 : index
    %c0_429 = arith.constant 0 : index
    %550 = vector.load %arg18[%c7_427, %c0_428, %c0_429] : memref<16x16x10xf32, #tpu.memory_space<vmem>>, vector<1x16x10xf32>
    %551 = vector.shape_cast %550 : vector<1x16x10xf32> to vector<16x10xf32>
    %552 = vector.broadcast %549 : vector<16x1xf32> to vector<16x10xf32>
    %553 = arith.mulf %552, %551 : vector<16x10xf32>
    %554 = arith.addf %548, %553 : vector<16x10xf32>
    %555 = vector.extract_strided_slice %505 {offsets = [0, 8], sizes = [16, 1], strides = [1, 1]} : vector<16x32xf32> to vector<16x1xf32>
    %c8_430 = arith.constant 8 : index
    %c0_431 = arith.constant 0 : index
    %c0_432 = arith.constant 0 : index
    %556 = vector.load %arg18[%c8_430, %c0_431, %c0_432] : memref<16x16x10xf32, #tpu.memory_space<vmem>>, vector<1x16x10xf32>
    %557 = vector.shape_cast %556 : vector<1x16x10xf32> to vector<16x10xf32>
    %558 = vector.broadcast %555 : vector<16x1xf32> to vector<16x10xf32>
    %559 = arith.mulf %558, %557 : vector<16x10xf32>
    %560 = arith.addf %554, %559 : vector<16x10xf32>
    %561 = vector.extract_strided_slice %505 {offsets = [0, 9], sizes = [16, 1], strides = [1, 1]} : vector<16x32xf32> to vector<16x1xf32>
    %c9 = arith.constant 9 : index
    %c0_433 = arith.constant 0 : index
    %c0_434 = arith.constant 0 : index
    %562 = vector.load %arg18[%c9, %c0_433, %c0_434] : memref<16x16x10xf32, #tpu.memory_space<vmem>>, vector<1x16x10xf32>
    %563 = vector.shape_cast %562 : vector<1x16x10xf32> to vector<16x10xf32>
    %564 = vector.broadcast %561 : vector<16x1xf32> to vector<16x10xf32>
    %565 = arith.mulf %564, %563 : vector<16x10xf32>
    %566 = arith.addf %560, %565 : vector<16x10xf32>
    %567 = vector.extract_strided_slice %505 {offsets = [0, 10], sizes = [16, 1], strides = [1, 1]} : vector<16x32xf32> to vector<16x1xf32>
    %c10 = arith.constant 10 : index
    %c0_435 = arith.constant 0 : index
    %c0_436 = arith.constant 0 : index
    %568 = vector.load %arg18[%c10, %c0_435, %c0_436] : memref<16x16x10xf32, #tpu.memory_space<vmem>>, vector<1x16x10xf32>
    %569 = vector.shape_cast %568 : vector<1x16x10xf32> to vector<16x10xf32>
    %570 = vector.broadcast %567 : vector<16x1xf32> to vector<16x10xf32>
    %571 = arith.mulf %570, %569 : vector<16x10xf32>
    %572 = arith.addf %566, %571 : vector<16x10xf32>
    %573 = vector.extract_strided_slice %505 {offsets = [0, 11], sizes = [16, 1], strides = [1, 1]} : vector<16x32xf32> to vector<16x1xf32>
    %c11 = arith.constant 11 : index
    %c0_437 = arith.constant 0 : index
    %c0_438 = arith.constant 0 : index
    %574 = vector.load %arg18[%c11, %c0_437, %c0_438] : memref<16x16x10xf32, #tpu.memory_space<vmem>>, vector<1x16x10xf32>
    %575 = vector.shape_cast %574 : vector<1x16x10xf32> to vector<16x10xf32>
    %576 = vector.broadcast %573 : vector<16x1xf32> to vector<16x10xf32>
    %577 = arith.mulf %576, %575 : vector<16x10xf32>
    %578 = arith.addf %572, %577 : vector<16x10xf32>
    %579 = vector.extract_strided_slice %505 {offsets = [0, 12], sizes = [16, 1], strides = [1, 1]} : vector<16x32xf32> to vector<16x1xf32>
    %c12 = arith.constant 12 : index
    %c0_439 = arith.constant 0 : index
    %c0_440 = arith.constant 0 : index
    %580 = vector.load %arg18[%c12, %c0_439, %c0_440] : memref<16x16x10xf32, #tpu.memory_space<vmem>>, vector<1x16x10xf32>
    %581 = vector.shape_cast %580 : vector<1x16x10xf32> to vector<16x10xf32>
    %582 = vector.broadcast %579 : vector<16x1xf32> to vector<16x10xf32>
    %583 = arith.mulf %582, %581 : vector<16x10xf32>
    %584 = arith.addf %578, %583 : vector<16x10xf32>
    %585 = vector.extract_strided_slice %505 {offsets = [0, 13], sizes = [16, 1], strides = [1, 1]} : vector<16x32xf32> to vector<16x1xf32>
    %c13 = arith.constant 13 : index
    %c0_441 = arith.constant 0 : index
    %c0_442 = arith.constant 0 : index
    %586 = vector.load %arg18[%c13, %c0_441, %c0_442] : memref<16x16x10xf32, #tpu.memory_space<vmem>>, vector<1x16x10xf32>
    %587 = vector.shape_cast %586 : vector<1x16x10xf32> to vector<16x10xf32>
    %588 = vector.broadcast %585 : vector<16x1xf32> to vector<16x10xf32>
    %589 = arith.mulf %588, %587 : vector<16x10xf32>
    %590 = arith.addf %584, %589 : vector<16x10xf32>
    %591 = vector.extract_strided_slice %505 {offsets = [0, 14], sizes = [16, 1], strides = [1, 1]} : vector<16x32xf32> to vector<16x1xf32>
    %c14 = arith.constant 14 : index
    %c0_443 = arith.constant 0 : index
    %c0_444 = arith.constant 0 : index
    %592 = vector.load %arg18[%c14, %c0_443, %c0_444] : memref<16x16x10xf32, #tpu.memory_space<vmem>>, vector<1x16x10xf32>
    %593 = vector.shape_cast %592 : vector<1x16x10xf32> to vector<16x10xf32>
    %594 = vector.broadcast %591 : vector<16x1xf32> to vector<16x10xf32>
    %595 = arith.mulf %594, %593 : vector<16x10xf32>
    %596 = arith.addf %590, %595 : vector<16x10xf32>
    %597 = vector.extract_strided_slice %505 {offsets = [0, 15], sizes = [16, 1], strides = [1, 1]} : vector<16x32xf32> to vector<16x1xf32>
    %c15 = arith.constant 15 : index
    %c0_445 = arith.constant 0 : index
    %c0_446 = arith.constant 0 : index
    %598 = vector.load %arg18[%c15, %c0_445, %c0_446] : memref<16x16x10xf32, #tpu.memory_space<vmem>>, vector<1x16x10xf32>
    %599 = vector.shape_cast %598 : vector<1x16x10xf32> to vector<16x10xf32>
    %600 = vector.broadcast %597 : vector<16x1xf32> to vector<16x10xf32>
    %601 = arith.mulf %600, %599 : vector<16x10xf32>
    %602 = arith.addf %596, %601 : vector<16x10xf32>
    %cst_447 = arith.constant dense<0.000000e+00> : vector<10xf32>
    %603 = vector.multi_reduction <add>, %602, %cst_447 [0] : vector<16x10xf32> to vector<10xf32>
    %604 = vector.shape_cast %603 : vector<10xf32> to vector<1x10xf32>
    %c0_448 = arith.constant 0 : index
    %c0_449 = arith.constant 0 : index
    %605 = vector.load %arg19[%c0_448, %c0_449] : memref<1x10xf32, #tpu.memory_space<vmem>>, vector<1x10xf32>
    %606 = arith.addf %604, %605 : vector<1x10xf32>
    %cst_450 = arith.constant dense<0xFF800000> : vector<1xf32>
    %607 = vector.multi_reduction <maximumf>, %606, %cst_450 [1] : vector<1x10xf32> to vector<1xf32>
    %608 = vector.shape_cast %607 : vector<1xf32> to vector<1x1xf32>
    %609 = vector.broadcast %608 : vector<1x1xf32> to vector<1x10xf32>
    %610 = arith.subf %606, %609 : vector<1x10xf32>
    %611 = math.exp %610 : vector<1x10xf32>
    %cst_451 = arith.constant dense<0.000000e+00> : vector<1xf32>
    %612 = vector.multi_reduction <add>, %611, %cst_451 [1] : vector<1x10xf32> to vector<1xf32>
    %613 = vector.shape_cast %612 : vector<1xf32> to vector<1x1xf32>
    %614 = vector.broadcast %613 : vector<1x1xf32> to vector<1x10xf32>
    %615 = arith.divf %611, %614 : vector<1x10xf32>
    %cst_452 = arith.constant 0.000000e+00 : f32
    %616 = vector.broadcast %cst_452 : f32 to vector<16x10xf32>
    %617 = vector.extract_strided_slice %505 {offsets = [0, 16], sizes = [16, 1], strides = [1, 1]} : vector<16x32xf32> to vector<16x1xf32>
    %c0_453 = arith.constant 0 : index
    %c0_454 = arith.constant 0 : index
    %c0_455 = arith.constant 0 : index
    %618 = vector.load %arg18[%c0_453, %c0_454, %c0_455] : memref<16x16x10xf32, #tpu.memory_space<vmem>>, vector<1x16x10xf32>
    %619 = vector.shape_cast %618 : vector<1x16x10xf32> to vector<16x10xf32>
    %620 = vector.broadcast %617 : vector<16x1xf32> to vector<16x10xf32>
    %621 = arith.mulf %620, %619 : vector<16x10xf32>
    %622 = arith.addf %616, %621 : vector<16x10xf32>
    %623 = vector.extract_strided_slice %505 {offsets = [0, 17], sizes = [16, 1], strides = [1, 1]} : vector<16x32xf32> to vector<16x1xf32>
    %c1_456 = arith.constant 1 : index
    %c0_457 = arith.constant 0 : index
    %c0_458 = arith.constant 0 : index
    %624 = vector.load %arg18[%c1_456, %c0_457, %c0_458] : memref<16x16x10xf32, #tpu.memory_space<vmem>>, vector<1x16x10xf32>
    %625 = vector.shape_cast %624 : vector<1x16x10xf32> to vector<16x10xf32>
    %626 = vector.broadcast %623 : vector<16x1xf32> to vector<16x10xf32>
    %627 = arith.mulf %626, %625 : vector<16x10xf32>
    %628 = arith.addf %622, %627 : vector<16x10xf32>
    %629 = vector.extract_strided_slice %505 {offsets = [0, 18], sizes = [16, 1], strides = [1, 1]} : vector<16x32xf32> to vector<16x1xf32>
    %c2_459 = arith.constant 2 : index
    %c0_460 = arith.constant 0 : index
    %c0_461 = arith.constant 0 : index
    %630 = vector.load %arg18[%c2_459, %c0_460, %c0_461] : memref<16x16x10xf32, #tpu.memory_space<vmem>>, vector<1x16x10xf32>
    %631 = vector.shape_cast %630 : vector<1x16x10xf32> to vector<16x10xf32>
    %632 = vector.broadcast %629 : vector<16x1xf32> to vector<16x10xf32>
    %633 = arith.mulf %632, %631 : vector<16x10xf32>
    %634 = arith.addf %628, %633 : vector<16x10xf32>
    %635 = vector.extract_strided_slice %505 {offsets = [0, 19], sizes = [16, 1], strides = [1, 1]} : vector<16x32xf32> to vector<16x1xf32>
    %c3_462 = arith.constant 3 : index
    %c0_463 = arith.constant 0 : index
    %c0_464 = arith.constant 0 : index
    %636 = vector.load %arg18[%c3_462, %c0_463, %c0_464] : memref<16x16x10xf32, #tpu.memory_space<vmem>>, vector<1x16x10xf32>
    %637 = vector.shape_cast %636 : vector<1x16x10xf32> to vector<16x10xf32>
    %638 = vector.broadcast %635 : vector<16x1xf32> to vector<16x10xf32>
    %639 = arith.mulf %638, %637 : vector<16x10xf32>
    %640 = arith.addf %634, %639 : vector<16x10xf32>
    %641 = vector.extract_strided_slice %505 {offsets = [0, 20], sizes = [16, 1], strides = [1, 1]} : vector<16x32xf32> to vector<16x1xf32>
    %c4_465 = arith.constant 4 : index
    %c0_466 = arith.constant 0 : index
    %c0_467 = arith.constant 0 : index
    %642 = vector.load %arg18[%c4_465, %c0_466, %c0_467] : memref<16x16x10xf32, #tpu.memory_space<vmem>>, vector<1x16x10xf32>
    %643 = vector.shape_cast %642 : vector<1x16x10xf32> to vector<16x10xf32>
    %644 = vector.broadcast %641 : vector<16x1xf32> to vector<16x10xf32>
    %645 = arith.mulf %644, %643 : vector<16x10xf32>
    %646 = arith.addf %640, %645 : vector<16x10xf32>
    %647 = vector.extract_strided_slice %505 {offsets = [0, 21], sizes = [16, 1], strides = [1, 1]} : vector<16x32xf32> to vector<16x1xf32>
    %c5_468 = arith.constant 5 : index
    %c0_469 = arith.constant 0 : index
    %c0_470 = arith.constant 0 : index
    %648 = vector.load %arg18[%c5_468, %c0_469, %c0_470] : memref<16x16x10xf32, #tpu.memory_space<vmem>>, vector<1x16x10xf32>
    %649 = vector.shape_cast %648 : vector<1x16x10xf32> to vector<16x10xf32>
    %650 = vector.broadcast %647 : vector<16x1xf32> to vector<16x10xf32>
    %651 = arith.mulf %650, %649 : vector<16x10xf32>
    %652 = arith.addf %646, %651 : vector<16x10xf32>
    %653 = vector.extract_strided_slice %505 {offsets = [0, 22], sizes = [16, 1], strides = [1, 1]} : vector<16x32xf32> to vector<16x1xf32>
    %c6_471 = arith.constant 6 : index
    %c0_472 = arith.constant 0 : index
    %c0_473 = arith.constant 0 : index
    %654 = vector.load %arg18[%c6_471, %c0_472, %c0_473] : memref<16x16x10xf32, #tpu.memory_space<vmem>>, vector<1x16x10xf32>
    %655 = vector.shape_cast %654 : vector<1x16x10xf32> to vector<16x10xf32>
    %656 = vector.broadcast %653 : vector<16x1xf32> to vector<16x10xf32>
    %657 = arith.mulf %656, %655 : vector<16x10xf32>
    %658 = arith.addf %652, %657 : vector<16x10xf32>
    %659 = vector.extract_strided_slice %505 {offsets = [0, 23], sizes = [16, 1], strides = [1, 1]} : vector<16x32xf32> to vector<16x1xf32>
    %c7_474 = arith.constant 7 : index
    %c0_475 = arith.constant 0 : index
    %c0_476 = arith.constant 0 : index
    %660 = vector.load %arg18[%c7_474, %c0_475, %c0_476] : memref<16x16x10xf32, #tpu.memory_space<vmem>>, vector<1x16x10xf32>
    %661 = vector.shape_cast %660 : vector<1x16x10xf32> to vector<16x10xf32>
    %662 = vector.broadcast %659 : vector<16x1xf32> to vector<16x10xf32>
    %663 = arith.mulf %662, %661 : vector<16x10xf32>
    %664 = arith.addf %658, %663 : vector<16x10xf32>
    %665 = vector.extract_strided_slice %505 {offsets = [0, 24], sizes = [16, 1], strides = [1, 1]} : vector<16x32xf32> to vector<16x1xf32>
    %c8_477 = arith.constant 8 : index
    %c0_478 = arith.constant 0 : index
    %c0_479 = arith.constant 0 : index
    %666 = vector.load %arg18[%c8_477, %c0_478, %c0_479] : memref<16x16x10xf32, #tpu.memory_space<vmem>>, vector<1x16x10xf32>
    %667 = vector.shape_cast %666 : vector<1x16x10xf32> to vector<16x10xf32>
    %668 = vector.broadcast %665 : vector<16x1xf32> to vector<16x10xf32>
    %669 = arith.mulf %668, %667 : vector<16x10xf32>
    %670 = arith.addf %664, %669 : vector<16x10xf32>
    %671 = vector.extract_strided_slice %505 {offsets = [0, 25], sizes = [16, 1], strides = [1, 1]} : vector<16x32xf32> to vector<16x1xf32>
    %c9_480 = arith.constant 9 : index
    %c0_481 = arith.constant 0 : index
    %c0_482 = arith.constant 0 : index
    %672 = vector.load %arg18[%c9_480, %c0_481, %c0_482] : memref<16x16x10xf32, #tpu.memory_space<vmem>>, vector<1x16x10xf32>
    %673 = vector.shape_cast %672 : vector<1x16x10xf32> to vector<16x10xf32>
    %674 = vector.broadcast %671 : vector<16x1xf32> to vector<16x10xf32>
    %675 = arith.mulf %674, %673 : vector<16x10xf32>
    %676 = arith.addf %670, %675 : vector<16x10xf32>
    %677 = vector.extract_strided_slice %505 {offsets = [0, 26], sizes = [16, 1], strides = [1, 1]} : vector<16x32xf32> to vector<16x1xf32>
    %c10_483 = arith.constant 10 : index
    %c0_484 = arith.constant 0 : index
    %c0_485 = arith.constant 0 : index
    %678 = vector.load %arg18[%c10_483, %c0_484, %c0_485] : memref<16x16x10xf32, #tpu.memory_space<vmem>>, vector<1x16x10xf32>
    %679 = vector.shape_cast %678 : vector<1x16x10xf32> to vector<16x10xf32>
    %680 = vector.broadcast %677 : vector<16x1xf32> to vector<16x10xf32>
    %681 = arith.mulf %680, %679 : vector<16x10xf32>
    %682 = arith.addf %676, %681 : vector<16x10xf32>
    %683 = vector.extract_strided_slice %505 {offsets = [0, 27], sizes = [16, 1], strides = [1, 1]} : vector<16x32xf32> to vector<16x1xf32>
    %c11_486 = arith.constant 11 : index
    %c0_487 = arith.constant 0 : index
    %c0_488 = arith.constant 0 : index
    %684 = vector.load %arg18[%c11_486, %c0_487, %c0_488] : memref<16x16x10xf32, #tpu.memory_space<vmem>>, vector<1x16x10xf32>
    %685 = vector.shape_cast %684 : vector<1x16x10xf32> to vector<16x10xf32>
    %686 = vector.broadcast %683 : vector<16x1xf32> to vector<16x10xf32>
    %687 = arith.mulf %686, %685 : vector<16x10xf32>
    %688 = arith.addf %682, %687 : vector<16x10xf32>
    %689 = vector.extract_strided_slice %505 {offsets = [0, 28], sizes = [16, 1], strides = [1, 1]} : vector<16x32xf32> to vector<16x1xf32>
    %c12_489 = arith.constant 12 : index
    %c0_490 = arith.constant 0 : index
    %c0_491 = arith.constant 0 : index
    %690 = vector.load %arg18[%c12_489, %c0_490, %c0_491] : memref<16x16x10xf32, #tpu.memory_space<vmem>>, vector<1x16x10xf32>
    %691 = vector.shape_cast %690 : vector<1x16x10xf32> to vector<16x10xf32>
    %692 = vector.broadcast %689 : vector<16x1xf32> to vector<16x10xf32>
    %693 = arith.mulf %692, %691 : vector<16x10xf32>
    %694 = arith.addf %688, %693 : vector<16x10xf32>
    %695 = vector.extract_strided_slice %505 {offsets = [0, 29], sizes = [16, 1], strides = [1, 1]} : vector<16x32xf32> to vector<16x1xf32>
    %c13_492 = arith.constant 13 : index
    %c0_493 = arith.constant 0 : index
    %c0_494 = arith.constant 0 : index
    %696 = vector.load %arg18[%c13_492, %c0_493, %c0_494] : memref<16x16x10xf32, #tpu.memory_space<vmem>>, vector<1x16x10xf32>
    %697 = vector.shape_cast %696 : vector<1x16x10xf32> to vector<16x10xf32>
    %698 = vector.broadcast %695 : vector<16x1xf32> to vector<16x10xf32>
    %699 = arith.mulf %698, %697 : vector<16x10xf32>
    %700 = arith.addf %694, %699 : vector<16x10xf32>
    %701 = vector.extract_strided_slice %505 {offsets = [0, 30], sizes = [16, 1], strides = [1, 1]} : vector<16x32xf32> to vector<16x1xf32>
    %c14_495 = arith.constant 14 : index
    %c0_496 = arith.constant 0 : index
    %c0_497 = arith.constant 0 : index
    %702 = vector.load %arg18[%c14_495, %c0_496, %c0_497] : memref<16x16x10xf32, #tpu.memory_space<vmem>>, vector<1x16x10xf32>
    %703 = vector.shape_cast %702 : vector<1x16x10xf32> to vector<16x10xf32>
    %704 = vector.broadcast %701 : vector<16x1xf32> to vector<16x10xf32>
    %705 = arith.mulf %704, %703 : vector<16x10xf32>
    %706 = arith.addf %700, %705 : vector<16x10xf32>
    %707 = vector.extract_strided_slice %505 {offsets = [0, 31], sizes = [16, 1], strides = [1, 1]} : vector<16x32xf32> to vector<16x1xf32>
    %c15_498 = arith.constant 15 : index
    %c0_499 = arith.constant 0 : index
    %c0_500 = arith.constant 0 : index
    %708 = vector.load %arg18[%c15_498, %c0_499, %c0_500] : memref<16x16x10xf32, #tpu.memory_space<vmem>>, vector<1x16x10xf32>
    %709 = vector.shape_cast %708 : vector<1x16x10xf32> to vector<16x10xf32>
    %710 = vector.broadcast %707 : vector<16x1xf32> to vector<16x10xf32>
    %711 = arith.mulf %710, %709 : vector<16x10xf32>
    %712 = arith.addf %706, %711 : vector<16x10xf32>
    %cst_501 = arith.constant dense<0.000000e+00> : vector<10xf32>
    %713 = vector.multi_reduction <add>, %712, %cst_501 [0] : vector<16x10xf32> to vector<10xf32>
    %714 = vector.shape_cast %713 : vector<10xf32> to vector<1x10xf32>
    %c0_502 = arith.constant 0 : index
    %c0_503 = arith.constant 0 : index
    %715 = vector.load %arg19[%c0_502, %c0_503] : memref<1x10xf32, #tpu.memory_space<vmem>>, vector<1x10xf32>
    %716 = arith.addf %714, %715 : vector<1x10xf32>
    %cst_504 = arith.constant dense<0xFF800000> : vector<1xf32>
    %717 = vector.multi_reduction <maximumf>, %716, %cst_504 [1] : vector<1x10xf32> to vector<1xf32>
    %718 = vector.shape_cast %717 : vector<1xf32> to vector<1x1xf32>
    %719 = vector.broadcast %718 : vector<1x1xf32> to vector<1x10xf32>
    %720 = arith.subf %716, %719 : vector<1x10xf32>
    %721 = math.exp %720 : vector<1x10xf32>
    %cst_505 = arith.constant dense<0.000000e+00> : vector<1xf32>
    %722 = vector.multi_reduction <add>, %721, %cst_505 [1] : vector<1x10xf32> to vector<1xf32>
    %723 = vector.shape_cast %722 : vector<1xf32> to vector<1x1xf32>
    %724 = vector.broadcast %723 : vector<1x1xf32> to vector<1x10xf32>
    %725 = arith.divf %721, %724 : vector<1x10xf32>
    %726 = vector.shape_cast %615 : vector<1x10xf32> to vector<1x1x10xf32>
    %c0_506 = arith.constant 0 : index
    %c0_507 = arith.constant 0 : index
    %c0_508 = arith.constant 0 : index
    %727 = vector.load %arg20[%c0_506, %c0_507, %c0_508] : memref<1x2x10xf32, #tpu.memory_space<vmem>>, vector<1x1x10xf32>
    tpu.vector_store %arg20[%c0_506, %c0_507, %c0_508], %726 {strides = array<i32>} : memref<1x2x10xf32, #tpu.memory_space<vmem>>, vector<1x1x10xf32>,
    %728 = vector.shape_cast %725 : vector<1x10xf32> to vector<1x1x10xf32>
    %c0_509 = arith.constant 0 : index
    %c1_510 = arith.constant 1 : index
    %c0_511 = arith.constant 0 : index
    %729 = vector.load %arg20[%c0_509, %c1_510, %c0_511] : memref<1x2x10xf32, #tpu.memory_space<vmem>>, vector<1x1x10xf32>
    tpu.vector_store %arg20[%c0_509, %c1_510, %c0_511], %728 {strides = array<i32>} : memref<1x2x10xf32, #tpu.memory_space<vmem>>, vector<1x1x10xf32>,
    return
  }
  func.func @transform_0(%arg0: i32) -> (i32, i32, i32) {
    %c0_i32 = arith.constant 0 : i32
    %c0_i32_0 = arith.constant 0 : i32
    %c0_i32_1 = arith.constant 0 : i32
    return %arg0, %c0_i32, %c0_i32_0 : i32, i32, i32
  }
  func.func @transform_1(%arg0: i32) -> (i32, i32, i32) {
    %c0_i32 = arith.constant 0 : i32
    %c0_i32_0 = arith.constant 0 : i32
    %c0_i32_1 = arith.constant 0 : i32
    %c0_i32_2 = arith.constant 0 : i32
    return %c0_i32, %c0_i32_0, %c0_i32_1 : i32, i32, i32
  }
  func.func @transform_2(%arg0: i32) -> (i32, i32, i32) {
    %c0_i32 = arith.constant 0 : i32
    %c0_i32_0 = arith.constant 0 : i32
    %c0_i32_1 = arith.constant 0 : i32
    %c0_i32_2 = arith.constant 0 : i32
    return %c0_i32, %c0_i32_0, %c0_i32_1 : i32, i32, i32
  }
  func.func @transform_3(%arg0: i32) -> (i32, i32) {
    %c0_i32 = arith.constant 0 : i32
    %c0_i32_0 = arith.constant 0 : i32
    %c0_i32_1 = arith.constant 0 : i32
    return %c0_i32, %c0_i32_0 : i32, i32
  }
  func.func @transform_4(%arg0: i32) -> (i32, i32) {
    %c0_i32 = arith.constant 0 : i32
    %c0_i32_0 = arith.constant 0 : i32
    %c0_i32_1 = arith.constant 0 : i32
    return %c0_i32, %c0_i32_0 : i32, i32
  }
  func.func @transform_5(%arg0: i32) -> (i32, i32, i32) {
    %c0_i32 = arith.constant 0 : i32
    %c0_i32_0 = arith.constant 0 : i32
    %c0_i32_1 = arith.constant 0 : i32
    %c0_i32_2 = arith.constant 0 : i32
    return %c0_i32, %c0_i32_0, %c0_i32_1 : i32, i32, i32
  }
  func.func @transform_6(%arg0: i32) -> (i32, i32) {
    %c0_i32 = arith.constant 0 : i32
    %c0_i32_0 = arith.constant 0 : i32
    %c0_i32_1 = arith.constant 0 : i32
    return %c0_i32, %c0_i32_0 : i32, i32
  }
  func.func @transform_7(%arg0: i32) -> (i32, i32, i32) {
    %c0_i32 = arith.constant 0 : i32
    %c0_i32_0 = arith.constant 0 : i32
    %c0_i32_1 = arith.constant 0 : i32
    %c0_i32_2 = arith.constant 0 : i32
    return %c0_i32, %c0_i32_0, %c0_i32_1 : i32, i32, i32
  }
  func.func @transform_8(%arg0: i32) -> (i32, i32) {
    %c0_i32 = arith.constant 0 : i32
    %c0_i32_0 = arith.constant 0 : i32
    %c0_i32_1 = arith.constant 0 : i32
    return %c0_i32, %c0_i32_0 : i32, i32
  }
  func.func @transform_9(%arg0: i32) -> (i32, i32, i32) {
    %c0_i32 = arith.constant 0 : i32
    %c0_i32_0 = arith.constant 0 : i32
    %c0_i32_1 = arith.constant 0 : i32
    %c0_i32_2 = arith.constant 0 : i32
    return %c0_i32, %c0_i32_0, %c0_i32_1 : i32, i32, i32
  }
  func.func @transform_10(%arg0: i32) -> (i32, i32) {
    %c0_i32 = arith.constant 0 : i32
    %c0_i32_0 = arith.constant 0 : i32
    %c0_i32_1 = arith.constant 0 : i32
    return %c0_i32, %c0_i32_0 : i32, i32
  }
  func.func @transform_11(%arg0: i32) -> (i32, i32, i32) {
    %c0_i32 = arith.constant 0 : i32
    %c0_i32_0 = arith.constant 0 : i32
    %c0_i32_1 = arith.constant 0 : i32
    %c0_i32_2 = arith.constant 0 : i32
    return %c0_i32, %c0_i32_0, %c0_i32_1 : i32, i32, i32
  }
  func.func @transform_12(%arg0: i32) -> (i32, i32) {
    %c0_i32 = arith.constant 0 : i32
    %c0_i32_0 = arith.constant 0 : i32
    %c0_i32_1 = arith.constant 0 : i32
    return %c0_i32, %c0_i32_0 : i32, i32
  }
  func.func @transform_13(%arg0: i32) -> (i32, i32, i32) {
    %c0_i32 = arith.constant 0 : i32
    %c0_i32_0 = arith.constant 0 : i32
    %c0_i32_1 = arith.constant 0 : i32
    %c0_i32_2 = arith.constant 0 : i32
    return %c0_i32, %c0_i32_0, %c0_i32_1 : i32, i32, i32
  }
  func.func @transform_14(%arg0: i32) -> (i32, i32) {
    %c0_i32 = arith.constant 0 : i32
    %c0_i32_0 = arith.constant 0 : i32
    %c0_i32_1 = arith.constant 0 : i32
    return %c0_i32, %c0_i32_0 : i32, i32
  }
  func.func @transform_15(%arg0: i32) -> (i32, i32, i32) {
    %c0_i32 = arith.constant 0 : i32
    %c0_i32_0 = arith.constant 0 : i32
    %c0_i32_1 = arith.constant 0 : i32
    %c0_i32_2 = arith.constant 0 : i32
    return %c0_i32, %c0_i32_0, %c0_i32_1 : i32, i32, i32
  }
  func.func @transform_16(%arg0: i32) -> (i32, i32) {
    %c0_i32 = arith.constant 0 : i32
    %c0_i32_0 = arith.constant 0 : i32
    %c0_i32_1 = arith.constant 0 : i32
    return %c0_i32, %c0_i32_0 : i32, i32
  }
  func.func @transform_17(%arg0: i32) -> (i32, i32, i32) {
    %c0_i32 = arith.constant 0 : i32
    %c0_i32_0 = arith.constant 0 : i32
    %c0_i32_1 = arith.constant 0 : i32
    %c0_i32_2 = arith.constant 0 : i32
    return %c0_i32, %c0_i32_0, %c0_i32_1 : i32, i32, i32
  }
  func.func @transform_18(%arg0: i32) -> (i32, i32) {
    %c0_i32 = arith.constant 0 : i32
    %c0_i32_0 = arith.constant 0 : i32
    %c0_i32_1 = arith.constant 0 : i32
    return %c0_i32, %c0_i32_0 : i32, i32
  }
  func.func @transform_19(%arg0: i32) -> (i32, i32, i32) {
    %c0_i32 = arith.constant 0 : i32
    %c0_i32_0 = arith.constant 0 : i32
    %c0_i32_1 = arith.constant 0 : i32
    return %arg0, %c0_i32, %c0_i32_0 : i32, i32, i32
  }
}

</mosaic_0001>

<bundles_post_ra>
// kernel: net1_forward.1
= control target key start
LH: loop header
LB: loop body
LE: loop exit
PB: predicated region body
PF: predicated region fallthrough
CT: control target
= control target key end

     0   :  { %s7427_s0 = inlined_call_operand.vmem [shape: f32[4,1,512], index: 0, kind: input, shape index: {}]   ;;  %s7428_s1 = inlined_call_operand.vmem [shape: f32[9,1,512], index: 1, kind: input, shape index: {}]   ;;  %s7429_s2 = inlined_call_operand.vmem [shape: f32[9,1,128], index: 2, kind: input, shape index: {}]   ;;  %s7430_s3 = inlined_call_operand.vmem [shape: f32[512,128], index: 3, kind: input, shape index: {}]   ;;  %s7431_s4 = inlined_call_operand.vmem [shape: f32[128,32], index: 4, kind: input, shape index: {}]   ;;  %s7432_s5 = inlined_call_operand.vmem [shape: f32[9,8,1], index: 5, kind: input, shape index: {}]   ;;  %s7433_s6 = inlined_call_operand.vmem [shape: f32[8,1], index: 6, kind: input, shape index: {}]   ;;  %s7434_s7 = inlined_call_operand.vmem [shape: f32[9,8,8], index: 7, kind: input, shape index: {}]   ;;  %s7435_s8 = inlined_call_operand.vmem [shape: f32[8,1], index: 8, kind: input, shape index: {}]   ;;  %s7436_s9 = inlined_call_operand.vmem [shape: f32[9,8,8], index: 9, kind: input, shape index: {}]   ;;  %s7437_s10 = inlined_call_operand.vmem [shape: f32[8,1], index: 10, kind: input, shape index: {}]   ;;  %s7438_s11 = inlined_call_operand.vmem [shape: f32[9,16,8], index: 11, kind: input, shape index: {}]   ;;  %s7439_s12 = inlined_call_operand.vmem [shape: f32[16,1], index: 12, kind: input, shape index: {}]   ;;  %s7440_s13 = inlined_call_operand.vmem [shape: f32[9,16,16], index: 13, kind: input, shape index: {}]   ;;  %s7441_s14 = inlined_call_operand.vmem [shape: f32[16,1], index: 14, kind: input, shape index: {}]   ;;  %s7442_s15 = inlined_call_operand.vmem [shape: f32[9,16,16], index: 15, kind: input, shape index: {}]   ;;  %s7443_s16 = inlined_call_operand.vmem [shape: f32[16,1], index: 16, kind: input, shape index: {}]   ;;  %s7444_s17 = inlined_call_operand.vmem [shape: f32[16,16,10], index: 17, kind: input, shape index: {}]   ;;  %s7445_s18 = inlined_call_operand.vmem [shape: f32[1,10], index: 18, kind: input, shape index: {}]   ;;  %s7446_s19 = inlined_call_operand.hbm [shape: f32[4,2,10], index: 19, kind: output, shape index: {}]  }
   0x1   :  { %7512 = sst [smem:[#allocation31_spill]] %s7427_s0 }
   0x2   :  { %7513 = sst [smem:[#allocation32_spill]] %s7428_s1 }
   0x3   :  { %7514 = sst [smem:[#allocation33_spill]] %s7429_s2 }
   0x4   :  { %7515 = sst [smem:[#allocation34_spill]] %s7430_s3 }
   0x5   :  { %7516 = sst [smem:[#allocation35_spill]] %s7432_s5 }
   0x6   :  { %7517 = sst [smem:[#allocation36_spill]] %s7433_s6 }
   0x7   :  { %7518 = sst [smem:[#allocation37_spill]] %s7434_s7 }
   0x8   :  { %7519 = sst [smem:[#allocation38_spill]] %s7435_s8 }
   0x9   :  { %7520 = sst [smem:[#allocation39_spill]] %s7436_s9 }
   0xa   :  { %7521 = sst [smem:[#allocation40_spill]] %s7437_s10 }
   0xb   :  { %24 = vsyncpa [#allocation3], 0 }
   0xc   :  { %26 = vsyncpa [#allocation3 + $0x1], 0  ;;  %s5462_s0 = smov 0   ;;  %s5464_s30 = smov 0  }
   0xd   :  { %s5466_s20 = smov 0   ;;  %s5468_s21 = smov 0  }
   0xe LB: > { %7522 = sst [smem:[#allocation5_spill]] %s5310_s20  ;;  %s5483_s1 = sadd.s32 4294967295, %s5314_s21   ;;  %s5314_s21 = sphi %s5468_s21, %s7599_s21   ;;  %s5310_s20 = sphi %s5466_s20, %s7601_s20   ;;  %s5306_s30 = sphi %s5464_s30, %s7603_s30   ;;  %s5302_s0 = sphi %s5462_s0, %s7602_s0  }
   0xf   : > { %s4803_s22 = sadd.s32 4294967294, %s5314_s21   ;;  %s5487_s2 = sadd.s32 1, %s5314_s21  }
  0x10   : > { %7523 = sst [smem:[#allocation6_spill]] %s5487_s2  ;;  %s443_s23 = sadd.s32 1, %s5310_s20 }
  0x11   : > { %s440_s24 = ssub.s32 %s5314_s21, %s5487_s2  ;;  %p453_p0 = scmp.ne.s32.totalorder %s5310_s20, %s5306_s30 }
  0x12   : > { %p441_p1 = scmp.eq.s32.totalorder %s440_s24, 0  ;;  %p454_p2 = scmp.eq.s32.totalorder %s5483_s1, 3 }
  0x13   : > { %p459_p3 = scmp.ne.s32.totalorder %s5306_s30, %s5302_s0  ;;  %p460_p4 = scmp.eq.s32.totalorder %s4803_s22, 3 }
  0x14   : > { %s5498_s25 = scalar_select %p441_p1, %s5310_s20, %s443_s23  }
  0x15   : > { %p5500_p5 = por %p454_p2, %p453_p0  ;;  %p5504_p6 = por %p460_p4, %p459_p3 }
  0x16   : > { %7524 = sst [smem:[#allocation7_spill]] %s5498_s25  ;;  %p4806_p7 = scmp.ge.s32.totalorder %s5314_s21, 1 }
  0x17   : > { %s7526_s26 = scalar_select %p5504_p6, 1, 0 }
  0x18   : > { %p539_p8 = scmp.lt.s32.totalorder %s5314_s21, 5 }
  0x19   : > { %7527 = sst [smem:[#allocation8_spill]] %s7526_s26 }
  0x1a   : > { %p540_p9 = pnand %p4806_p7, %p539_p8 }
  0x1c   : > { %543 = sbr.rel (%p540_p9) target bundleno = 3314 (0xcf2), region = 96 }
  0x21   : > { %p594_p10 = scmp.lt.s32.totalorder %s5483_s1, 3  ;;  %v7468_v0 = vmov 0   ;;  %s7528_s23 = sld [smem:[#allocation31_spill]]  ;;  %v616_v36 = vlaneseq  ;;  %vm1044_vm8 = vcmask 64512   ;;  %vm3455_vm9 = vcmask 130048  }
  0x22   : > { %5140 = vset.pattern.permute.xlu2 %v7468_v0  ;;  %5141 = vset.pattern.permute.xlu0 %v7468_v0  ;;  %s7455_s25 = smov 17   ;;  %s7453_s20 = smov 16   ;;  %vm4463_vm10 = vcmask 80896   ;;  %vm4475_vm11 = vcmask 73728  }
  0x23   : > { %s595_s27 = scalar_select %p594_p10, %s5483_s1, 3  ;;  %5142 = vset.pattern.permute.xlu1 %v7468_v0  ;;  %v5646_v37 = vand.u32 127, %v616_v36 }
  0x24   : > { %s7529_s5 = sld [smem:[#allocation35_spill]]  ;;  %s7457_s29 = smov 127  }
  0x25   : > { %s4808_s28 = sshll.u32 %s595_s27, 2  ;;  %s7451_s27 = smov 15   ;;  %vm659_vm0 = vcmp.lt.s32.totalorder %v5646_v37, 16  ;;  %vm618_vm1 = vcmp.lt.s32.totalorder %v5646_v37, 17  ;;  %vm706_vm2 = vcmp.lt.s32.totalorder %v5646_v37, 15  ;;  %vm753_vm3 = vcmp.lt.s32.totalorder %v5646_v37, 1 }
  0x26   : > { %s7481_s22 = smov 112   ;;  %s7531_s6 = sld [smem:[#allocation36_spill]]  ;;  %vm815_vm4 = vcmp.lt.s32.totalorder %v5646_v37, 127  ;;  %vm862_vm5 = vcmp.lt.s32.totalorder %v5646_v37, 113  ;;  %vm909_vm6 = vcmp.lt.s32.totalorder %v5646_v37, 112  ;;  %vm956_vm7 = vcmp.lt.s32.totalorder %v5646_v37, 111 }
  0x27   : > { %s597_s24 = scalar_lea.vmem %s7528_s23, %s4808_s28  ;;  %s7459_s28 = smov 1   ;;  %v3423_v37 = vld [vmem:[%s7439_s12 + $0x8] sm:$0xff] }
  0x28   : > { %v598_v1 = vld [vmem:[%s597_s24] sm:$0xf]  ;;  %s7465_s24 = smov 111   ;;  %s7532_s23 = smov 111  }
  0x29   : > { %v5518_v2 = vperm.slane %v598_v1, 2  ;;  %v5520_v3 = vperm.slane %v598_v1, 1  ;;  %v5522_v4 = vperm.slane %v598_v1, 0  ;;  %v5542_v5 = vperm.slane %v598_v1, 3  ;;  %s7558_s2 = smov 1   ;;  %s7559_s26 = smov 127  }
  0x2a   : > { %v637_v6 = vld [vmem:[%s7529_s5] sm:$0xff]  ;;  %v4812_v7 = vld [vmem:[%s7529_s5 + $0x10] sm:$0xff]  ;;  %v4810_v8 = vld [vmem:[%s7529_s5 + $0x8] sm:$0xff]  ;;  %s7561_s8 = sld [smem:[#allocation38_spill]] }
  0x2b   : > { %612 = vrot.lane.b32.xlu1 %v5518_v2, %s7455_s25  ;;  %653 = vrot.lane.b32.xlu2 %v5520_v3, %s7453_s20  ;;  %v4814_v9 = vld [vmem:[%s7529_s5 + $0x18] sm:$0xff]  ;;  %v4815_v10 = vld [vmem:[%s7529_s5 + $0x20] sm:$0xff]  ;;  %s7562_s7 = sld [smem:[#allocation37_spill]] }
  0x2c   : > { %608 = vrot.lane.b32.xlu0 %v5522_v4, %s7455_s25  ;;  %v4817_v11 = vld [vmem:[%s7529_s5 + $0x28] sm:$0xff]  ;;  %v4819_v13 = vld [vmem:[%s7529_s5 + $0x30] sm:$0xff]  ;;  %v4821_v14 = vld [vmem:[%s7529_s5 + $0x38] sm:$0xff]  ;;  %s7570_s10 = sld [smem:[#allocation40_spill]] }
  0x2d   : > { %v4823_v16 = vld [vmem:[%s7529_s5 + $0x40] sm:$0xff]  ;;  %s7571_s9 = sld [smem:[#allocation39_spill]]  ;;  %s7509_s5 = smov 8  }
  0x2e   : > { %v995_v17 = vld [vmem:[%s7531_s6] sm:$0xff]  ;;  %s7595_s6 = smov 8  }
  0x33   : > { %655 = vrot.lane.b32.xlu2 %v5518_v2, %s7453_s20  ;;  %651 = vrot.lane.b32.xlu1 %v5522_v4, %s7453_s20 }
  0x34   : > { %610 = vrot.lane.b32.xlu0 %v5520_v3, %s7455_s25 }
  0x3b   : > { %702 = vrot.lane.b32.xlu2 %v5518_v2, %s7451_s27  ;;  %700 = vrot.lane.b32.xlu1 %v5520_v3, %s7451_s27 }
  0x3c   : > { %698 = vrot.lane.b32.xlu0 %v5522_v4, %s7451_s27  ;;  %s7557_s27 = smov 17  }
  0x43   : > { %745 = vrot.lane.b32.xlu2 %v5522_v4, %s7459_s28  ;;  %657 = vrot.lane.b32.xlu1 %v5542_v5, %s7453_s20  ;;  %s7461_s20 = smov 113  }
  0x44   : > { %614 = vrot.lane.b32.xlu0 %v5542_v5, %s7455_s25  ;;  %s7530_s25 = smov 15  }
  0x4b   : > { %640 = vperm.xlu2 %5140, %v637_v6   ;;  %749 = vrot.lane.b32.xlu1 %v5518_v2, %s7459_s28 }
  0x4c   : > { %747 = vrot.lane.b32.xlu0 %v5520_v3, %s7459_s28 }
  0x53   : > { %730 = vperm.xlu2 %5140, %v4812_v7   ;;  %704 = vrot.lane.b32.xlu1 %v5542_v5, %s7530_s25 }
  0x54   : > { %683 = vperm.xlu0 %5141, %v4810_v8  }
  0x5b   : > { %809 = vrot.lane.b32.xlu2 %v5520_v3, %s7457_s29  ;;  %751 = vrot.lane.b32.xlu1 %v5542_v5, %s7459_s28  ;;  %s7533_s28 = sld [smem:[#allocation32_spill]] }
  0x5c   : > { %811 = vrot.lane.b32.xlu0 %v5518_v2, %s7457_s29 }
  0x61   : > { %v4809_v41 = vld [vmem:[%s7533_s28 + $0x4] sm:$0xf]  ;;  %v623_v42 = vld [vmem:[%s7533_s28] sm:$0xf]  ;;  %v4811_v52 = vld [vmem:[%s7533_s28 + $0x8] sm:$0xf] }
  0x62   : > { %v5662_v43 = vperm.slane %v4809_v41, 2  ;;  %v5667_v45 = vperm.slane %v623_v42, 1  ;;  %v5669_v46 = vperm.slane %v623_v42, 2  ;;  %v5680_v51 = vperm.slane %v4809_v41, 1  ;;  %v4813_v1 = vld [vmem:[%s7533_s28 + $0xc] sm:$0xf] }
  0x63   : > { %777 = vperm.xlu2 %5140, %v4814_v9   ;;  %813 = vrot.lane.b32.xlu1 %v5542_v5, %s7457_s29  ;;  %v5695_v58 = vperm.slane %v4811_v52, 2  ;;  %v5697_v59 = vperm.slane %v4811_v52, 1  ;;  %v5704_v63 = vperm.slane %v4809_v41, 0  ;;  %v5712_v8 = vperm.slane %v623_v42, 0 }
  0x64   : > { %856 = vrot.lane.b32.xlu0 %v5520_v3, %s7461_s20  ;;  %v5714_v9 = vperm.slane %v623_v42, 3  ;;  %v5733_v42 = vperm.slane %v4811_v52, 3 }
  0x65   : > { %7534 = vst [vmem:[#allocation9_spill] sm:$0xff] %v5697_v59 }
  0x6b   : > { %860 = vrot.lane.b32.xlu2 %v5542_v5, %s7461_s20  ;;  %858 = vrot.lane.b32.xlu1 %v5518_v2, %s7461_s20 }
  0x6c   : > { %796 = vperm.xlu0 %5141, %v4815_v10  }
  0x73   : > { %903 = vrot.lane.b32.xlu2 %v5520_v3, %s7481_s22  ;;  %807 = vrot.lane.b32.xlu1 %v5522_v4, %s7457_s29  ;;  %s7560_s29 = smov 113  }
  0x74   : > { %905 = vrot.lane.b32.xlu0 %v5518_v2, %s7481_s22 }
  0x7b   : > { %839 = vperm.xlu2 %5140, %v4817_v11   ;;  %907 = vrot.lane.b32.xlu1 %v5542_v5, %s7481_s22  ;;  %v5716_v11 = vperm.slane %v4809_v41, 3  ;;  %v5731_v41 = vperm.slane %v4811_v52, 0 }
  0x7c   : > { %854 = vrot.lane.b32.xlu0 %v5522_v4, %s7461_s20  ;;  %s7592_s20 = smov 121  }
  0x7d   : > { %7536 = vst [vmem:[#allocation11_spill] sm:$0xff] %v5731_v41 }
  0x83   : > { %952 = vrot.lane.b32.xlu2 %v5518_v2, %s7465_s24  ;;  %950 = vrot.lane.b32.xlu1 %v5520_v3, %s7465_s24 }
  0x84   : > { %954 = vrot.lane.b32.xlu0 %v5542_v5, %s7465_s24  ;;  %s7554_s24 = smov 16  }
  0x85   : > { %v654_v12 = vpop.permute.xlu2 %653 }
  0x8b   : > { %901 = vrot.lane.b32.xlu2 %v5522_v4, %s7481_s22  ;;  %886 = vperm.xlu1 %5142, %v4819_v13  }
  0x8c   : > { %933 = vperm.xlu0 %5141, %v4821_v14  }
  0x8d   : > { %v5612_v15 = vpop.permute.xlu2 %655 }
  0x8e   : > { %v661_v44 = vsel %vm659_vm0, %v654_v12, %v5612_v15 }
  0x8f   : > { %v5678_v50 = vmul.f32 %v5662_v43, %v661_v44 }
  0x91   : > { %v688_v60 = vperm.slane %v5678_v50, 0 }
  0x93   : > { %980 = vperm.xlu2 %5140, %v4823_v16   ;;  %948 = vrot.lane.b32.xlu1 %v5522_v4, %s7532_s23  ;;  %v5724_v16 = vperm.slane %v4813_v1, 1 }
  0x94   : > { %998 = vperm.xlu0 %5141, %v995_v17   ;;  %v5726_v17 = vperm.slane %v4813_v1, 2 }
  0x95   : > { %v5622_v18 = vpop.permute.xlu2 %702  ;;  %7535 = vst [vmem:[#allocation10_spill] sm:$0xff] %v5724_v16 }
  0x9d   : > { %v613_v19 = vpop.permute.xlu1 %612  ;;  %v5624_v20 = vpop.permute.xlu2 %745 }
  0x9e   : > { %v609_v21 = vpop.permute.xlu0 %608 }
  0xa5   : > { %v5626_v22 = vpop.permute.xlu1 %651  ;;  %v5628_v23 = vpop.permute.xlu2 %640 }
  0xa6   : > { %v611_v24 = vpop.permute.xlu0 %610  ;;  %v662_v54 = vsel %vm659_vm0, %v5626_v22, %v654_v12 }
  0xa7   : > { %v621_v47 = vsel %vm618_vm1, %v609_v21, %v611_v24  ;;  %v620_v48 = vsel %vm618_vm1, %v611_v24, %v613_v19  ;;  %v676_v61 = vmul.f32 %v5680_v51, %v662_v54  ;;  %v5752_v54 = vperm.slane %v4813_v1, 0 }
  0xa8   : > { %v634_v55 = vmul.f32 %v5667_v45, %v621_v47  ;;  %v635_v56 = vmul.f32 %v5669_v46, %v620_v48 }
  0xa9   : > { %7537 = vst [vmem:[#allocation12_spill] sm:$0xff] %v5752_v54 }
  0xaa   : > { %v644_v6 = vperm.slane %v634_v55, 0  ;;  %v645_v10 = vperm.slane %v635_v56, 0  ;;  %v5757_v56 = vperm.slane %v4813_v1, 3 }
  0xac   : > { %v649_v48 = vmul.f32 %v645_v10, %v5628_v23  ;;  %7538 = vst [vmem:[#allocation13_spill] sm:$0xff] %v5757_v56 }
  0xad   : > { %v701_v25 = vpop.permute.xlu1 %700  ;;  %v5632_v27 = vpop.permute.xlu2 %730 }
  0xae   : > { %v5630_v26 = vpop.permute.xlu0 %698  ;;  %v708_v62 = vsel %vm706_vm2, %v701_v25, %v5622_v18 }
  0xaf   : > { %v709_v7 = vsel %vm706_vm2, %v5630_v26, %v701_v25  ;;  %v724_v14 = vmul.f32 %v5695_v58, %v708_v62  ;;  %v687_v25 = vperm.slane %v676_v61, 0 }
  0xb0   : > { %v723_v36 = vmul.f32 %v5697_v59, %v709_v7 }
  0xb1   : > { %v735_v55 = vperm.slane %v724_v14, 0 }
  0xb2   : > { %v734_v61 = vperm.slane %v723_v36, 0 }
  0xb5   : > { %v5634_v28 = vpop.permute.xlu1 %657  ;;  %v5636_v30 = vpop.permute.xlu2 %809 }
  0xb6   : > { %v615_v29 = vpop.permute.xlu0 %614  ;;  %v660_v50 = vsel %vm659_vm0, %v5612_v15, %v5634_v28 }
  0xb7   : > { %v619_v12 = vsel %vm618_vm1, %v613_v19, %v615_v29  ;;  %v622_v13 = vsel %vm618_vm1, %v615_v29, %v609_v21  ;;  %v648_v21 = vmul.f32 %v644_v6, %v5628_v23  ;;  %v663_v29 = vsel %vm659_vm0, %v5634_v28, %v5626_v22 }
  0xb8   : > { %v633_v44 = vmul.f32 %v5712_v8, %v622_v13  ;;  %v636_v47 = vmul.f32 %v5714_v9, %v619_v12  ;;  %v675_v62 = vmul.f32 %v5704_v63, %v663_v29 }
  0xba   : > { %v643_v1 = vperm.slane %v633_v44, 0  ;;  %v646_v6 = vperm.slane %v636_v47, 0 }
  0xbd   : > { %v5638_v31 = vpop.permute.xlu1 %749  ;;  %v5642_v33 = vpop.permute.xlu2 %777 }
  0xbe   : > { %v5640_v32 = vpop.permute.xlu0 %747 }
  0xbf   : > { %v755_v15 = vsel %vm753_vm3, %v5640_v32, %v5638_v31 }
  0xc0   : > { %v771_v36 = vmul.f32 %v5726_v17, %v755_v15 }
  0xc2   : > { %v782_v59 = vperm.slane %v771_v36, 0 }
  0xc4   : > { %v786_v36 = vmul.f32 %v782_v59, %v5642_v33 }
  0xc5   : > { %v705_v34 = vpop.permute.xlu1 %704  ;;  %v5650_v39 = vpop.permute.xlu2 %860 }
  0xc6   : > { %v5644_v35 = vpop.permute.xlu0 %683  ;;  %v710_v52 = vsel %vm706_vm2, %v705_v34, %v5630_v26  ;;  %v707_v22 = vsel %vm706_vm2, %v5622_v18, %v705_v34  ;;  %v756_v26 = vsel %vm753_vm3, %v5624_v20, %v5640_v32  ;;  %v4816_v18 = vld [vmem:[%s7533_s28 + $0x14] sm:$0xf]  ;;  %v678_v34 = vmul.f32 %v5716_v11, %v660_v50 }
  0xc7   : > { %v722_v7 = vmul.f32 %v5731_v41, %v710_v52  ;;  %v725_v10 = vmul.f32 %v5733_v42, %v707_v22  ;;  %v691_v12 = vmul.f32 %v687_v25, %v5644_v35  ;;  %v770_v14 = vmul.f32 %v5724_v16, %v756_v26  ;;  %v4818_v26 = vld [vmem:[%s7533_s28 + $0x18] sm:$0xf] }
  0xc8   : > { %v692_v29 = vmul.f32 %v688_v60, %v5644_v35  ;;  %v5789_v44 = vperm.slane %v4816_v18, 1  ;;  %v739_v25 = vmul.f32 %v735_v55, %v5632_v27  ;;  %v738_v50 = vmul.f32 %v734_v61, %v5632_v27 }
  0xc9   : > { %v5795_v52 = vperm.slane %v4816_v18, 2  ;;  %v650_v55 = vmul.f32 %v646_v6, %v5628_v23  ;;  %v733_v0 = vperm.slane %v722_v7, 0  ;;  %v736_v61 = vperm.slane %v725_v10, 0 }
  0xca   : > { %v781_v16 = vperm.slane %v770_v14, 0  ;;  %v696_v41 = vadd.f32 %v692_v29, %v649_v48  ;;  %v5838_v59 = vperm.slane %v4816_v18, 3 }
  0xcb   : > { %v737_v48 = vmul.f32 %v733_v0, %v5632_v27  ;;  %v740_v7 = vmul.f32 %v736_v61, %v5632_v27 }
  0xcc   : > { %v785_v14 = vmul.f32 %v781_v16, %v5642_v33  ;;  %v743_v29 = vadd.f32 %v739_v25, %v696_v41  ;;  %7542 = vst [vmem:[#allocation17_spill] sm:$0xff] %v5838_v59 }
  0xcd   : > { %v5648_v38 = vpop.permute.xlu1 %751  ;;  %v5693_v57 = vpop.permute.xlu2 %903 }
  0xce   : > { %v5652_v40 = vpop.permute.xlu0 %811  ;;  %v754_v32 = vsel %vm753_vm3, %v5638_v31, %v5648_v38  ;;  %v757_v13 = vsel %vm753_vm3, %v5648_v38, %v5624_v20  ;;  %v686_v31 = vperm.slane %v675_v62, 0  ;;  %v689_v20 = vperm.slane %v678_v34, 0  ;;  %v4820_v34 = vld [vmem:[%s7533_s28 + $0x1c] sm:$0xf] }
  0xcf   : > { %v647_v38 = vmul.f32 %v643_v1, %v5628_v23  ;;  %v769_v15 = vmul.f32 %v5752_v54, %v757_v13  ;;  %v772_v60 = vmul.f32 %v5757_v56, %v754_v32  ;;  %v695_v62 = vadd.f32 %v691_v12, %v648_v21 }
  0xd0   : > { %v690_v1 = vmul.f32 %v686_v31, %v5644_v35  ;;  %v693_v32 = vmul.f32 %v689_v20, %v5644_v35  ;;  %v5812_v13 = vperm.slane %v4818_v26, 1  ;;  %v5814_v56 = vperm.slane %v4818_v26, 2 }
  0xd1   : > { %v780_v23 = vperm.slane %v769_v15, 0  ;;  %v783_v6 = vperm.slane %v772_v60, 0  ;;  %v817_v21 = vsel %vm815_vm4, %v5636_v30, %v5652_v40  ;;  %v742_v10 = vadd.f32 %v738_v50, %v695_v62  ;;  %v5847_v62 = vld [vmem:[%s7533_s28 + $0x20] sm:$0xf] }
  0xd2   : > { %7539 = vst [vmem:[#allocation14_spill] sm:$0xff] %v5812_v13  ;;  %v5823_v35 = vperm.slane %v4820_v34, 0  ;;  %v5827_v31 = vperm.slane %v4816_v18, 0  ;;  %v694_v15 = vadd.f32 %v690_v1, %v647_v38  ;;  %v697_v60 = vadd.f32 %v693_v32, %v650_v55 }
  0xd3   : > { %7540 = vst [vmem:[#allocation15_spill] sm:$0xff] %v5814_v56  ;;  %v832_v54 = vmul.f32 %v5789_v44, %v817_v21  ;;  %v784_v50 = vmul.f32 %v780_v23, %v5642_v33  ;;  %v787_v16 = vmul.f32 %v783_v6, %v5642_v33  ;;  %v5840_v41 = vperm.slane %v4820_v34, 1 }
  0xd4   : > { %7541 = vst [vmem:[#allocation16_spill] sm:$0xff] %v5823_v35  ;;  %v741_v25 = vadd.f32 %v737_v48, %v694_v15  ;;  %v744_v61 = vadd.f32 %v740_v7, %v697_v60  ;;  %v789_v38 = vadd.f32 %v785_v14, %v742_v10  ;;  %v5842_v55 = vperm.slane %v4820_v34, 2 }
  0xd5   : > { %v5675_v49 = vpop.permute.xlu1 %813  ;;  %v5772_v28 = vpop.permute.xlu2 %839  ;;  %7543 = vst [vmem:[#allocation18_spill] sm:$0xff] %v5840_v41  ;;  %v790_v1 = vadd.f32 %v786_v36, %v743_v29  ;;  %v5850_v32 = vperm.slane %v4820_v34, 3  ;;  %v5852_v33 = vperm.slane %v4818_v26, 0  ;;  %v843_v18 = vperm.slane %v832_v54, 0 }
  0xd6   : > { %v5685_v53 = vpop.permute.xlu0 %856  ;;  %v816_v0 = vsel %vm815_vm4, %v5652_v40, %v5675_v49  ;;  %7544 = vst [vmem:[#allocation19_spill] sm:$0xff] %v5842_v55  ;;  %v5862_v21 = vperm.slane %v4818_v26, 3  ;;  %v788_v48 = vadd.f32 %v784_v50, %v741_v25  ;;  %v791_v7 = vadd.f32 %v787_v16, %v744_v61 }
  0xd7   : > { %v833_v40 = vmul.f32 %v5795_v52, %v816_v0  ;;  %7545 = vst [vmem:[#allocation20_spill] sm:$0xff] %v5850_v32  ;;  %v5866_v34 = vperm.slane %v5847_v62, 1 }
  0xd8   : > { %7546 = vst [vmem:[#allocation21_spill] sm:$0xff] %v5852_v33 }
  0xd9   : > { %7547 = vst [vmem:[#allocation22_spill] sm:$0xff] %v5862_v21  ;;  %v844_v14 = vperm.slane %v833_v40, 0 }
  0xda   : > { %7548 = vst [vmem:[#allocation23_spill] sm:$0xff] %v5866_v34 }
  0xdd   : > { %v5728_v24 = vpop.permute.xlu1 %858  ;;  %v953_v12 = vpop.permute.xlu2 %952 }
  0xde   : > { %v5735_v19 = vpop.permute.xlu0 %796  ;;  %v863_v23 = vsel %vm862_vm5, %v5728_v24, %v5650_v39  ;;  %v864_v6 = vsel %vm862_vm5, %v5685_v53, %v5728_v24 }
  0xdf   : > { %v800_v54 = vmul.f32 %v5735_v19, %v5520_v3  ;;  %v801_v10 = vmul.f32 %v5735_v19, %v5518_v2  ;;  %v879_v36 = vmul.f32 %v5812_v13, %v864_v6  ;;  %v880_v29 = vmul.f32 %v5814_v56, %v863_v23 }
  0xe0   : > { %v5885_v3 = vperm.slane %v5847_v62, 2  ;;  %v799_v2 = vmul.f32 %v5735_v19, %v5522_v4  ;;  %v847_v23 = vmul.f32 %v843_v18, %v5772_v28 }
  0xe1   : > { %v805_v25 = vadd.f32 %v801_v10, %v790_v1  ;;  %v891_v1 = vperm.slane %v880_v29, 0 }
  0xe2   : > { %7549 = vst [vmem:[#allocation24_spill] sm:$0xff] %v5885_v3 }
  0xe5   : > { %v5791_v47 = vpop.permute.xlu1 %807  ;;  %v902_v60 = vpop.permute.xlu2 %901 }
  0xe6   : > { %v5797_v22 = vpop.permute.xlu0 %905  ;;  %v818_v24 = vsel %vm815_vm4, %v5791_v47, %v5636_v30  ;;  %v819_v26 = vsel %vm815_vm4, %v5675_v49, %v5791_v47  ;;  %v802_v30 = vmul.f32 %v5735_v19, %v5542_v5  ;;  %v804_v19 = vadd.f32 %v800_v54, %v789_v38 }
  0xe7   : > { %v911_v49 = vsel %vm909_vm6, %v5693_v57, %v5797_v22  ;;  %v831_v50 = vmul.f32 %v5827_v31, %v818_v24  ;;  %v834_v16 = vmul.f32 %v5838_v59, %v819_v26  ;;  %v890_v38 = vperm.slane %v879_v36, 0 }
  0xe8   : > { %v926_v6 = vmul.f32 %v5840_v41, %v911_v49  ;;  %v806_v18 = vadd.f32 %v802_v30, %v791_v7  ;;  %v851_v13 = vadd.f32 %v847_v23, %v804_v19 }
  0xe9   : > { %v842_v10 = vperm.slane %v831_v50, 0 }
  0xed   : > { %v5829_v20 = vpop.permute.xlu1 %907  ;;  %v981_v19 = vpop.permute.xlu2 %980 }
  0xee   : > { %v855_v27 = vpop.permute.xlu0 %854  ;;  %v910_v4 = vsel %vm909_vm6, %v5797_v22, %v5829_v20  ;;  %v913_v50 = vsel %vm909_vm6, %v5829_v20, %v902_v60 }
  0xef   : > { %v865_v61 = vsel %vm862_vm5, %v855_v27, %v5685_v53  ;;  %v866_v40 = vsel %vm862_vm5, %v5650_v39, %v855_v27  ;;  %v927_v54 = vmul.f32 %v5842_v55, %v910_v4  ;;  %v845_v53 = vperm.slane %v834_v16, 0 }
  0xf0   : > { %v878_v26 = vmul.f32 %v5852_v33, %v865_v61  ;;  %v881_v39 = vmul.f32 %v5862_v21, %v866_v40  ;;  %v803_v27 = vadd.f32 %v799_v2, %v788_v48  ;;  %v846_v48 = vmul.f32 %v842_v10, %v5772_v28 }
  0xf1   : > { %v938_v16 = vperm.slane %v927_v54, 0  ;;  %v849_v7 = vmul.f32 %v845_v53, %v5772_v28  ;;  %v5934_v10 = vperm.slane %v5847_v62, 0 }
  0xf2   : > { %v889_v2 = vperm.slane %v878_v26, 0  ;;  %v892_v30 = vperm.slane %v881_v39, 0 }
  0xf3   : > { %7550 = vst [vmem:[#allocation25_spill] sm:$0xff] %v5934_v10  ;;  %v853_v53 = vadd.f32 %v849_v7, %v806_v18 }
  0xf5   : > { %v5882_v15 = vpop.permute.xlu1 %950 }
  0xf6   : > { %v958_v47 = vsel %vm956_vm7, %v5882_v15, %v953_v12  ;;  %v5898_v0 = vpop.permute.xlu0 %954 }
  0xf7   : > { %v957_v5 = vsel %vm956_vm7, %v953_v12, %v5898_v0  ;;  %v973_v22 = vmul.f32 %v5866_v34, %v958_v47  ;;  %v848_v12 = vmul.f32 %v844_v14, %v5772_v28  ;;  %v912_v47 = vsel %vm909_vm6, %v902_v60, %v5693_v57 }
  0xf8   : > { %v974_v24 = vmul.f32 %v5885_v3, %v957_v5  ;;  %v937_v5 = vperm.slane %v926_v6, 0  ;;  %v5937_v28 = vperm.slane %v5847_v62, 3 }
  0xf9   : > { %v852_v49 = vadd.f32 %v848_v12, %v805_v25  ;;  %v984_v14 = vperm.slane %v973_v22, 0  ;;  %v925_v22 = vmul.f32 %v5823_v35, %v912_v47 }
  0xfa   : > { %v985_v36 = vperm.slane %v974_v24, 0  ;;  %v928_v24 = vmul.f32 %v5850_v32, %v913_v50  ;;  %7551 = vst [vmem:[#allocation26_spill] sm:$0xff] %v5937_v28 }
  0xfb   : > { %v988_v20 = vmul.f32 %v984_v14, %v981_v19 }
  0xfc   : > { %v989_v60 = vmul.f32 %v985_v36, %v981_v19  ;;  %v939_v47 = vperm.slane %v928_v24, 0 }
  0xfd   : > { %v887_v29 = vpop.permute.xlu1 %886 }
  0xfe   : > { %v894_v4 = vmul.f32 %v890_v38, %v887_v29  ;;  %v895_v61 = vmul.f32 %v891_v1, %v887_v29  ;;  %v934_v40 = vpop.permute.xlu0 %933  ;;  %v893_v12 = vmul.f32 %v889_v2, %v887_v29  ;;  %v896_v38 = vmul.f32 %v892_v30, %v887_v29 }
  0xff   : > { %v941_v23 = vmul.f32 %v937_v5, %v934_v40  ;;  %v942_v6 = vmul.f32 %v938_v16, %v934_v40 }
 0x100   : > { %v898_v57 = vadd.f32 %v894_v4, %v851_v13  ;;  %v899_v25 = vadd.f32 %v895_v61, %v852_v49  ;;  %v850_v13 = vadd.f32 %v846_v48, %v803_v27  ;;  %v936_v49 = vperm.slane %v925_v22, 0 }
 0x101   : > { %v900_v14 = vadd.f32 %v896_v38, %v853_v53  ;;  %v943_v48 = vmul.f32 %v939_v47, %v934_v40 }
 0x102   : > { %v945_v1 = vadd.f32 %v941_v23, %v898_v57  ;;  %v946_v54 = vadd.f32 %v942_v6, %v899_v25  ;;  %v897_v50 = vadd.f32 %v893_v12, %v850_v13  ;;  %v940_v61 = vmul.f32 %v936_v49, %v934_v40 }
 0x103   : > { %v947_v25 = vadd.f32 %v943_v48, %v900_v14 }
 0x104   : > { %v992_v26 = vadd.f32 %v988_v20, %v945_v1  ;;  %v993_v39 = vadd.f32 %v989_v60, %v946_v54 }
 0x105   : > { %v949_v5 = vpop.permute.xlu1 %948 }
 0x106   : > { %v959_v36 = vsel %vm956_vm7, %v949_v5, %v5882_v15  ;;  %v960_v29 = vsel %vm956_vm7, %v5898_v0, %v949_v5  ;;  %v999_v16 = vpop.permute.xlu0 %998  ;;  %v944_v15 = vadd.f32 %v940_v61, %v897_v50 }
 0x107   : > { %v972_v62 = vmul.f32 %v5934_v10, %v959_v36  ;;  %v975_v27 = vmul.f32 %v5937_v28, %v960_v29  ;;  %v1002_v18 = vadd.f32 %v999_v16, %v992_v26  ;;  %v1003_v4 = vadd.f32 %v999_v16, %v993_v39  ;;  %v4824_v39 = vld [vmem:[%s7562_s7 + $0x8] sm:$0xff] }
 0x109   : > { %v983_v7 = vperm.slane %v972_v62, 0  ;;  %v986_v2 = vperm.slane %v975_v27, 0  ;;  %v5947_v30 = vmax.f32 %v1002_v18, 0.0  ;;  %v5949_v57 = vmax.f32 %v1003_v4, 0.0 }
 0x10b   : > { %7552 = vst [vmem:[#allocation27_spill] sm:$0xff] %v5947_v30  ;;  %v987_v23 = vmul.f32 %v983_v7, %v981_v19  ;;  %v990_v6 = vmul.f32 %v986_v2, %v981_v19  ;;  %1030 = vrot.lane.b32.xlu2 %v5949_v57, %s7554_s24  ;;  %1028 = vrot.lane.b32.xlu1 %v5947_v30, %s7554_s24  ;;  %v1930_v19 = vld [vmem:[%s7561_s8] sm:$0xff]  ;;  %s7499_s8 = smov 120  }
 0x10c   : > { %7553 = vst [vmem:[#allocation28_spill] sm:$0xff] %v5949_v57 }
 0x10d   : > { %v991_v0 = vadd.f32 %v987_v23, %v944_v15  ;;  %v994_v22 = vadd.f32 %v990_v6, %v947_v25  ;;  %v1025_v6 = vld [vmem:[%s7562_s7] sm:$0xff] }
 0x10f   : > { %v1001_v24 = vadd.f32 %v999_v16, %v991_v0  ;;  %v1004_v40 = vadd.f32 %v999_v16, %v994_v22 }
 0x111   : > { %v5955_v20 = vmax.f32 %v1001_v24, 0.0  ;;  %v5957_v60 = vmax.f32 %v1004_v40, 0.0 }
 0x113   : > { %7555 = vst [vmem:[#allocation29_spill] sm:$0xff] %v5955_v20  ;;  %1011 = vrot.lane.b32.xlu2 %v5947_v30, %s7557_s27  ;;  %1032 = vrot.lane.b32.xlu1 %v5957_v60, %s7554_s24 }
 0x114   : > { %7556 = vst [vmem:[#allocation30_spill] sm:$0xff] %v5957_v60  ;;  %1026 = vrot.lane.b32.xlu0 %v5955_v20, %s7554_s24 }
 0x11b   : > { %1009 = vrot.lane.b32.xlu2 %v5955_v20, %s7557_s27  ;;  %1015 = vrot.lane.b32.xlu1 %v5957_v60, %s7557_s27 }
 0x11c   : > { %1013 = vrot.lane.b32.xlu0 %v5949_v57, %s7557_s27 }
 0x123   : > { %1217 = vrot.lane.b32.xlu2 %v5957_v60, %s7530_s25  ;;  %1215 = vrot.lane.b32.xlu1 %v5949_v57, %s7530_s25 }
 0x124   : > { %1213 = vrot.lane.b32.xlu0 %v5947_v30, %s7530_s25 }
 0x12b   : > { %1320 = vrot.lane.b32.xlu2 %v5949_v57, %s7558_s2  ;;  %1318 = vrot.lane.b32.xlu1 %v5947_v30, %s7558_s2 }
 0x12c   : > { %1211 = vrot.lane.b32.xlu0 %v5955_v20, %s7530_s25 }
 0x133   : > { %1510 = vrot.lane.b32.xlu2 %v5955_v20, %s7559_s26  ;;  %1316 = vrot.lane.b32.xlu1 %v5955_v20, %s7558_s2 }
 0x134   : > { %1322 = vrot.lane.b32.xlu0 %v5957_v60, %s7558_s2 }
 0x13b   : > { %1512 = vrot.lane.b32.xlu2 %v5947_v30, %s7559_s26  ;;  %1516 = vrot.lane.b32.xlu1 %v5957_v60, %s7559_s26 }
 0x13c   : > { %1514 = vrot.lane.b32.xlu0 %v5949_v57, %s7559_s26 }
 0x143   : > { %1621 = vrot.lane.b32.xlu2 %v5957_v60, %s7560_s29  ;;  %1619 = vrot.lane.b32.xlu1 %v5949_v57, %s7560_s29 }
 0x144   : > { %1615 = vrot.lane.b32.xlu0 %v5955_v20, %s7560_s29 }
 0x14b   : > { %1724 = vrot.lane.b32.xlu2 %v5949_v57, %s7481_s22  ;;  %1720 = vrot.lane.b32.xlu1 %v5955_v20, %s7481_s22 }
 0x14c   : > { %1617 = vrot.lane.b32.xlu0 %v5947_v30, %s7560_s29 }
 0x153   : > { %1825 = vrot.lane.b32.xlu2 %v5955_v20, %s7532_s23  ;;  %1722 = vrot.lane.b32.xlu1 %v5947_v30, %s7481_s22 }
 0x154   : > { %1726 = vrot.lane.b32.xlu0 %v5957_v60, %s7481_s22  ;;  %s7589_s22 = sld [smem:[#allocation34_spill]] }
 0x15b   : > { %1827 = vrot.lane.b32.xlu2 %v5947_v30, %s7532_s23  ;;  %1831 = vrot.lane.b32.xlu1 %v5957_v60, %s7532_s23 }
 0x15c   : > { %1829 = vrot.lane.b32.xlu0 %v5949_v57, %s7532_s23 }
 0x164   : > { %1933 = vperm.xlu0 %5141, %v1930_v19  }
 0x165   : > { %v1031_v12 = vpop.permute.xlu2 %1030 }
 0x16d   : > { %v1012_v38 = vpop.permute.xlu2 %1011 }
 0x175   : > { %v1010_v1 = vpop.permute.xlu2 %1009 }
 0x176   : > { %v1019_v50 = vsel %vm618_vm1, %v1010_v1, %v1012_v38 }
 0x177   : > { %v1022_v18 = vmul.f32 %v1019_v50, %v5667_v45  ;;  %v7563_v50 = vld [vmem:[#allocation11_spill] sm:$0xff] }
 0x17d   : > { %v1029_v54 = vpop.permute.xlu1 %1028  ;;  %v1218_v53 = vpop.permute.xlu2 %1217 }
 0x17e   : > { %v1035_v13 = vsel %vm659_vm0, %v1029_v54, %v1031_v12 }
 0x17f   : > { %v1040_v26 = vmul.f32 %v1035_v13, %v5662_v43 }
 0x181   : > { %1103 = vmatpush.msra.mxu2 %v1040_v26 }
 0x182   : > { %4827 = vmatmul.msk.f32.vlgmr.msra.gmra.mxu2 %vm1044_vm8, %v4824_v39 }
 0x185   : > { %v1033_v49 = vpop.permute.xlu1 %1032  ;;  %v1321_v27 = vpop.permute.xlu2 %1320 }
 0x186   : > { %v1027_v47 = vpop.permute.xlu0 %1026  ;;  %v1034_v5 = vsel %vm659_vm0, %v1031_v12, %v1033_v49 }
 0x187   : > { %v1037_v14 = vsel %vm659_vm0, %v1033_v49, %v1027_v47  ;;  %v1036_v36 = vsel %vm659_vm0, %v1027_v47, %v1029_v54  ;;  %v1041_v62 = vmul.f32 %v1034_v5, %v5716_v11 }
 0x188   : > { %v1038_v29 = vmul.f32 %v1037_v14, %v5704_v63  ;;  %v1039_v16 = vmul.f32 %v1036_v36, %v5680_v51  ;;  %v7564_v36 = vld [vmem:[#allocation9_spill] sm:$0xff] }
 0x18a   : > { %1063 = vmatpush.msra.mxu0 %v1038_v29  ;;  %1083 = vmatpush.msra.mxu1 %v1039_v16  ;;  %v4838_v16 = vld [vmem:[%s7562_s7 + $0x18] sm:$0xff] }
 0x18b   : > { %4825 = vmatmul.msk.f32.vlgmr.msra.gmra.mxu0 %vm1044_vm8, %v4824_v39  ;;  %4826 = vmatmul.msk.f32.vlgmr.msra.gmra.mxu1 %vm1044_vm8, %v4824_v39 }
 0x18c   : > { %1166 = vmatpush.msrb.mxu1 %v1022_v18  ;;  %1123 = vmatpush.msrb.mxu0 %v1041_v62 }
 0x18d   : > { %v1016_v4 = vpop.permute.xlu1 %1015  ;;  %v1511_v0 = vpop.permute.xlu2 %1510 }
 0x18e   : > { %v1020_v61 = vsel %vm618_vm1, %v1016_v4, %v1010_v1  ;;  %v1014_v48 = vpop.permute.xlu0 %1013  ;;  %v4833_v1 = vld [vmem:[%s7562_s7 + $0x10] sm:$0xff] }
 0x18f   : > { %v1021_v7 = vmul.f32 %v1020_v61, %v5712_v8  ;;  %v1018_v2 = vsel %vm618_vm1, %v1012_v38, %v1014_v48  ;;  %v1017_v15 = vsel %vm618_vm1, %v1014_v48, %v1016_v4  ;;  %v7565_v61 = vld [vmem:[#allocation10_spill] sm:$0xff] }
 0x190   : > { %v1023_v25 = vmul.f32 %v1018_v2, %v5669_v46  ;;  %v1024_v23 = vmul.f32 %v1017_v15, %v5714_v9  ;;  %v7566_v15 = vld [vmem:[#allocation12_spill] sm:$0xff] }
 0x191   : > { %1146 = vmatpush.msra.mxu0 %v1021_v7 }
 0x192   : > { %1186 = vmatpush.msrb.mxu2 %v1023_v25  ;;  %1206 = vmatpush.msra.mxu3 %v1024_v23  ;;  %v7567_v23 = vld [vmem:[#allocation13_spill] sm:$0xff] }
 0x193   : > { %4828 = vmatmul.msk.f32.vlgmr.msrb.gmra.mxu0 %vm1044_vm8, %v4824_v39  ;;  %4831 = vmatmul.msk.f32.vlgmr.msrb.gmra.mxu2 %vm1044_vm8, %v1025_v6 }
 0x194   : > { %4832 = vmatmul.msk.f32.vlgmr.msra.gmra.mxu3 %vm1044_vm8, %v1025_v6  ;;  %4830 = vmatmul.msk.f32.vlgmr.msrb.gmra.mxu1 %vm1044_vm8, %v1025_v6 }
 0x195   : > { %v1216_v22 = vpop.permute.xlu1 %1215  ;;  %v1513_v54 = vpop.permute.xlu2 %1512 }
 0x196   : > { %v1214_v24 = vpop.permute.xlu0 %1213  ;;  %v1219_v40 = vsel %vm706_vm2, %v1216_v22, %v1218_v53 }
 0x197   : > { %v1220_v19 = vsel %vm706_vm2, %v1214_v24, %v1216_v22  ;;  %v1226_v12 = vmul.f32 %v1219_v40, %v5733_v42  ;;  %v1520_v22 = vsel %vm815_vm4, %v1511_v0, %v1513_v54 }
 0x198   : > { %v1225_v38 = vmul.f32 %v1220_v19, %v5695_v58 }
 0x199   : > { %1307 = vmatpush.msrb.mxu3 %v1226_v12 }
 0x19a   : > { %1287 = vmatpush.msra.mxu2 %v1225_v38 }
 0x19b   : > { %4829 = vmatmul.msk.f32.vlgmr.msra.gmra.mxu0 %vm1044_vm8, %v1025_v6  ;;  %4836 = vmatmul.msk.f32.vlgmr.msra.gmra.mxu2 %vm1044_vm8, %v4833_v1 }
 0x19c   : > { %4837 = vmatmul.msk.f32.vlgmr.msrb.gmra.mxu3 %vm1044_vm8, %v4833_v1 }
 0x19d   : > { %v1319_v13 = vpop.permute.xlu1 %1318  ;;  %v1622_v4 = vpop.permute.xlu2 %1621 }
 0x19e   : > { %v1325_v26 = vsel %vm753_vm3, %v1319_v13, %v1321_v27  ;;  %v1212_v39 = vpop.permute.xlu0 %1211 }
 0x19f   : > { %v1330_v49 = vmul.f32 %v1325_v26, %v5726_v17  ;;  %v1221_v47 = vsel %vm706_vm2, %v1212_v39, %v1214_v24  ;;  %v1222_v5 = vsel %vm706_vm2, %v1218_v53, %v1212_v39  ;;  %v4843_v24 = vld [vmem:[%s7562_s7 + $0x20] sm:$0xff] }
 0x1a0   : > { %v1223_v14 = vmul.f32 %v1222_v5, %v7563_v50  ;;  %v1224_v29 = vmul.f32 %v1221_v47, %v7564_v36 }
 0x1a1   : > { %1392 = vmatpush.msrb.mxu2 %v1330_v49 }
 0x1a2   : > { %1247 = vmatpush.msrb.mxu0 %v1223_v14  ;;  %1267 = vmatpush.msra.mxu1 %v1224_v29 }
 0x1a3   : > { %4834 = vmatmul.msk.f32.vlgmr.msrb.gmra.mxu0 %vm1044_vm8, %v4833_v1  ;;  %4835 = vmatmul.msk.f32.vlgmr.msra.gmra.mxu1 %vm1044_vm8, %v4833_v1 }
 0x1a4   : > { %4841 = vmatmul.msk.f32.vlgmr.msrb.gmra.mxu2 %vm1044_vm8, %v4838_v16 }
 0x1a5   : > { %1481 = vmatpush.msra.mxu2 %v5949_v57  ;;  %v1317_v53 = vpop.permute.xlu1 %1316  ;;  %v1725_v49 = vpop.permute.xlu2 %1724 }
 0x1a6   : > { %v1326_v62 = vsel %vm753_vm3, %v1317_v53, %v1319_v13  ;;  %v1323_v18 = vpop.permute.xlu0 %1322 }
 0x1a7   : > { %v1329_v48 = vmul.f32 %v1326_v62, %v7565_v61  ;;  %v1324_v7 = vsel %vm753_vm3, %v1321_v27, %v1323_v18  ;;  %v1327_v2 = vsel %vm753_vm3, %v1323_v18, %v1317_v53  ;;  %v1522_v27 = vmul.f32 %v1520_v22, %v5827_v31  ;;  %v4853_v53 = vld [vmem:[%s7562_s7 + $0x30] sm:$0xff] }
 0x1a8   : > { %v1328_v25 = vmul.f32 %v1327_v2, %v7566_v15  ;;  %v1331_v6 = vmul.f32 %v1324_v7, %v7567_v23 }
 0x1a9   : > { %1372 = vmatpush.msrb.mxu1 %v1329_v48 }
 0x1aa   : > { %1352 = vmatpush.msra.mxu0 %v1328_v25  ;;  %1412 = vmatpush.msra.mxu3 %v1331_v6  ;;  %v7568_v25 = vld [vmem:[#allocation14_spill] sm:$0xff] }
 0x1ab   : > { %4839 = vmatmul.msk.f32.vlgmr.msra.gmra.mxu0 %vm1044_vm8, %v4838_v16  ;;  %4840 = vmatmul.msk.f32.vlgmr.msrb.gmra.mxu1 %vm1044_vm8, %v4838_v16 }
 0x1ac   : > { %4842 = vmatmul.msk.f32.vlgmr.msra.gmra.mxu3 %vm1044_vm8, %v4838_v16  ;;  %1441 = vmatpush.msrb.mxu0 %v5955_v20 }
 0x1ad   : > { %1461 = vmatpush.msra.mxu1 %v5947_v30  ;;  %4846 = vmatmul.msk.f32.vlgmr.msra.gmra.mxu2 %vm1044_vm8, %v4843_v24  ;;  %v1517_v40 = vpop.permute.xlu1 %1516  ;;  %v1826_v62 = vpop.permute.xlu2 %1825 }
 0x1ae   : > { %1501 = vmatpush.msrb.mxu3 %v5957_v60  ;;  %1546 = vmatpush.msra.mxu0 %v1522_v27  ;;  %v1521_v19 = vsel %vm815_vm4, %v1517_v40, %v1511_v0  ;;  %v1515_v12 = vpop.permute.xlu0 %1514  ;;  %v4848_v0 = vld [vmem:[%s7562_s7 + $0x28] sm:$0xff] }
 0x1af   : > { %v1525_v38 = vmul.f32 %v1521_v19, %v5838_v59  ;;  %v1518_v1 = vsel %vm815_vm4, %v1515_v12, %v1517_v40  ;;  %v1519_v13 = vsel %vm815_vm4, %v1513_v54, %v1515_v12 }
 0x1b0   : > { %v1523_v26 = vmul.f32 %v1519_v13, %v5789_v44  ;;  %v1524_v39 = vmul.f32 %v1518_v1, %v5795_v52 }
 0x1b1   : > { %1606 = vmatpush.msra.mxu3 %v1525_v38 }
 0x1b2   : > { %1566 = vmatpush.msrb.mxu1 %v1523_v26  ;;  %1586 = vmatpush.msrb.mxu2 %v1524_v39 }
 0x1b3   : > { %4844 = vmatmul.msk.f32.vlgmr.msrb.gmra.mxu0 %vm1044_vm8, %v4843_v24  ;;  %4845 = vmatmul.msk.f32.vlgmr.msra.gmra.mxu1 %vm1044_vm8, %v4843_v24 }
 0x1b4   : > { %4847 = vmatmul.msk.f32.vlgmr.msrb.gmra.mxu3 %vm1044_vm8, %v4843_v24 }
 0x1b5   : > { %4851 = vmatmul.msk.f32.vlgmr.msrb.gmra.mxu2 %vm1044_vm8, %v4848_v0  ;;  %v1620_v54 = vpop.permute.xlu1 %1619  ;;  %v1828_v22 = vpop.permute.xlu2 %1827 }
 0x1b6   : > { %v1623_v47 = vsel %vm862_vm5, %v1620_v54, %v1622_v4  ;;  %v1616_v5 = vpop.permute.xlu0 %1615  ;;  %v1835_v26 = vsel %vm956_vm7, %v1826_v62, %v1828_v22 }
 0x1b7   : > { %v1629_v14 = vmul.f32 %v1623_v47, %v5814_v56  ;;  %v1626_v29 = vsel %vm862_vm5, %v1622_v4, %v1616_v5 }
 0x1b8   : > { %v1630_v16 = vmul.f32 %v1626_v29, %v5862_v21 }
 0x1b9   : > { %1691 = vmatpush.msra.mxu2 %v1629_v14 }
 0x1ba   : > { %1711 = vmatpush.msrb.mxu3 %v1630_v16 }
 0x1bb   : > { %4849 = vmatmul.msk.f32.vlgmr.msra.gmra.mxu0 %vm1044_vm8, %v4848_v0  ;;  %4850 = vmatmul.msk.f32.vlgmr.msrb.gmra.mxu1 %vm1044_vm8, %v4848_v0 }
 0x1bc   : > { %4852 = vmatmul.msk.f32.vlgmr.msra.gmra.mxu3 %vm1044_vm8, %v4848_v0 }
 0x1bd   : > { %4856 = vmatmul.msk.f32.vlgmr.msra.gmra.mxu2 %vm1044_vm8, %v4853_v53  ;;  %v1721_v18 = vpop.permute.xlu1 %1720 }
 0x1be   : > { %v1618_v48 = vpop.permute.xlu0 %1617 }
 0x1bf   : > { %v1624_v4 = vsel %vm862_vm5, %v1618_v48, %v1620_v54  ;;  %v1625_v7 = vsel %vm862_vm5, %v1616_v5, %v1618_v48  ;;  %v4858_v54 = vld [vmem:[%s7562_s7 + $0x38] sm:$0xff] }
 0x1c0   : > { %v1627_v2 = vmul.f32 %v1625_v7, %v5852_v33  ;;  %v1628_v6 = vmul.f32 %v1624_v4, %v7568_v25  ;;  %v4863_v4 = vld [vmem:[%s7562_s7 + $0x40] sm:$0xff]  ;;  %s7505_s7 = smov 7  }
 0x1c2   : > { %1651 = vmatpush.msrb.mxu0 %v1627_v2  ;;  %1671 = vmatpush.msra.mxu1 %v1628_v6 }
 0x1c3   : > { %4854 = vmatmul.msk.f32.vlgmr.msrb.gmra.mxu0 %vm1044_vm8, %v4853_v53  ;;  %4855 = vmatmul.msk.f32.vlgmr.msra.gmra.mxu1 %vm1044_vm8, %v4853_v53 }
 0x1c4   : > { %4857 = vmatmul.msk.f32.vlgmr.msrb.gmra.mxu3 %vm1044_vm8, %v4853_v53 }
 0x1c5   : > { %v1723_v24 = vpop.permute.xlu1 %1722 }
 0x1c6   : > { %v1729_v27 = vsel %vm909_vm6, %v1723_v24, %v1725_v49  ;;  %v1730_v40 = vsel %vm909_vm6, %v1721_v18, %v1723_v24  ;;  %v1727_v19 = vpop.permute.xlu0 %1726 }
 0x1c7   : > { %v1732_v12 = vmul.f32 %v1730_v40, %v5823_v35  ;;  %v1733_v38 = vmul.f32 %v1729_v27, %v5840_v41  ;;  %v1728_v1 = vsel %vm909_vm6, %v1725_v49, %v1727_v19  ;;  %v1731_v13 = vsel %vm909_vm6, %v1727_v19, %v1721_v18 }
 0x1c8   : > { %v1734_v39 = vmul.f32 %v1728_v1, %v5842_v55  ;;  %v1735_v0 = vmul.f32 %v1731_v13, %v5850_v32  ;;  %v1837_v49 = vmul.f32 %v1835_v26, %v5934_v10 }
 0x1c9   : > { %1756 = vmatpush.msra.mxu0 %v1732_v12  ;;  %1776 = vmatpush.msrb.mxu1 %v1733_v38 }
 0x1ca   : > { %1796 = vmatpush.msrb.mxu2 %v1734_v39  ;;  %1816 = vmatpush.msra.mxu3 %v1735_v0 }
 0x1cb   : > { %4859 = vmatmul.msk.f32.vlgmr.msra.gmra.mxu0 %vm1044_vm8, %v4858_v54  ;;  %4860 = vmatmul.msk.f32.vlgmr.msrb.gmra.mxu1 %vm1044_vm8, %v4858_v54 }
 0x1cc   : > { %4861 = vmatmul.msk.f32.vlgmr.msrb.gmra.mxu2 %vm1044_vm8, %v4858_v54  ;;  %4862 = vmatmul.msk.f32.vlgmr.msra.gmra.mxu3 %vm1044_vm8, %v4858_v54 }
 0x1cd   : > { %1861 = vmatpush.msrb.mxu0 %v1837_v49  ;;  %v1832_v47 = vpop.permute.xlu1 %1831 }
 0x1ce   : > { %v1836_v5 = vsel %vm956_vm7, %v1832_v47, %v1826_v62  ;;  %v1830_v14 = vpop.permute.xlu0 %1829 }
 0x1cf   : > { %v1840_v29 = vmul.f32 %v1836_v5, %v5937_v28  ;;  %v1833_v16 = vsel %vm956_vm7, %v1830_v14, %v1832_v47  ;;  %v1834_v53 = vsel %vm956_vm7, %v1828_v22, %v1830_v14 }
 0x1d0   : > { %v1838_v18 = vmul.f32 %v1834_v53, %v5866_v34  ;;  %v1839_v48 = vmul.f32 %v1833_v16, %v5885_v3 }
 0x1d1   : > { %1921 = vmatpush.msrb.mxu3 %v1840_v29 }
 0x1d2   : > { %1881 = vmatpush.msra.mxu1 %v1838_v18  ;;  %1901 = vmatpush.msra.mxu2 %v1839_v48 }
 0x1d3   : > { %4864 = vmatmul.msk.f32.vlgmr.msrb.gmra.mxu0 %vm1044_vm8, %v4863_v4  ;;  %4865 = vmatmul.msk.f32.vlgmr.msra.gmra.mxu1 %vm1044_vm8, %v4863_v4 }
 0x1d4   : > { %4866 = vmatmul.msk.f32.vlgmr.msra.gmra.mxu2 %vm1044_vm8, %v4863_v4  ;;  %4867 = vmatmul.msk.f32.vlgmr.msrb.gmra.mxu3 %vm1044_vm8, %v4863_v4 }
 0x205   : > { %v1105_v7 = vpop.f32.mrf.mxu2 }
 0x208   : > { %v1065_v62 = vpop.f32.mrf.mxu0  ;;  %v1085_v2 = vpop.f32.mrf.mxu1 }
 0x210   : > { %v1125_v6 = vpop.f32.mrf.mxu0 }
 0x211   : > { %v1168_v24 = vpop.f32.mrf.mxu1 }
 0x212   : > { %v1169_v48 = vadd.f32 %v1168_v24, %v1085_v2 }
 0x216   : > { %v1188_v22 = vpop.f32.mrf.mxu2 }
 0x217   : > { %v1208_v40 = vpop.f32.mrf.mxu3  ;;  %v1189_v18 = vadd.f32 %v1188_v22, %v1105_v7 }
 0x218   : > { %v1148_v27 = vpop.f32.mrf.mxu0  ;;  %v1209_v28 = vadd.f32 %v1208_v40, %v1125_v6 }
 0x219   : > { %v1149_v6 = vadd.f32 %v1148_v27, %v1065_v62 }
 0x21e   : > { %v1289_v19 = vpop.f32.mrf.mxu2 }
 0x21f   : > { %v1309_v1 = vpop.f32.mrf.mxu3  ;;  %v1314_v60 = vadd.f32 %v1289_v19, %v1189_v18  ;;  %v1934_v18 = vpop.permute.xlu0 %1933 }
 0x220   : > { %v1269_v12 = vpop.f32.mrf.mxu1  ;;  %v1249_v38 = vpop.f32.mrf.mxu0  ;;  %v1315_v34 = vadd.f32 %v1309_v1, %v1209_v28 }
 0x221   : > { %v1313_v57 = vadd.f32 %v1269_v12, %v1169_v48  ;;  %v4868_v48 = vld [vmem:[%s7571_s9 + $0x8] sm:$0xff] }
 0x227   : > { %v1394_v26 = vpop.f32.mrf.mxu2 }
 0x228   : > { %v1374_v13 = vpop.f32.mrf.mxu1  ;;  %v1354_v39 = vpop.f32.mrf.mxu0  ;;  %v1419_v32 = vadd.f32 %v1394_v26, %v1314_v60 }
 0x229   : > { %v1418_v3 = vadd.f32 %v1374_v13, %v1313_v57 }
 0x22f   : > { %v1414_v0 = vpop.f32.mrf.mxu3 }
 0x230   : > { %v1463_v54 = vpop.f32.mrf.mxu1  ;;  %v1483_v49 = vpop.f32.mrf.mxu2  ;;  %v1420_v56 = vadd.f32 %v1414_v0, %v1315_v34  ;;  %v1312_v34 = vadd.f32 %v1249_v38, %v1149_v6 }
 0x231   : > { %v1443_v5 = vpop.f32.mrf.mxu0  ;;  %v1507_v35 = vadd.f32 %v1463_v54, %v1418_v3  ;;  %v1508_v25 = vadd.f32 %v1483_v49, %v1419_v32 }
 0x237   : > { %v1503_v47 = vpop.f32.mrf.mxu3 }
 0x238   : > { %v1568_v14 = vpop.f32.mrf.mxu1  ;;  %v1588_v29 = vpop.f32.mrf.mxu2  ;;  %v1509_v7 = vadd.f32 %v1503_v47, %v1420_v56 }
 0x239   : > { %v1548_v4 = vpop.f32.mrf.mxu0  ;;  %v1612_v41 = vadd.f32 %v1568_v14, %v1507_v35  ;;  %v1613_v24 = vadd.f32 %v1588_v29, %v1508_v25 }
 0x23f   : > { %v1608_v16 = vpop.f32.mrf.mxu3 }
 0x240   : > { %v1673_v53 = vpop.f32.mrf.mxu1  ;;  %v1693_v30 = vpop.f32.mrf.mxu2  ;;  %v1614_v19 = vadd.f32 %v1608_v16, %v1509_v7 }
 0x241   : > { %v1653_v55 = vpop.f32.mrf.mxu0  ;;  %v1717_v21 = vadd.f32 %v1673_v53, %v1612_v41  ;;  %v1718_v57 = vadd.f32 %v1693_v30, %v1613_v24 }
 0x247   : > { %v1713_v20 = vpop.f32.mrf.mxu3 }
 0x248   : > { %v1778_v10 = vpop.f32.mrf.mxu1  ;;  %v1719_v40 = vadd.f32 %v1713_v20, %v1614_v19 }
 0x249   : > { %v1822_v2 = vadd.f32 %v1778_v10, %v1717_v21  ;;  %v1758_v3 = vpop.f32.mrf.mxu0  ;;  %v1417_v21 = vadd.f32 %v1354_v39, %v1312_v34 }
 0x24b   : > { %v1506_v62 = vadd.f32 %v1443_v5, %v1417_v21 }
 0x24d   : > { %v1611_v20 = vadd.f32 %v1548_v4, %v1506_v62  ;;  %v4877_v62 = vld [vmem:[%s7571_s9 + $0x10] sm:$0xff] }
 0x24f   : > { %v1798_v33 = vpop.f32.mrf.mxu2  ;;  %v1818_v59 = vpop.f32.mrf.mxu3 }
 0x250   : > { %v1883_v22 = vpop.f32.mrf.mxu1  ;;  %v1823_v28 = vadd.f32 %v1798_v33, %v1718_v57  ;;  %v1824_v35 = vadd.f32 %v1818_v59, %v1719_v40  ;;  %v1716_v59 = vadd.f32 %v1653_v55, %v1611_v20  ;;  %v2864_v55 = vld [vmem:[%s7570_s10] sm:$0xff]  ;;  %s7596_s10 = smov 9  }
 0x251   : > { %v1927_v12 = vadd.f32 %v1883_v22, %v1822_v2  ;;  %v1863_v33 = vpop.f32.mrf.mxu0 }
 0x252   : > { %v1821_v38 = vadd.f32 %v1758_v3, %v1716_v59 }
 0x253   : > { %v1937_v60 = vadd.f32 %v1934_v18, %v1927_v12 }
 0x254   : > { %v1926_v26 = vadd.f32 %v1863_v33, %v1821_v38  ;;  %v4882_v38 = vld [vmem:[%s7571_s9 + $0x18] sm:$0xff] }
 0x255   : > { %v6185_v1 = vmax.f32 %v1937_v60, 0.0 }
 0x256   : > { %v1936_v39 = vadd.f32 %v1934_v18, %v1926_v26 }
 0x257   : > { %v1903_v32 = vpop.f32.mrf.mxu2  ;;  %v1923_v41 = vpop.f32.mrf.mxu3  ;;  %1946 = vrot.lane.b32.xlu2 %v6185_v1, %s7557_s27 }
 0x258   : > { %v1928_v13 = vadd.f32 %v1903_v32, %v1823_v28  ;;  %v1929_v56 = vadd.f32 %v1923_v41, %v1824_v35  ;;  %v6205_v0 = vmax.f32 %v1936_v39, 0.0 }
 0x25a   : > { %v1938_v10 = vadd.f32 %v1934_v18, %v1928_v13  ;;  %v1939_v25 = vadd.f32 %v1934_v18, %v1929_v56  ;;  %v1960_v13 = vld [vmem:[%s7571_s9] sm:$0xff] }
 0x25c   : > { %v6189_v30 = vmax.f32 %v1939_v25, 0.0  ;;  %v6191_v27 = vmax.f32 %v1938_v10, 0.0 }
 0x25e   : > { %1950 = vrot.lane.b32.xlu1 %v6189_v30, %s7557_s27  ;;  %1967 = vrot.lane.b32.xlu0 %v6189_v30, %s7554_s24 }
 0x25f   : > { %1965 = vrot.lane.b32.xlu2 %v6191_v27, %s7554_s24 }
 0x266   : > { %2147 = vrot.lane.b32.xlu0 %v6185_v1, %s7530_s25  ;;  %1963 = vrot.lane.b32.xlu1 %v6185_v1, %s7554_s24 }
 0x267   : > { %2151 = vrot.lane.b32.xlu2 %v6189_v30, %s7530_s25 }
 0x26e   : > { %1948 = vrot.lane.b32.xlu0 %v6191_v27, %s7557_s27  ;;  %1961 = vrot.lane.b32.xlu1 %v6205_v0, %s7554_s24 }
 0x26f   : > { %1944 = vrot.lane.b32.xlu2 %v6205_v0, %s7557_s27 }
 0x276   : > { %2145 = vrot.lane.b32.xlu0 %v6205_v0, %s7530_s25  ;;  %2149 = vrot.lane.b32.xlu1 %v6191_v27, %s7530_s25  ;;  %s7569_s25 = smov 112  }
 0x277   : > { %2254 = vrot.lane.b32.xlu2 %v6191_v27, %s7558_s2 }
 0x27e   : > { %2256 = vrot.lane.b32.xlu0 %v6189_v30, %s7558_s2  ;;  %2252 = vrot.lane.b32.xlu1 %v6185_v1, %s7558_s2 }
 0x27f   : > { %2446 = vrot.lane.b32.xlu2 %v6185_v1, %s7559_s26 }
 0x286   : > { %2448 = vrot.lane.b32.xlu0 %v6191_v27, %s7559_s26  ;;  %2250 = vrot.lane.b32.xlu1 %v6205_v0, %s7558_s2 }
 0x287   : > { %2444 = vrot.lane.b32.xlu2 %v6205_v0, %s7559_s26 }
 0x28e   : > { %2551 = vrot.lane.b32.xlu0 %v6185_v1, %s7560_s29  ;;  %2450 = vrot.lane.b32.xlu1 %v6189_v30, %s7559_s26 }
 0x28f   : > { %2555 = vrot.lane.b32.xlu2 %v6189_v30, %s7560_s29 }
 0x296   : > { %2549 = vrot.lane.b32.xlu0 %v6205_v0, %s7560_s29  ;;  %2553 = vrot.lane.b32.xlu1 %v6191_v27, %s7560_s29  ;;  %s7594_s29 = smov 119  }
 0x297   : > { %2658 = vrot.lane.b32.xlu2 %v6191_v27, %s7569_s25 }
 0x29e   : > { %2660 = vrot.lane.b32.xlu0 %v6189_v30, %s7569_s25  ;;  %2656 = vrot.lane.b32.xlu1 %v6185_v1, %s7569_s25 }
 0x29f   : > { %2759 = vrot.lane.b32.xlu2 %v6205_v0, %s7532_s23 }
 0x2a6   : > { %2763 = vrot.lane.b32.xlu0 %v6191_v27, %s7532_s23  ;;  %2654 = vrot.lane.b32.xlu1 %v6205_v0, %s7569_s25 }
 0x2a7   : > { %2761 = vrot.lane.b32.xlu2 %v6185_v1, %s7532_s23 }
 0x2ae   : > { %2867 = vperm.xlu0 %5141, %v2864_v55   ;;  %2765 = vrot.lane.b32.xlu1 %v6189_v30, %s7532_s23  ;;  %s7507_s23 = smov 9  }
 0x2b1   : > { %v1947_v54 = vpop.permute.xlu2 %1946 }
 0x2b9   : > { %v1966_v49 = vpop.permute.xlu2 %1965 }
 0x2c1   : > { %v2152_v47 = vpop.permute.xlu2 %2151 }
 0x2c9   : > { %v1945_v29 = vpop.permute.xlu2 %1944 }
 0x2d0   : > { %v1951_v5 = vpop.permute.xlu1 %1950  ;;  %v1968_v14 = vpop.permute.xlu0 %1967 }
 0x2d1   : > { %v1969_v16 = vsel %vm659_vm0, %v1966_v49, %v1968_v14  ;;  %v2255_v24 = vpop.permute.xlu2 %2254  ;;  %v1955_v19 = vsel %vm618_vm1, %v1951_v5, %v1945_v29 }
 0x2d2   : > { %v1976_v53 = vmul.f32 %v1969_v16, %v5716_v11  ;;  %v1954_v11 = vsel %vm618_vm1, %v1945_v29, %v1947_v54  ;;  %v1956_v41 = vmul.f32 %v1955_v19, %v5712_v8  ;;  %v7574_v19 = vld [vmem:[#allocation22_spill] sm:$0xff] }
 0x2d3   : > { %v1957_v32 = vmul.f32 %v1954_v11, %v5667_v45 }
 0x2d4   : > { %2057 = vmatpush.msra.mxu3 %v1976_v53  ;;  %v4892_v53 = vld [vmem:[%s7571_s9 + $0x28] sm:$0xff] }
 0x2d5   : > { %4872 = vmatmul.msk.f32.vlgmr.msra.gmra.mxu3 %vm1044_vm8, %v4868_v48 }
 0x2d8   : > { %v2148_v4 = vpop.permute.xlu0 %2147  ;;  %v1964_v7 = vpop.permute.xlu1 %1963 }
 0x2d9   : > { %v1970_v2 = vsel %vm659_vm0, %v1964_v7, %v1966_v49  ;;  %v2447_v34 = vpop.permute.xlu2 %2446 }
 0x2da   : > { %v1975_v22 = vmul.f32 %v1970_v2, %v5662_v43 }
 0x2dc   : > { %2037 = vmatpush.msrb.mxu2 %v1975_v22 }
 0x2dd   : > { %4871 = vmatmul.msk.f32.vlgmr.msrb.gmra.mxu2 %vm1044_vm8, %v4868_v48 }
 0x2e0   : > { %v1949_v12 = vpop.permute.xlu0 %1948  ;;  %v1962_v18 = vpop.permute.xlu1 %1961 }
 0x2e1   : > { %v1952_v6 = vsel %vm618_vm1, %v1949_v12, %v1951_v5  ;;  %v1953_v57 = vsel %vm618_vm1, %v1947_v54, %v1949_v12  ;;  %v1971_v43 = vsel %vm659_vm0, %v1962_v18, %v1964_v7  ;;  %v1972_v40 = vsel %vm659_vm0, %v1968_v14, %v1962_v18  ;;  %v2445_v20 = vpop.permute.xlu2 %2444  ;;  %v4887_v14 = vld [vmem:[%s7571_s9 + $0x20] sm:$0xff]  ;;  %v7575_v18 = vld [vmem:[#allocation14_spill] sm:$0xff] }
 0x2e2   : > { %v1958_v60 = vmul.f32 %v1953_v57, %v5669_v46  ;;  %v1959_v3 = vmul.f32 %v1952_v6, %v5714_v9  ;;  %v1973_v28 = vmul.f32 %v1972_v40, %v5704_v63  ;;  %v1974_v35 = vmul.f32 %v1971_v43, %v5680_v51  ;;  %v7576_v57 = vld [vmem:[#allocation15_spill] sm:$0xff] }
 0x2e4   : > { %1997 = vmatpush.msra.mxu0 %v1973_v28  ;;  %2017 = vmatpush.msrb.mxu1 %v1974_v35 }
 0x2e5   : > { %2120 = vmatpush.msra.mxu2 %v1958_v60  ;;  %2140 = vmatpush.msrb.mxu3 %v1959_v3  ;;  %v4897_v60 = vld [vmem:[%s7571_s9 + $0x30] sm:$0xff] }
 0x2e6   : > { %4869 = vmatmul.msk.f32.vlgmr.msra.gmra.mxu0 %vm1044_vm8, %v4868_v48  ;;  %4870 = vmatmul.msk.f32.vlgmr.msrb.gmra.mxu1 %vm1044_vm8, %v4868_v48 }
 0x2e7   : > { %2080 = vmatpush.msrb.mxu0 %v1956_v41  ;;  %2100 = vmatpush.msra.mxu1 %v1957_v32  ;;  %v7577_v41 = vld [vmem:[#allocation19_spill] sm:$0xff] }
 0x2e8   : > { %4875 = vmatmul.msk.f32.vlgmr.msra.gmra.mxu2 %vm1044_vm8, %v1960_v13  ;;  %4876 = vmatmul.msk.f32.vlgmr.msrb.gmra.mxu3 %vm1044_vm8, %v1960_v13  ;;  %v2146_v45 = vpop.permute.xlu0 %2145  ;;  %v2150_v46 = vpop.permute.xlu1 %2149 }
 0x2e9   : > { %v2155_v51 = vsel %vm706_vm2, %v2146_v45, %v2148_v4  ;;  %v2156_v63 = vsel %vm706_vm2, %v2152_v47, %v2146_v45  ;;  %v2153_v8 = vsel %vm706_vm2, %v2150_v46, %v2152_v47  ;;  %v2154_v9 = vsel %vm706_vm2, %v2148_v4, %v2150_v46  ;;  %v2556_v26 = vpop.permute.xlu2 %2555  ;;  %v4902_v46 = vld [vmem:[%s7571_s9 + $0x38] sm:$0xff] }
 0x2ea   : > { %v2157_v56 = vmul.f32 %v2156_v63, %v7563_v50  ;;  %v2158_v21 = vmul.f32 %v2155_v51, %v7564_v36  ;;  %v2159_v10 = vmul.f32 %v2154_v9, %v5695_v58  ;;  %v2160_v25 = vmul.f32 %v2153_v8, %v5733_v42 }
 0x2ec   : > { %2181 = vmatpush.msra.mxu0 %v2157_v56  ;;  %2201 = vmatpush.msrb.mxu1 %v2158_v21 }
 0x2ed   : > { %2221 = vmatpush.msrb.mxu2 %v2159_v10  ;;  %2241 = vmatpush.msra.mxu3 %v2160_v25  ;;  %v7579_v25 = vld [vmem:[#allocation23_spill] sm:$0xff] }
 0x2ee   : > { %4873 = vmatmul.msk.f32.vlgmr.msrb.gmra.mxu0 %vm1044_vm8, %v1960_v13  ;;  %4874 = vmatmul.msk.f32.vlgmr.msra.gmra.mxu1 %vm1044_vm8, %v1960_v13  ;;  %v7578_v13 = vld [vmem:[#allocation18_spill] sm:$0xff] }
 0x2f0   : > { %4880 = vmatmul.msk.f32.vlgmr.msrb.gmra.mxu2 %vm1044_vm8, %v4877_v62  ;;  %4881 = vmatmul.msk.f32.vlgmr.msra.gmra.mxu3 %vm1044_vm8, %v4877_v62  ;;  %v2257_v58 = vpop.permute.xlu0 %2256  ;;  %v2253_v50 = vpop.permute.xlu1 %2252 }
 0x2f1   : > { %v2258_v42 = vsel %vm753_vm3, %v2255_v24, %v2257_v58  ;;  %v2259_v36 = vsel %vm753_vm3, %v2253_v50, %v2255_v24  ;;  %v2659_v16 = vpop.permute.xlu2 %2658  ;;  %v7573_v24 = vld [vmem:[#allocation21_spill] sm:$0xff] }
 0x2f2   : > { %v2265_v59 = vmul.f32 %v2258_v42, %v7567_v23  ;;  %v2264_v33 = vmul.f32 %v2259_v36, %v5726_v17  ;;  %v7582_v36 = vld [vmem:[#allocation25_spill] sm:$0xff] }
 0x2f4   : > { %2326 = vmatpush.msra.mxu2 %v2264_v33  ;;  %2346 = vmatpush.msrb.mxu3 %v2265_v59 }
 0x2f6   : > { %2415 = vmatpush.msrb.mxu2 %v6191_v27  ;;  %2435 = vmatpush.msra.mxu3 %v6189_v30  ;;  %v2454_v30 = vsel %vm815_vm4, %v2445_v20, %v2447_v34 }
 0x2f7   : > { %4878 = vmatmul.msk.f32.vlgmr.msra.gmra.mxu0 %vm1044_vm8, %v4877_v62  ;;  %4879 = vmatmul.msk.f32.vlgmr.msrb.gmra.mxu1 %vm1044_vm8, %v4877_v62  ;;  %v2456_v47 = vmul.f32 %v2454_v30, %v5827_v31  ;;  %v4907_v30 = vld [vmem:[%s7571_s9 + $0x40] sm:$0xff]  ;;  %s7501_s9 = smov 121  }
 0x2f8   : > { %4885 = vmatmul.msk.f32.vlgmr.msra.gmra.mxu2 %vm1044_vm8, %v4882_v38  ;;  %4886 = vmatmul.msk.f32.vlgmr.msrb.gmra.mxu3 %vm1044_vm8, %v4882_v38  ;;  %v2449_v23 = vpop.permute.xlu0 %2448  ;;  %v2251_v17 = vpop.permute.xlu1 %2250 }
 0x2f9   : > { %v2260_v39 = vsel %vm753_vm3, %v2251_v17, %v2253_v50  ;;  %v2261_v55 = vsel %vm753_vm3, %v2257_v58, %v2251_v17  ;;  %v2453_v27 = vsel %vm815_vm4, %v2447_v34, %v2449_v23  ;;  %v2760_v40 = vpop.permute.xlu2 %2759  ;;  %v7581_v50 = vld [vmem:[#allocation20_spill] sm:$0xff] }
 0x2fa   : > { %v2262_v54 = vmul.f32 %v2261_v55, %v7566_v15  ;;  %v2263_v49 = vmul.f32 %v2260_v39, %v7565_v61  ;;  %v2457_v5 = vmul.f32 %v2453_v27, %v5789_v44  ;;  %v7583_v17 = vld [vmem:[#allocation24_spill] sm:$0xff]  ;;  %v7584_v39 = vld [vmem:[#allocation26_spill] sm:$0xff] }
 0x2fc   : > { %2286 = vmatpush.msrb.mxu0 %v2262_v54  ;;  %2306 = vmatpush.msra.mxu1 %v2263_v49 }
 0x2fe   : > { %2375 = vmatpush.msra.mxu0 %v6205_v0  ;;  %2395 = vmatpush.msrb.mxu1 %v6185_v1  ;;  %v7572_v0 = vld [vmem:[#allocation17_spill] sm:$0xff] }
 0x2ff   : > { %4883 = vmatmul.msk.f32.vlgmr.msrb.gmra.mxu0 %vm1044_vm8, %v4882_v38  ;;  %4884 = vmatmul.msk.f32.vlgmr.msra.gmra.mxu1 %vm1044_vm8, %v4882_v38 }
 0x300   : > { %2480 = vmatpush.msrb.mxu0 %v2456_v47  ;;  %2500 = vmatpush.msra.mxu1 %v2457_v5  ;;  %v2552_v31 = vpop.permute.xlu0 %2551  ;;  %v2451_v44 = vpop.permute.xlu1 %2450 }
 0x301   : > { %4890 = vmatmul.msk.f32.vlgmr.msrb.gmra.mxu2 %vm1044_vm8, %v4887_v14  ;;  %4891 = vmatmul.msk.f32.vlgmr.msra.gmra.mxu3 %vm1044_vm8, %v4887_v14  ;;  %v2452_v61 = vsel %vm815_vm4, %v2449_v23, %v2451_v44  ;;  %v2455_v15 = vsel %vm815_vm4, %v2451_v44, %v2445_v20  ;;  %v2762_v51 = vpop.permute.xlu2 %2761  ;;  %v7580_v20 = vld [vmem:[#allocation16_spill] sm:$0xff] }
 0x302   : > { %v2458_v1 = vmul.f32 %v2452_v61, %v5795_v52  ;;  %v2459_v29 = vmul.f32 %v2455_v15, %v7572_v0  ;;  %v2769_v10 = vsel %vm956_vm7, %v2760_v40, %v2762_v51 }
 0x303   : > { %v2771_v59 = vmul.f32 %v2769_v10, %v7582_v36 }
 0x304   : > { %2520 = vmatpush.msra.mxu2 %v2458_v1  ;;  %2540 = vmatpush.msrb.mxu3 %v2459_v29 }
 0x307   : > { %4888 = vmatmul.msk.f32.vlgmr.msra.gmra.mxu0 %vm1044_vm8, %v4887_v14  ;;  %4889 = vmatmul.msk.f32.vlgmr.msrb.gmra.mxu1 %vm1044_vm8, %v4887_v14 }
 0x308   : > { %v2550_v48 = vpop.permute.xlu0 %2549  ;;  %v2554_v4 = vpop.permute.xlu1 %2553 }
 0x309   : > { %4895 = vmatmul.msk.f32.vlgmr.msra.gmra.mxu2 %vm1044_vm8, %v4892_v53  ;;  %4896 = vmatmul.msk.f32.vlgmr.msrb.gmra.mxu3 %vm1044_vm8, %v4892_v53  ;;  %v2559_v52 = vsel %vm862_vm5, %v2550_v48, %v2552_v31  ;;  %v2560_v7 = vsel %vm862_vm5, %v2556_v26, %v2550_v48  ;;  %v2557_v2 = vsel %vm862_vm5, %v2554_v4, %v2556_v26 }
 0x30a   : > { %v2558_v22 = vsel %vm862_vm5, %v2552_v31, %v2554_v4  ;;  %v2561_v11 = vmul.f32 %v2559_v52, %v7573_v24  ;;  %v2564_v12 = vmul.f32 %v2560_v7, %v7574_v19  ;;  %v2563_v43 = vmul.f32 %v2557_v2, %v7576_v57 }
 0x30b   : > { %v2562_v6 = vmul.f32 %v2558_v22, %v7575_v18 }
 0x30c   : > { %2585 = vmatpush.msra.mxu0 %v2561_v11  ;;  %2625 = vmatpush.msrb.mxu2 %v2563_v43 }
 0x30d   : > { %2605 = vmatpush.msrb.mxu1 %v2562_v6  ;;  %2645 = vmatpush.msra.mxu3 %v2564_v12 }
 0x30f   : > { %4893 = vmatmul.msk.f32.vlgmr.msrb.gmra.mxu0 %vm1044_vm8, %v4892_v53  ;;  %4894 = vmatmul.msk.f32.vlgmr.msra.gmra.mxu1 %vm1044_vm8, %v4892_v53 }
 0x310   : > { %v2661_v3 = vpop.permute.xlu0 %2660  ;;  %v2657_v28 = vpop.permute.xlu1 %2656 }
 0x311   : > { %4900 = vmatmul.msk.f32.vlgmr.msrb.gmra.mxu2 %vm1044_vm8, %v4897_v60  ;;  %4901 = vmatmul.msk.f32.vlgmr.msra.gmra.mxu3 %vm1044_vm8, %v4897_v60  ;;  %v2662_v35 = vsel %vm909_vm6, %v2659_v16, %v2661_v3  ;;  %v2663_v32 = vsel %vm909_vm6, %v2657_v28, %v2659_v16 }
 0x312   : > { %v2668_v34 = vmul.f32 %v2662_v35, %v7577_v41  ;;  %v2667_v45 = vmul.f32 %v2663_v32, %v7578_v13 }
 0x314   : > { %2710 = vmatpush.msra.mxu1 %v2667_v45  ;;  %2730 = vmatpush.msra.mxu2 %v2668_v34 }
 0x317   : > { %4898 = vmatmul.msk.f32.vlgmr.msra.gmra.mxu0 %vm1044_vm8, %v4897_v60  ;;  %4899 = vmatmul.msk.f32.vlgmr.msrb.gmra.mxu1 %vm1044_vm8, %v4897_v60 }
 0x318   : > { %v2764_v63 = vpop.permute.xlu0 %2763  ;;  %v2655_v8 = vpop.permute.xlu1 %2654 }
 0x319   : > { %4905 = vmatmul.msk.f32.vlgmr.msra.gmra.mxu2 %vm1044_vm8, %v4902_v46  ;;  %v2768_v9 = vsel %vm956_vm7, %v2762_v51, %v2764_v63  ;;  %v2664_v56 = vsel %vm909_vm6, %v2655_v8, %v2657_v28  ;;  %v2665_v21 = vsel %vm909_vm6, %v2661_v3, %v2655_v8 }
 0x31a   : > { %v2772_v62 = vmul.f32 %v2768_v9, %v7579_v25  ;;  %v2666_v58 = vmul.f32 %v2664_v56, %v7580_v20  ;;  %v2669_v42 = vmul.f32 %v2665_v21, %v7581_v50 }
 0x31c   : > { %2690 = vmatpush.msrb.mxu0 %v2666_v58  ;;  %2750 = vmatpush.msrb.mxu3 %v2669_v42 }
 0x31d   : > { %2815 = vmatpush.msrb.mxu1 %v2772_v62  ;;  %4906 = vmatmul.msk.f32.vlgmr.msrb.gmra.mxu3 %vm1044_vm8, %v4902_v46 }
 0x31e   : > { %2795 = vmatpush.msra.mxu0 %v2771_v59 }
 0x31f   : > { %4903 = vmatmul.msk.f32.vlgmr.msrb.gmra.mxu0 %vm1044_vm8, %v4902_v46  ;;  %4904 = vmatmul.msk.f32.vlgmr.msra.gmra.mxu1 %vm1044_vm8, %v4902_v46 }
 0x320   : > { %v2766_v33 = vpop.permute.xlu1 %2765 }
 0x321   : > { %v2767_v38 = vsel %vm956_vm7, %v2764_v63, %v2766_v33  ;;  %v2770_v23 = vsel %vm956_vm7, %v2766_v33, %v2760_v40 }
 0x322   : > { %v2773_v26 = vmul.f32 %v2767_v38, %v7583_v17  ;;  %v2774_v55 = vmul.f32 %v2770_v23, %v7584_v39 }
 0x324   : > { %2835 = vmatpush.msrb.mxu2 %v2773_v26  ;;  %2855 = vmatpush.msra.mxu3 %v2774_v55 }
 0x325   : > { %4910 = vmatmul.msk.f32.vlgmr.msrb.gmra.mxu2 %vm1044_vm8, %v4907_v30  ;;  %4911 = vmatmul.msk.f32.vlgmr.msra.gmra.mxu3 %vm1044_vm8, %v4907_v30 }
 0x327   : > { %4908 = vmatmul.msk.f32.vlgmr.msra.gmra.mxu0 %vm1044_vm8, %v4907_v30  ;;  %4909 = vmatmul.msk.f32.vlgmr.msrb.gmra.mxu1 %vm1044_vm8, %v4907_v30  ;;  %v2868_v30 = vpop.permute.xlu0 %2867 }
 0x358   : > { %v2059_v54 = vpop.f32.mrf.mxu3 }
 0x360   : > { %v2039_v27 = vpop.f32.mrf.mxu2 }
 0x363   : > { %v1999_v49 = vpop.f32.mrf.mxu0  ;;  %v2019_v47 = vpop.f32.mrf.mxu1 }
 0x36b   : > { %v2122_v5 = vpop.f32.mrf.mxu2  ;;  %v2142_v14 = vpop.f32.mrf.mxu3 }
 0x36c   : > { %v2082_v31 = vpop.f32.mrf.mxu0  ;;  %v2102_v44 = vpop.f32.mrf.mxu1  ;;  %v2143_v18 = vadd.f32 %v2142_v14, %v2059_v54  ;;  %v2123_v41 = vadd.f32 %v2122_v5, %v2039_v27 }
 0x36d   : > { %v2103_v12 = vadd.f32 %v2102_v44, %v2019_v47  ;;  %v2083_v60 = vadd.f32 %v2082_v31, %v1999_v49 }
 0x373   : > { %v2223_v61 = vpop.f32.mrf.mxu2  ;;  %v2243_v15 = vpop.f32.mrf.mxu3 }
 0x374   : > { %v2183_v1 = vpop.f32.mrf.mxu0  ;;  %v2203_v0 = vpop.f32.mrf.mxu1  ;;  %v2249_v3 = vadd.f32 %v2243_v15, %v2143_v18  ;;  %v2248_v51 = vadd.f32 %v2223_v61, %v2123_v41  ;;  %v7585_v61 = vld [vmem:[#allocation29_spill] sm:$0xff]  ;;  %v2945_v18 = vld [vmem:[%s7589_s22 + $0xf8] sm:$0xff] }
 0x375   : > { %v2247_v43 = vadd.f32 %v2203_v0, %v2103_v12  ;;  %v2246_v35 = vadd.f32 %v2183_v1, %v2083_v60  ;;  %v7586_v1 = vld [vmem:[#allocation27_spill] sm:$0xff]  ;;  %2998 = vmatpush.msra.mxu1 %v2945_v18  ;;  %v2975_v41 = vld [vmem:[%s7589_s22 + $0x1e8] sm:$0xff] }
 0x376   : > { %v2929_v12 = vld [vmem:[%s7589_s22 + $0x78] sm:$0xff]  ;;  %v2960_v60 = vld [vmem:[%s7589_s22 + $0x170] sm:$0xff] }
 0x377   : > { %2978 = vmatpush.msrb.mxu0 %v2929_v12 }
 0x37b   : > { %v2328_v29 = vpop.f32.mrf.mxu2  ;;  %v2348_v16 = vpop.f32.mrf.mxu3 }
 0x37c   : > { %v2288_v53 = vpop.f32.mrf.mxu0  ;;  %v2308_v48 = vpop.f32.mrf.mxu1  ;;  %v2354_v34 = vadd.f32 %v2348_v16, %v2249_v3  ;;  %v2353_v9 = vadd.f32 %v2328_v29, %v2248_v51  ;;  %v2976_v3 = vld [vmem:[%s7589_s22 + $0x1f0] sm:$0xff]  ;;  %v2925_v51 = vld [vmem:[%s7589_s22 + $0x58] sm:$0xff] }
 0x37d   : > { %v2352_v32 = vadd.f32 %v2308_v48, %v2247_v43  ;;  %v2351_v13 = vadd.f32 %v2288_v53, %v2246_v35  ;;  %v7587_v53 = vld [vmem:[#allocation28_spill] sm:$0xff]  ;;  %v2928_v43 = vld [vmem:[%s7589_s22 + $0x70] sm:$0xff]  ;;  %v2943_v35 = vld [vmem:[%s7589_s22 + $0xe8] sm:$0xff] }
 0x37e   : > { %2979 = vmatpush.msrb.mxu0 %v2928_v43 }
 0x384   : > { %v2417_v4 = vpop.f32.mrf.mxu2  ;;  %v2437_v52 = vpop.f32.mrf.mxu3 }
 0x385   : > { %v2377_v7 = vpop.f32.mrf.mxu0  ;;  %v2397_v2 = vpop.f32.mrf.mxu1  ;;  %v2443_v56 = vadd.f32 %v2437_v52, %v2354_v34  ;;  %v2442_v20 = vadd.f32 %v2417_v4, %v2353_v9  ;;  %v7588_v4 = vld [vmem:[#allocation30_spill] sm:$0xff]  ;;  %v2926_v34 = vld [vmem:[%s7589_s22 + $0x60] sm:$0xff]  ;;  %v2973_v9 = vld [vmem:[%s7589_s22 + $0x1d8] sm:$0xff] }
 0x386   : > { %v2440_v63 = vadd.f32 %v2377_v7, %v2351_v13  ;;  %v2441_v8 = vadd.f32 %v2397_v2, %v2352_v32  ;;  %v2959_v32 = vld [vmem:[%s7589_s22 + $0x168] sm:$0xff]  ;;  %v2942_v13 = vld [vmem:[%s7589_s22 + $0xe0] sm:$0xff] }
 0x38c   : > { %v2522_v22 = vpop.f32.mrf.mxu2  ;;  %v2542_v19 = vpop.f32.mrf.mxu3 }
 0x38d   : > { %v2482_v24 = vpop.f32.mrf.mxu0  ;;  %v2502_v11 = vpop.f32.mrf.mxu1  ;;  %v2547_v42 = vadd.f32 %v2522_v22, %v2442_v20  ;;  %v2548_v36 = vadd.f32 %v2542_v19, %v2443_v56  ;;  %v2924_v56 = vld [vmem:[%s7589_s22 + $0x50] sm:$0xff]  ;;  %v2939_v20 = vld [vmem:[%s7589_s22 + $0xc8] sm:$0xff] }
 0x38e   : > { %v2545_v21 = vadd.f32 %v2482_v24, %v2440_v63  ;;  %v2546_v10 = vadd.f32 %v2502_v11, %v2441_v8  ;;  %v2941_v63 = vld [vmem:[%s7589_s22 + $0xd8] sm:$0xff] }
 0x38f   : > { %v2957_v8 = vld [vmem:[%s7589_s22 + $0x158] sm:$0xff] }
 0x394   : > { %v2627_v40 = vpop.f32.mrf.mxu2  ;;  %v2647_v28 = vpop.f32.mrf.mxu3 }
 0x395   : > { %v2587_v6 = vpop.f32.mrf.mxu0  ;;  %v2607_v57 = vpop.f32.mrf.mxu1  ;;  %v2652_v17 = vadd.f32 %v2627_v40, %v2547_v42  ;;  %v2653_v26 = vadd.f32 %v2647_v28, %v2548_v36  ;;  %v2944_v40 = vld [vmem:[%s7589_s22 + $0xf0] sm:$0xff]  ;;  %v2927_v28 = vld [vmem:[%s7589_s22 + $0x68] sm:$0xff]  ;;  %v2922_v42 = vld [vmem:[%s7589_s22 + $0x40] sm:$0xff] }
 0x396   : > { %v2650_v58 = vadd.f32 %v2587_v6, %v2545_v21  ;;  %v2651_v50 = vadd.f32 %v2607_v57, %v2546_v10  ;;  %v2961_v6 = vld [vmem:[%s7589_s22 + $0x178] sm:$0xff]  ;;  %2999 = vmatpush.msra.mxu1 %v2944_v40  ;;  %2980 = vmatpush.msrb.mxu0 %v2927_v28  ;;  %v2940_v21 = vld [vmem:[%s7589_s22 + $0xd0] sm:$0xff]  ;;  %v2938_v36 = vld [vmem:[%s7589_s22 + $0xc0] sm:$0xff] }
 0x397   : > { %v2977_v57 = vld [vmem:[%s7589_s22 + $0x1f8] sm:$0xff]  ;;  %3018 = vmatpush.msra.mxu2 %v2961_v6  ;;  %v2956_v10 = vld [vmem:[%s7589_s22 + $0x150] sm:$0xff] }
 0x398   : > { %3038 = vmatpush.msrb.mxu3 %v2977_v57  ;;  %3000 = vmatpush.msra.mxu1 %v2943_v35 }
 0x399   : > { %3019 = vmatpush.msra.mxu2 %v2960_v60  ;;  %2981 = vmatpush.msrb.mxu0 %v2926_v34 }
 0x39a   : > { %3039 = vmatpush.msrb.mxu3 %v2976_v3  ;;  %3001 = vmatpush.msra.mxu1 %v2942_v13  ;;  %v2914_v13 = vld [vmem:[%s7589_s22] sm:$0xff] }
 0x39b   : > { %3020 = vmatpush.msra.mxu2 %v2959_v32  ;;  %2982 = vmatpush.msrb.mxu0 %v2925_v51  ;;  %v2962_v51 = vld [vmem:[%s7589_s22 + $0x180] sm:$0xff] }
 0x39c   : > { %v2732_v25 = vpop.f32.mrf.mxu2  ;;  %3040 = vmatpush.msrb.mxu3 %v2975_v41  ;;  %3002 = vmatpush.msra.mxu1 %v2941_v63 }
 0x39d   : > { %v2692_v45 = vpop.f32.mrf.mxu0  ;;  %v2712_v46 = vpop.f32.mrf.mxu1  ;;  %v2757_v27 = vadd.f32 %v2732_v25, %v2652_v17  ;;  %v2972_v25 = vld [vmem:[%s7589_s22 + $0x1d0] sm:$0xff]  ;;  %2983 = vmatpush.msrb.mxu0 %v2924_v56  ;;  %v2953_v17 = vld [vmem:[%s7589_s22 + $0x138] sm:$0xff] }
 0x39e   : > { %v2755_v59 = vadd.f32 %v2692_v45, %v2650_v58  ;;  %v2756_v33 = vadd.f32 %v2712_v46, %v2651_v50  ;;  %v2958_v45 = vld [vmem:[%s7589_s22 + $0x160] sm:$0xff]  ;;  %3003 = vmatpush.msra.mxu1 %v2940_v21  ;;  %v2955_v58 = vld [vmem:[%s7589_s22 + $0x148] sm:$0xff] }
 0x39f   : > { %v2974_v46 = vld [vmem:[%s7589_s22 + $0x1e0] sm:$0xff]  ;;  %3021 = vmatpush.msra.mxu2 %v2958_v45  ;;  %v2971_v50 = vld [vmem:[%s7589_s22 + $0x1c8] sm:$0xff] }
 0x3a0   : > { %v2752_v62 = vpop.f32.mrf.mxu3  ;;  %3041 = vmatpush.msrb.mxu3 %v2974_v46  ;;  %3004 = vmatpush.msra.mxu1 %v2939_v20  ;;  %v2930_v45 = vld [vmem:[%s7589_s22 + $0x80] sm:$0xff] }
 0x3a1   : > { %v2758_v54 = vadd.f32 %v2752_v62, %v2653_v26  ;;  %3022 = vmatpush.msra.mxu2 %v2957_v8  ;;  %v2923_v62 = vld [vmem:[%s7589_s22 + $0x48] sm:$0xff]  ;;  %v2969_v26 = vld [vmem:[%s7589_s22 + $0x1b8] sm:$0xff]  ;;  %v2946_v46 = vld [vmem:[%s7589_s22 + $0x100] sm:$0xff] }
 0x3a2   : > { %3042 = vmatpush.msrb.mxu3 %v2973_v9  ;;  %2984 = vmatpush.msrb.mxu0 %v2923_v62 }
 0x3a3   : > { %3023 = vmatpush.msra.mxu2 %v2956_v10  ;;  %3005 = vmatpush.msra.mxu1 %v2938_v36 }
 0x3a4   : > { %3043 = vmatpush.msrb.mxu3 %v2972_v25  ;;  %2985 = vmatpush.msrb.mxu0 %v2922_v42 }
 0x3a5   : > { %v2797_v38 = vpop.f32.mrf.mxu0  ;;  %v2817_v23 = vpop.f32.mrf.mxu1  ;;  %3024 = vmatpush.msra.mxu2 %v2955_v58 }
 0x3a6   : > { %v2860_v39 = vadd.f32 %v2797_v38, %v2755_v59  ;;  %v2861_v55 = vadd.f32 %v2817_v23, %v2756_v33  ;;  %v2954_v59 = vld [vmem:[%s7589_s22 + $0x140] sm:$0xff]  ;;  %3044 = vmatpush.msrb.mxu3 %v2971_v50  ;;  %v2921_v38 = vld [vmem:[%s7589_s22 + $0x38] sm:$0xff] }
 0x3a7   : > { %v2970_v33 = vld [vmem:[%s7589_s22 + $0x1c0] sm:$0xff]  ;;  %v2937_v23 = vld [vmem:[%s7589_s22 + $0xb8] sm:$0xff]  ;;  %3025 = vmatpush.msra.mxu2 %v2954_v59  ;;  %2986 = vmatpush.msrb.mxu0 %v2921_v38 }
 0x3a8   : > { %v2870_v49 = vadd.f32 %v2868_v30, %v2860_v39  ;;  %v2871_v47 = vadd.f32 %v2868_v30, %v2861_v55  ;;  %v2837_v5 = vpop.f32.mrf.mxu2  ;;  %v2857_v14 = vpop.f32.mrf.mxu3  ;;  %3045 = vmatpush.msrb.mxu3 %v2970_v33  ;;  %v2920_v39 = vld [vmem:[%s7589_s22 + $0x30] sm:$0xff]  ;;  %3006 = vmatpush.msra.mxu1 %v2937_v23 }
 0x3a9   : > { %v2862_v31 = vadd.f32 %v2837_v5, %v2757_v27  ;;  %v2863_v44 = vadd.f32 %v2857_v14, %v2758_v54  ;;  %v2936_v55 = vld [vmem:[%s7589_s22 + $0xb0] sm:$0xff]  ;;  %3026 = vmatpush.msra.mxu2 %v2953_v17  ;;  %v2919_v54 = vld [vmem:[%s7589_s22 + $0x28] sm:$0xff]  ;;  %2987 = vmatpush.msrb.mxu0 %v2920_v39  ;;  %v2918_v14 = vld [vmem:[%s7589_s22 + $0x20] sm:$0xff] }
 0x3aa   : > { %v6424_v15 = vadd.f32 %v2870_v49, %v7585_v61  ;;  %v6427_v0 = vadd.f32 %v2871_v47, %v7586_v1  ;;  %v2968_v27 = vld [vmem:[%s7589_s22 + $0x1b0] sm:$0xff]  ;;  %3046 = vmatpush.msrb.mxu3 %v2969_v26  ;;  %v2935_v49 = vld [vmem:[%s7589_s22 + $0xa8] sm:$0xff]  ;;  %3007 = vmatpush.msra.mxu1 %v2936_v55  ;;  %v2966_v61 = vld [vmem:[%s7589_s22 + $0x1a0] sm:$0xff] }
 0x3ab   : > { %v2872_v29 = vadd.f32 %v2868_v30, %v2862_v31  ;;  %v2873_v16 = vadd.f32 %v2868_v30, %v2863_v44  ;;  %v2952_v30 = vld [vmem:[%s7589_s22 + $0x130] sm:$0xff]  ;;  %v2951_v47 = vld [vmem:[%s7589_s22 + $0x128] sm:$0xff]  ;;  %v2934_v31 = vld [vmem:[%s7589_s22 + $0xa0] sm:$0xff]  ;;  %2988 = vmatpush.msrb.mxu0 %v2919_v54 }
 0x3ac   : > { %v2878_v7 = vmax.f32 %v6424_v15, 0.0  ;;  %v2879_v2 = vmax.f32 %v6427_v0, 0.0  ;;  %v2967_v5 = vld [vmem:[%s7589_s22 + $0x1a8] sm:$0xff]  ;;  %3027 = vmatpush.msra.mxu2 %v2952_v30  ;;  %3047 = vmatpush.msrb.mxu3 %v2968_v27  ;;  %v2950_v44 = vld [vmem:[%s7589_s22 + $0x120] sm:$0xff]  ;;  %v2948_v15 = vld [vmem:[%s7589_s22 + $0x110] sm:$0xff] }
 0x3ad   : > { %v6430_v48 = vadd.f32 %v2872_v29, %v7587_v53  ;;  %v6433_v52 = vadd.f32 %v2873_v16, %v7588_v4  ;;  %3008 = vmatpush.msra.mxu1 %v2935_v49  ;;  %v2917_v29 = vld [vmem:[%s7589_s22 + $0x18] sm:$0xff]  ;;  %2989 = vmatpush.msrb.mxu0 %v2918_v14  ;;  %v2964_v0 = vld [vmem:[%s7589_s22 + $0x190] sm:$0xff]  ;;  %v3422_v30 = vld [vmem:[%s7439_s12] sm:$0xff] }
 0x3ae   : > { %3028 = vmatpush.msra.mxu2 %v2951_v47  ;;  %3048 = vmatpush.msrb.mxu3 %v2967_v5  ;;  %v2933_v16 = vld [vmem:[%s7589_s22 + $0x98] sm:$0xff]  ;;  %v4913_v47 = vld [vmem:[%s7438_s11 + $0x10] sm:$0xff] }
 0x3af   : > { %v2880_v22 = vmax.f32 %v6430_v48, 0.0  ;;  %v2881_v24 = vmax.f32 %v6433_v52, 0.0  ;;  %3009 = vmatpush.msra.mxu1 %v2934_v31  ;;  %v2949_v53 = vld [vmem:[%s7589_s22 + $0x118] sm:$0xff]  ;;  %2990 = vmatpush.msrb.mxu0 %v2917_v29  ;;  %v2916_v48 = vld [vmem:[%s7589_s22 + $0x10] sm:$0xff] }
 0x3b0   : > { %v2965_v4 = vld [vmem:[%s7589_s22 + $0x198] sm:$0xff]  ;;  %3029 = vmatpush.msra.mxu2 %v2950_v44  ;;  %3049 = vmatpush.msrb.mxu3 %v2966_v61  ;;  %v2932_v52 = vld [vmem:[%s7589_s22 + $0x90] sm:$0xff]  ;;  %v3065_v44 = vld [vmem:[%s7438_s11] sm:$0xff] }
 0x3b1   : > { %v5148_v11 = vpack.i.bf16 %v2879_v2, %v2881_v24  ;;  %v5143_v19 = vpack.i.bf16 %v2880_v22, %v2878_v7  ;;  %3010 = vmatpush.msra.mxu1 %v2933_v16  ;;  %2991 = vmatpush.msrb.mxu0 %v2916_v48  ;;  %v4914_v61 = vld [vmem:[%s7438_s11 + $0x18] sm:$0xff] }
 0x3b2   : > { %3030 = vmatpush.msra.mxu2 %v2949_v53  ;;  %3050 = vmatpush.msrb.mxu3 %v2965_v4  ;;  %v3066_v53 = vld [vmem:[%s7438_s11 + $0x8] sm:$0xff]  ;;  %v4929_v4 = vld [vmem:[%s7438_s11 + $0x40] sm:$0xff] }
 0x3b3   : > { %5149 = vrot.lane.b32.xlu2 %v5148_v11, %s7559_s26  ;;  %5144 = vrot.lane.b32.xlu1 %v5143_v19, %s7559_s26 }
 0x3b4   : > { %3011 = vmatpush.msra.mxu1 %v2932_v52  ;;  %3031 = vmatpush.msra.mxu2 %v2948_v15  ;;  %v4921_v52 = vld [vmem:[%s7438_s11 + $0x28] sm:$0xff]  ;;  %v4926_v15 = vld [vmem:[%s7438_s11 + $0x38] sm:$0xff] }
 0x3b5   : > { %3051 = vmatpush.msrb.mxu3 %v2964_v0  ;;  %v4935_v0 = vld [vmem:[%s7438_s11 + $0x58] sm:$0xff] }
 0x40d   : > { %v5150_v1 = vpop.permute.xlu2 %5149 }
 0x40e   : > { %v5152_v19 = vunpack.i.h.bf16 %v5150_v1  ;;  %v5151_v12 = vunpack.i.l.bf16 %v5150_v1 }
 0x425   : > { %v5145_v11 = vpop.permute.xlu1 %5144 }
 0x426   : > { %v5147_v18 = vunpack.i.h.bf16 %v5145_v11  ;;  %v5146_v6 = vunpack.i.l.bf16 %v5145_v11 }
 0x428   : > { %v2890_v57 = vsel %vm815_vm4, %v5147_v18, %v5151_v12  ;;  %v2891_v43 = vsel %vm815_vm4, %v5152_v19, %v5147_v18  ;;  %v2892_v40 = vsel %vm815_vm4, %v5146_v6, %v5152_v19  ;;  %v2893_v60 = vsel %vm815_vm4, %v5151_v12, %v5146_v6 }
 0x429   : > { %v2896_v3 = vmax.f32 %v2880_v22, %v2890_v57  ;;  %v2897_v28 = vmax.f32 %v2881_v24, %v2893_v60  ;;  %v2894_v35 = vmax.f32 %v2878_v7, %v2892_v40  ;;  %v2895_v32 = vmax.f32 %v2879_v2, %v2891_v43  ;;  %v2915_v7 = vld [vmem:[%s7589_s22 + $0x8] sm:$0xff]  ;;  %v4920_v43 = vld [vmem:[%s7438_s11 + $0x20] sm:$0xff]  ;;  %v4925_v40 = vld [vmem:[%s7438_s11 + $0x30] sm:$0xff] }
 0x42a   : > { %v2931_v2 = vld [vmem:[%s7589_s22 + $0x88] sm:$0xff]  ;;  %2992 = vmatpush.msrb.mxu0 %v2915_v7  ;;  %v4934_v60 = vld [vmem:[%s7438_s11 + $0x50] sm:$0xff] }
 0x42b   : > { %v5153_v41 = vpack.i.bf16 %v2897_v28, %v2896_v3  ;;  %v5158_v34 = vpack.i.bf16 %v2895_v32, %v2894_v35  ;;  %v2947_v22 = vld [vmem:[%s7589_s22 + $0x108] sm:$0xff]  ;;  %3012 = vmatpush.msra.mxu1 %v2931_v2 }
 0x42c   : > { %v2963_v24 = vld [vmem:[%s7589_s22 + $0x188] sm:$0xff]  ;;  %3032 = vmatpush.msra.mxu2 %v2947_v22  ;;  %2993 = vmatpush.msrb.mxu0 %v2914_v13  ;;  %v4944_v13 = vld [vmem:[%s7438_s11 + $0x70] sm:$0xff] }
 0x42d   : > { %5154 = vrot.lane.b32.xlu0 %v5153_v41, %s7569_s25  ;;  %5159 = vrot.lane.b32.xlu1 %v5158_v34, %s7569_s25  ;;  %s7503_s25 = smov 119  }
 0x42e   : > { %3052 = vmatpush.msrb.mxu3 %v2963_v24  ;;  %3013 = vmatpush.msra.mxu1 %v2930_v45  ;;  %v4939_v24 = vld [vmem:[%s7438_s11 + $0x60] sm:$0xff] }
 0x42f   : > { %3033 = vmatpush.msra.mxu2 %v2946_v46  ;;  %v4949_v45 = vld [vmem:[%s7438_s11 + $0x80] sm:$0xff]  ;;  %v4940_v46 = vld [vmem:[%s7438_s11 + $0x68] sm:$0xff] }
 0x430   : > { %3053 = vmatpush.msrb.mxu3 %v2962_v51  ;;  %v4945_v51 = vld [vmem:[%s7438_s11 + $0x78] sm:$0xff] }
 0x49f   : > { %v5155_v63 = vpop.permute.xlu0 %5154  ;;  %v5160_v8 = vpop.permute.xlu1 %5159 }
 0x4a0   : > { %v5157_v9 = vunpack.i.h.bf16 %v5155_v63  ;;  %v5156_v56 = vunpack.i.l.bf16 %v5155_v63  ;;  %v5162_v21 = vunpack.i.h.bf16 %v5160_v8  ;;  %v5161_v10 = vunpack.i.l.bf16 %v5160_v8  ;;  %v4950_v63 = vld [vmem:[%s7438_s11 + $0x88] sm:$0xff] }
 0x4a2   : > { %v2906_v25 = vsel %vm909_vm6, %v5156_v56, %v5157_v9  ;;  %v2907_v62 = vsel %vm909_vm6, %v5162_v21, %v5156_v56  ;;  %v2908_v20 = vsel %vm909_vm6, %v5161_v10, %v5162_v21  ;;  %v2909_v58 = vsel %vm909_vm6, %v5157_v9, %v5161_v10 }
 0x4a3   : > { %v2912_v50 = vmax.f32 %v2896_v3, %v2906_v25  ;;  %v2911_v42 = vmax.f32 %v2895_v32, %v2907_v62  ;;  %v2910_v36 = vmax.f32 %v2894_v35, %v2908_v20  ;;  %v2913_v59 = vmax.f32 %v2897_v28, %v2909_v58  ;;  %v4930_v3 = vld [vmem:[%s7438_s11 + $0x48] sm:$0xff] }
 0x4a5   : > { %2994 = vmatmul.f32.vlgmr.msrb.gmra.mxu0 %v2910_v36  ;;  %3014 = vmatmul.f32.vlgmr.msra.gmra.mxu1 %v2911_v42 }
 0x4a6   : > { %3034 = vmatmul.f32.vlgmr.msra.gmra.mxu2 %v2912_v50  ;;  %3054 = vmatmul.f32.vlgmr.msrb.gmra.mxu3 %v2913_v59 }
 0x522   : > { %v2995_v33 = vpop.f32.mrf.mxu0  ;;  %v3015_v38 = vpop.f32.mrf.mxu1 }
 0x523   : > { %v3016_v23 = vadd.f32 %v3015_v38, %v2995_v33 }
 0x529   : > { %v3035_v17 = vpop.f32.mrf.mxu2  ;;  %v3055_v39 = vpop.f32.mrf.mxu3 }
 0x52a   : > { %v3036_v26 = vadd.f32 %v3035_v17, %v3016_v23 }
 0x52c   : > { %v3056_v55 = vadd.f32 %v3055_v39, %v3036_v26 }
 0x52e   : > { %3178 = vrot.lane.b32.xlu1 %v3056_v55, %s7558_s2  ;;  %3136 = vrot.lane.b32.xlu0 %v3056_v55, %s7505_s7 }
 0x52f   : > { %3067 = vrot.lane.b32.xlu2 %v3056_v55, %s7509_s5 }
 0x536   : > { %3338 = vrot.lane.b32.xlu1 %v3056_v55, %s7499_s8  ;;  %3296 = vrot.lane.b32.xlu0 %v3056_v55, %s7501_s9  ;;  %s7590_s9 = sld [smem:[#allocation33_spill]]  ;;  %s7593_s8 = smov 120  }
 0x537   : > { %3058 = vrot.lane.b32.xlu2 %v3056_v55, %s7507_s23 }
 0x53c   : > { %v6684_v27 = vld [vmem:[%s7590_s9 + $0x1] ss:$0 sm:$0xff]  ;;  %v6693_v5 = vld [vmem:[%s7590_s9] ss:$0 sm:$0xff]  ;;  %v6707_v1 = vld [vmem:[%s7590_s9 + $0x5] ss:$0 sm:$0xff] }
 0x53d   : > { %v6720_v11 = vld [vmem:[%s7590_s9 + $0x3] ss:$0 sm:$0xff]  ;;  %v6725_v19 = vld [vmem:[%s7590_s9 + $0x2] ss:$0 sm:$0xff]  ;;  %v6748_v28 = vld [vmem:[%s7590_s9 + $0x7] ss:$0 sm:$0xff] }
 0x53e   : > { %3431 = vperm.xlu1 %5142, %v3423_v37   ;;  %3380 = vrot.lane.b32.xlu0 %v3056_v55, %s7503_s25  ;;  %v6753_v35 = vld [vmem:[%s7590_s9 + $0x6] ss:$0 sm:$0xff]  ;;  %v6773_v7 = vld [vmem:[%s7590_s9 + $0x8] ss:$0 sm:$0xff]  ;;  %s7591_s25 = smov 7  }
 0x53f   : > { %3254 = vrot.lane.b32.xlu2 %v3056_v55, %s7559_s26 }
 0x547   : > { %3426 = vperm.xlu2 %5140, %v3422_v30  }
 0x589   : > { %v3068_v54 = vpop.permute.xlu2 %3067 }
 0x58a   : > { %v3074_v49 = vmul.f32 %v6684_v27, %v3068_v54 }
 0x58c   : > { %3099 = vmatpush.msra.mxu0 %v3074_v49 }
 0x58d   : > { %4915 = vmatmul.msk.f32.vlgmr.msra.gmra.mxu0 %vm1044_vm8, %v4913_v47 }
 0x58e   : > { %3244 = vmatpush.msrb.mxu0 %v3056_v55 }
 0x591   : > { %v3059_v14 = vpop.permute.xlu2 %3058 }
 0x592   : > { %v3064_v31 = vmul.f32 %v6693_v5, %v3059_v14 }
 0x594   : > { %3128 = vmatpush.msrb.mxu1 %v3064_v31 }
 0x595   : > { %4917 = vmatmul.msk.f32.vlgmr.msrb.gmra.mxu1 %vm1044_vm8, %v3065_v44  ;;  %4916 = vmatmul.msk.f32.gmra.mxu0 %vm1044_vm8, %v4914_v61 }
 0x599   : > { %v3255_v29 = vpop.permute.xlu2 %3254 }
 0x59a   : > { %v3261_v16 = vmul.f32 %v6707_v1, %v3255_v29 }
 0x59c   : > { %3286 = vmatpush.msra.mxu1 %v3261_v16 }
 0x59d   : > { %4918 = vmatmul.msk.f32.gmra.mxu1 %vm1044_vm8, %v3066_v53  ;;  %4931 = vmatmul.msk.f32.vlgmr.msrb.gmra.mxu0 %vm1044_vm8, %v4929_v4 }
 0x5a0   : > { %v3179_v12 = vpop.permute.xlu1 %3178  ;;  %v3137_v18 = vpop.permute.xlu0 %3136 }
 0x5a1   : > { %v3185_v6 = vmul.f32 %v6720_v11, %v3179_v12  ;;  %v3143_v57 = vmul.f32 %v6725_v19, %v3137_v18  ;;  %v3427_v44 = vpop.permute.xlu2 %3426 }
 0x5a3   : > { %3168 = vmatpush.msrb.mxu2 %v3143_v57  ;;  %3210 = vmatpush.msra.mxu3 %v3185_v6 }
 0x5a4   : > { %4922 = vmatmul.msk.f32.vlgmr.msrb.gmra.mxu2 %vm1044_vm8, %v4920_v43  ;;  %4927 = vmatmul.msk.f32.vlgmr.msra.gmra.mxu3 %vm1044_vm8, %v4925_v40 }
 0x5a5   : > { %4936 = vmatmul.msk.f32.vlgmr.msra.gmra.mxu1 %vm1044_vm8, %v4934_v60  ;;  %4932 = vmatmul.msk.f32.gmra.mxu0 %vm1044_vm8, %v4930_v3  ;;  %v3789_v3 = vld [vmem:[%s7441_s14 + $0x8] sm:$0xff] }
 0x5a8   : > { %v3339_v32 = vpop.permute.xlu1 %3338  ;;  %v3297_v41 = vpop.permute.xlu0 %3296 }
 0x5a9   : > { %v3345_v34 = vmul.f32 %v6748_v28, %v3339_v32  ;;  %v3303_v48 = vmul.f32 %v6753_v35, %v3297_v41  ;;  %v3788_v32 = vld [vmem:[%s7441_s14] sm:$0xff] }
 0x5ab   : > { %3328 = vmatpush.msra.mxu2 %v3303_v48  ;;  %3370 = vmatpush.msrb.mxu3 %v3345_v34 }
 0x5ac   : > { %4923 = vmatmul.msk.f32.gmra.mxu2 %vm1044_vm8, %v4921_v52  ;;  %4928 = vmatmul.msk.f32.gmra.mxu3 %vm1044_vm8, %v4926_v15 }
 0x5ad   : > { %4937 = vmatmul.msk.f32.gmra.mxu1 %vm1044_vm8, %v4935_v0 }
 0x5b0   : > { %v3381_v2 = vpop.permute.xlu0 %3380  ;;  %v3432_v43 = vpop.permute.xlu1 %3431 }
 0x5b1   : > { %v3387_v22 = vmul.f32 %v6773_v7, %v3381_v2 }
 0x5b3   : > { %3412 = vmatpush.msra.mxu0 %v3387_v22 }
 0x5b4   : > { %4941 = vmatmul.msk.f32.vlgmr.msra.gmra.mxu2 %vm1044_vm8, %v4939_v24  ;;  %4946 = vmatmul.msk.f32.vlgmr.msrb.gmra.mxu3 %vm1044_vm8, %v4944_v13 }
 0x5b5   : > { %4951 = vmatmul.msk.f32.vlgmr.msra.gmra.mxu0 %vm1044_vm8, %v4949_v45 }
 0x5bc   : > { %4942 = vmatmul.msk.f32.gmra.mxu2 %vm1044_vm8, %v4940_v46  ;;  %4947 = vmatmul.msk.f32.gmra.mxu3 %vm1044_vm8, %v4945_v51  ;;  %v4953_v51 = vld [vmem:[%s7440_s13 + $0x10] sm:$0xff] }
 0x5bd   : > { %4952 = vmatmul.msk.f32.gmra.mxu0 %vm1044_vm8, %v4950_v63  ;;  %v4959_v63 = vld [vmem:[%s7440_s13 + $0x20] sm:$0xff] }
 0x60a   : > { %v3101_v8 = vpop.f32.mrf.mxu0 }
 0x612   : > { %v3104_v9 = vpop.f32.mrf.mxu0  ;;  %v3130_v56 = vpop.f32.mrf.mxu1 }
 0x613   : > { %v3131_v62 = vadd.f32 %v3130_v56, %v3101_v8 }
 0x61a   : > { %v3246_v21 = vpop.f32.mrf.mxu0  ;;  %v3133_v20 = vpop.f32.mrf.mxu1 }
 0x61b   : > { %v3134_v33 = vadd.f32 %v3133_v20, %v3104_v9  ;;  %v4954_v20 = vld [vmem:[%s7440_s13 + $0x18] sm:$0xff] }
 0x622   : > { %v3249_v50 = vpop.f32.mrf.mxu0  ;;  %v3288_v38 = vpop.f32.mrf.mxu1 }
 0x627   : > { %v3170_v10 = vpop.f32.mrf.mxu2  ;;  %v3212_v25 = vpop.f32.mrf.mxu3 }
 0x628   : > { %v3176_v58 = vadd.f32 %v3170_v10, %v3131_v62 }
 0x62a   : > { %v3218_v42 = vadd.f32 %v3212_v25, %v3176_v58  ;;  %v3291_v14 = vpop.f32.mrf.mxu1  ;;  %v3444_v25 = vld [vmem:[%s7440_s13] sm:$0xff]  ;;  %v4960_v58 = vld [vmem:[%s7440_s13 + $0x28] sm:$0xff] }
 0x62c   : > { %v3252_v23 = vadd.f32 %v3246_v21, %v3218_v42 }
 0x62e   : > { %v3294_v26 = vadd.f32 %v3288_v38, %v3252_v23  ;;  %v4963_v23 = vld [vmem:[%s7440_s13 + $0x30] sm:$0xff] }
 0x62f   : > { %v3173_v36 = vpop.f32.mrf.mxu2  ;;  %v3215_v59 = vpop.f32.mrf.mxu3 }
 0x630   : > { %v3177_v17 = vadd.f32 %v3173_v36, %v3134_v33 }
 0x632   : > { %v3219_v39 = vadd.f32 %v3215_v59, %v3177_v17  ;;  %v3414_v55 = vpop.f32.mrf.mxu0  ;;  %v3445_v59 = vld [vmem:[%s7440_s13 + $0x8] sm:$0xff] }
 0x634   : > { %v3253_v49 = vadd.f32 %v3249_v50, %v3219_v39  ;;  %v4975_v39 = vld [vmem:[%s7440_s13 + $0x60] sm:$0xff] }
 0x636   : > { %v3295_v61 = vadd.f32 %v3291_v14, %v3253_v49  ;;  %v4968_v49 = vld [vmem:[%s7440_s13 + $0x48] sm:$0xff] }
 0x637   : > { %v3330_v37 = vpop.f32.mrf.mxu2  ;;  %v3372_v30 = vpop.f32.mrf.mxu3 }
 0x638   : > { %v3336_v54 = vadd.f32 %v3330_v37, %v3294_v26  ;;  %v4967_v26 = vld [vmem:[%s7440_s13 + $0x40] sm:$0xff] }
 0x63a   : > { %v3378_v47 = vadd.f32 %v3372_v30, %v3336_v54  ;;  %v3417_v18 = vpop.f32.mrf.mxu0  ;;  %v4971_v30 = vld [vmem:[%s7440_s13 + $0x50] sm:$0xff]  ;;  %v4964_v54 = vld [vmem:[%s7440_s13 + $0x38] sm:$0xff] }
 0x63c   : > { %v3420_v31 = vadd.f32 %v3414_v55, %v3378_v47  ;;  %v4976_v47 = vld [vmem:[%s7440_s13 + $0x68] sm:$0xff] }
 0x63e   : > { %v3434_v29 = vadd.f32 %v3427_v44, %v3420_v31 }
 0x63f   : > { %v3333_v16 = vpop.f32.mrf.mxu2  ;;  %v3375_v53 = vpop.f32.mrf.mxu3 }
 0x640   : > { %v6801_v4 = vmax.f32 %v3434_v29, 0.0  ;;  %v3337_v12 = vadd.f32 %v3333_v16, %v3295_v61  ;;  %v4972_v61 = vld [vmem:[%s7440_s13 + $0x58] sm:$0xff]  ;;  %v4979_v16 = vld [vmem:[%s7440_s13 + $0x70] sm:$0xff] }
 0x642   : > { %v3379_v6 = vadd.f32 %v3375_v53, %v3337_v12  ;;  %3446 = vrot.lane.b32.xlu1 %v6801_v4, %s7509_s5 }
 0x644   : > { %v3421_v57 = vadd.f32 %v3417_v18, %v3379_v6  ;;  %v4983_v18 = vld [vmem:[%s7440_s13 + $0x80] sm:$0xff]  ;;  %v4980_v6 = vld [vmem:[%s7440_s13 + $0x78] sm:$0xff] }
 0x646   : > { %v3435_v40 = vadd.f32 %v3432_v43, %v3421_v57  ;;  %v4984_v57 = vld [vmem:[%s7440_s13 + $0x88] sm:$0xff] }
 0x648   : > { %v6805_v60 = vmax.f32 %v3435_v40, 0.0 }
 0x64a   : > { %3440 = vrot.lane.b32.xlu2 %v6805_v60, %s7507_s23  ;;  %3448 = vrot.lane.b32.xlu0 %v6805_v60, %s7509_s5 }
 0x64b   : > { %3516 = vrot.lane.b32.xlu1 %v6805_v60, %s7591_s25 }
 0x652   : > { %3514 = vrot.lane.b32.xlu2 %v6801_v4, %s7591_s25  ;;  %3438 = vrot.lane.b32.xlu0 %v6801_v4, %s7507_s23  ;;  %s5052_s23 = sshll.u32 %s5483_s1, 1 }
 0x653   : > { %3554 = vrot.lane.b32.xlu1 %v6801_v4, %s7558_s2 }
 0x65a   : > { %3630 = vrot.lane.b32.xlu2 %v6805_v60, %s7559_s26  ;;  %3556 = vrot.lane.b32.xlu0 %v6805_v60, %s7558_s2 }
 0x65b   : > { %3670 = vrot.lane.b32.xlu1 %v6805_v60, %s7592_s20 }
 0x662   : > { %3668 = vrot.lane.b32.xlu2 %v6801_v4, %s7592_s20  ;;  %3628 = vrot.lane.b32.xlu0 %v6801_v4, %s7559_s26 }
 0x663   : > { %3708 = vrot.lane.b32.xlu1 %v6801_v4, %s7593_s8 }
 0x66a   : > { %3750 = vrot.lane.b32.xlu2 %v6805_v60, %s7594_s29  ;;  %3710 = vrot.lane.b32.xlu0 %v6805_v60, %s7593_s8 }
 0x66b   : > { %3797 = vperm.xlu1 %5142, %v3789_v3  }
 0x672   : > { %3792 = vperm.xlu2 %5140, %v3788_v32   ;;  %3748 = vrot.lane.b32.xlu0 %v6801_v4, %s7594_s29 }
 0x6a4   : > { %v3441_v41 = vpop.permute.xlu2 %3440 }
 0x6a5   : > { %v3443_v34 = vmul.f32 %v6693_v5, %v3441_v41 }
 0x6a7   : > { %3505 = vmatpush.msrb.mxu2 %v3443_v34 }
 0x6ac   : > { %v3515_v48 = vpop.permute.xlu2 %3514 }
 0x6ad   : > { %v3518_v46 = vmul.f32 %v6725_v19, %v3515_v48 }
 0x6b4   : > { %v3447_v52 = vpop.permute.xlu1 %3446  ;;  %v3631_v15 = vpop.permute.xlu2 %3630 }
 0x6b5   : > { %v3450_v45 = vmul.f32 %v6684_v27, %v3447_v52  ;;  %v3633_v62 = vmul.f32 %v6707_v1, %v3631_v15 }
 0x6bc   : > { %v3449_v0 = vpop.permute.xlu0 %3448  ;;  %v3669_v2 = vpop.permute.xlu2 %3668 }
 0x6bd   : > { %v3451_v22 = vmul.f32 %v6684_v27, %v3449_v0  ;;  %v3517_v24 = vpop.permute.xlu1 %3516  ;;  %v3672_v17 = vmul.f32 %v6753_v35, %v3669_v2 }
 0x6be   : > { %v3519_v13 = vmul.f32 %v6725_v19, %v3517_v24 }
 0x6bf   : > { %3476 = vmatpush.msrb.mxu1 %v3451_v22 }
 0x6c0   : > { %3543 = vmatpush.msra.mxu3 %v3519_v13 }
 0x6c1   : > { %3477 = vmatpush.msrb.mxu1 %v3450_v45 }
 0x6c2   : > { %3544 = vmatpush.msra.mxu3 %v3518_v46  ;;  %4955 = vmatmul.msk.f32.vlgmr.msrb.gmra.mxu1 %vm3455_vm9, %v4953_v51 }
 0x6c3   : > { %3617 = vmatpush.msra.mxu1 %v6805_v60  ;;  %4961 = vmatmul.msk.f32.vlgmr.msra.gmra.mxu3 %vm3455_vm9, %v4959_v63 }
 0x6c4   : > { %v3439_v8 = vpop.permute.xlu0 %3438  ;;  %v3751_v9 = vpop.permute.xlu2 %3750 }
 0x6c5   : > { %3618 = vmatpush.msra.mxu1 %v6801_v4  ;;  %v3442_v56 = vmul.f32 %v6693_v5, %v3439_v8  ;;  %v3555_v21 = vpop.permute.xlu1 %3554  ;;  %v3753_v10 = vmul.f32 %v6773_v7, %v3751_v9 }
 0x6c6   : > { %v3558_v38 = vmul.f32 %v6720_v11, %v3555_v21 }
 0x6c7   : > { %3506 = vmatpush.msrb.mxu2 %v3442_v56  ;;  %3777 = vmatpush.msrb.mxu1 %v3753_v10 }
 0x6c8   : > { %4957 = vmatmul.msk.f32.vlgmr.msrb.gmra.mxu2 %vm3455_vm9, %v3444_v25 }
 0x6c9   : > { %3657 = vmatpush.msra.mxu2 %v3633_v62 }
 0x6ca   : > { %4956 = vmatmul.msk.f32.gmra.mxu1 %vm3455_vm9, %v4954_v20 }
 0x6cb   : > { %4962 = vmatmul.msk.f32.gmra.mxu3 %vm3455_vm9, %v4960_v58 }
 0x6cc   : > { %v3557_v50 = vpop.permute.xlu0 %3556 }
 0x6cd   : > { %v3559_v42 = vmul.f32 %v6720_v11, %v3557_v50  ;;  %v3671_v36 = vpop.permute.xlu1 %3670 }
 0x6ce   : > { %v3673_v33 = vmul.f32 %v6753_v35, %v3671_v36  ;;  %v3793_v36 = vpop.permute.xlu2 %3792 }
 0x6cf   : > { %3583 = vmatpush.msrb.mxu0 %v3559_v42 }
 0x6d0   : > { %3697 = vmatpush.msrb.mxu3 %v3673_v33  ;;  %4958 = vmatmul.msk.f32.gmra.mxu2 %vm3455_vm9, %v3445_v59 }
 0x6d1   : > { %3584 = vmatpush.msrb.mxu0 %v3558_v38 }
 0x6d2   : > { %3698 = vmatpush.msrb.mxu3 %v3672_v17  ;;  %4965 = vmatmul.msk.f32.vlgmr.msrb.gmra.mxu0 %vm3455_vm9, %v4963_v23 }
 0x6d3   : > { %4969 = vmatmul.msk.f32.vlgmr.msra.gmra.mxu1 %vm3455_vm9, %v4967_v26  ;;  %4977 = vmatmul.msk.f32.vlgmr.msrb.gmra.mxu3 %vm3455_vm9, %v4975_v39 }
 0x6d4   : > { %v3629_v55 = vpop.permute.xlu0 %3628 }
 0x6d5   : > { %v3632_v37 = vmul.f32 %v6707_v1, %v3629_v55  ;;  %v3709_v14 = vpop.permute.xlu1 %3708 }
 0x6d6   : > { %v3712_v29 = vmul.f32 %v6748_v28, %v3709_v14 }
 0x6d7   : > { %3658 = vmatpush.msra.mxu2 %v3632_v37 }
 0x6d8   : > { %4973 = vmatmul.msk.f32.vlgmr.msra.gmra.mxu2 %vm3455_vm9, %v4971_v30 }
 0x6da   : > { %4966 = vmatmul.msk.f32.gmra.mxu0 %vm3455_vm9, %v4964_v54  ;;  %v4153_v54 = vld [vmem:[%s7443_s16] sm:$0xff] }
 0x6db   : > { %4970 = vmatmul.msk.f32.gmra.mxu1 %vm3455_vm9, %v4968_v49  ;;  %4978 = vmatmul.msk.f32.gmra.mxu3 %vm3455_vm9, %v4976_v47  ;;  %v4154_v49 = vld [vmem:[%s7443_s16 + $0x8] sm:$0xff] }
 0x6dc   : > { %v3711_v31 = vpop.permute.xlu0 %3710 }
 0x6dd   : > { %v3713_v44 = vmul.f32 %v6748_v28, %v3711_v31  ;;  %v3798_v55 = vpop.permute.xlu1 %3797 }
 0x6df   : > { %3737 = vmatpush.msra.mxu0 %v3713_v44 }
 0x6e0   : > { %4974 = vmatmul.msk.f32.gmra.mxu2 %vm3455_vm9, %v4972_v61 }
 0x6e1   : > { %3738 = vmatpush.msra.mxu0 %v3712_v29 }
 0x6e2   : > { %4981 = vmatmul.msk.f32.vlgmr.msra.gmra.mxu0 %vm3455_vm9, %v4979_v16 }
 0x6e4   : > { %v3749_v53 = vpop.permute.xlu0 %3748 }
 0x6e5   : > { %v3752_v12 = vmul.f32 %v6773_v7, %v3749_v53 }
 0x6e7   : > { %3778 = vmatpush.msrb.mxu1 %v3752_v12 }
 0x6e8   : > { %4985 = vmatmul.msk.f32.vlgmr.msrb.gmra.mxu1 %vm3455_vm9, %v4983_v18 }
 0x6ea   : > { %4982 = vmatmul.msk.f32.gmra.mxu0 %vm3455_vm9, %v4980_v6 }
 0x6f0   : > { %4986 = vmatmul.msk.f32.gmra.mxu1 %vm3455_vm9, %v4984_v57 }
 0x73f   : > { %v3479_v43 = vpop.f32.mrf.mxu1 }
 0x746   : > { %v3546_v40 = vpop.f32.mrf.mxu3 }
 0x747   : > { %v3482_v3 = vpop.f32.mrf.mxu1 }
 0x74b   : > { %v3508_v32 = vpop.f32.mrf.mxu2 }
 0x74c   : > { %v3509_v41 = vadd.f32 %v3508_v32, %v3479_v43  ;;  %v4987_v43 = vld [vmem:[%s7442_s15 + $0x10] sm:$0xff] }
 0x74e   : > { %v3549_v48 = vpop.f32.mrf.mxu3  ;;  %v3552_v52 = vadd.f32 %v3546_v40, %v3509_v41  ;;  %v3810_v41 = vld [vmem:[%s7442_s15] sm:$0xff] }
 0x74f   : > { %v3586_v34 = vpop.f32.mrf.mxu0 }
 0x750   : > { %v3620_v15 = vpop.f32.mrf.mxu1  ;;  %v3592_v2 = vadd.f32 %v3586_v34, %v3552_v52  ;;  %v4994_v52 = vld [vmem:[%s7442_s15 + $0x28] sm:$0xff] }
 0x752   : > { %v3626_v13 = vadd.f32 %v3620_v15, %v3592_v2 }
 0x753   : > { %v3511_v0 = vpop.f32.mrf.mxu2 }
 0x754   : > { %v3512_v22 = vadd.f32 %v3511_v0, %v3482_v3  ;;  %v4993_v3 = vld [vmem:[%s7442_s15 + $0x20] sm:$0xff] }
 0x756   : > { %v3553_v45 = vadd.f32 %v3549_v48, %v3512_v22  ;;  %v3700_v51 = vpop.f32.mrf.mxu3  ;;  %v4988_v48 = vld [vmem:[%s7442_s15 + $0x18] sm:$0xff]  ;;  %v3811_v22 = vld [vmem:[%s7442_s15 + $0x8] sm:$0xff] }
 0x757   : > { %v3589_v24 = vpop.f32.mrf.mxu0 }
 0x758   : > { %v3623_v8 = vpop.f32.mrf.mxu1  ;;  %v3593_v9 = vadd.f32 %v3589_v24, %v3553_v45 }
 0x75a   : > { %v3627_v10 = vadd.f32 %v3623_v8, %v3593_v9  ;;  %v5005_v9 = vld [vmem:[%s7442_s15 + $0x50] sm:$0xff] }
 0x75b   : > { %v3660_v46 = vpop.f32.mrf.mxu2 }
 0x75c   : > { %v3666_v63 = vadd.f32 %v3660_v46, %v3626_v13  ;;  %v5001_v46 = vld [vmem:[%s7442_s15 + $0x40] sm:$0xff] }
 0x75e   : > { %v3706_v21 = vadd.f32 %v3700_v51, %v3666_v63  ;;  %v3703_v58 = vpop.f32.mrf.mxu3  ;;  %v4997_v51 = vld [vmem:[%s7442_s15 + $0x30] sm:$0xff] }
 0x75f   : > { %v3740_v56 = vpop.f32.mrf.mxu0 }
 0x760   : > { %v3746_v62 = vadd.f32 %v3740_v56, %v3706_v21  ;;  %v5009_v21 = vld [vmem:[%s7442_s15 + $0x60] sm:$0xff] }
 0x763   : > { %v3663_v25 = vpop.f32.mrf.mxu2 }
 0x764   : > { %v3667_v20 = vadd.f32 %v3663_v25, %v3627_v10  ;;  %v5002_v10 = vld [vmem:[%s7442_s15 + $0x48] sm:$0xff] }
 0x765   : > { %v3780_v50 = vpop.f32.mrf.mxu1 }
 0x766   : > { %v3786_v42 = vadd.f32 %v3780_v50, %v3746_v62  ;;  %v3707_v59 = vadd.f32 %v3703_v58, %v3667_v20  ;;  %v5006_v62 = vld [vmem:[%s7442_s15 + $0x58] sm:$0xff]  ;;  %v5010_v20 = vld [vmem:[%s7442_s15 + $0x68] sm:$0xff]  ;;  %v5017_v58 = vld [vmem:[%s7442_s15 + $0x80] sm:$0xff] }
 0x767   : > { %v3743_v38 = vpop.f32.mrf.mxu0 }
 0x768   : > { %v3800_v33 = vadd.f32 %v3793_v36, %v3786_v42  ;;  %v3747_v17 = vadd.f32 %v3743_v38, %v3707_v59  ;;  %v5013_v42 = vld [vmem:[%s7442_s15 + $0x70] sm:$0xff]  ;;  %v5018_v36 = vld [vmem:[%s7442_s15 + $0x88] sm:$0xff]  ;;  %v5014_v59 = vld [vmem:[%s7442_s15 + $0x78] sm:$0xff] }
 0x76a   : > { %v3802_v23 = vmax.f32 %v3800_v33, 0.0 }
 0x76c   : > { %3812 = vrot.lane.b32.xlu1 %v3802_v23, %s7595_s6 }
 0x76d   : > { %v3783_v26 = vpop.f32.mrf.mxu1 }
 0x76e   : > { %v3787_v39 = vadd.f32 %v3783_v26, %v3747_v17 }
 0x770   : > { %v3801_v37 = vadd.f32 %v3798_v55, %v3787_v39 }
 0x772   : > { %v3803_v30 = vmax.f32 %v3801_v37, 0.0 }
 0x774   : > { %3806 = vrot.lane.b32.xlu2 %v3803_v30, %s7596_s10  ;;  %3814 = vrot.lane.b32.xlu0 %v3803_v30, %s7595_s6 }
 0x775   : > { %3881 = vrot.lane.b32.xlu1 %v3803_v30, %s7591_s25 }
 0x77c   : > { %3879 = vrot.lane.b32.xlu2 %v3802_v23, %s7591_s25  ;;  %3804 = vrot.lane.b32.xlu0 %v3802_v23, %s7596_s10  ;;  %s4739_s10 = scalar_lea.hbm %s7446_s19, %s5052_s23 }
 0x77d   : > { %3919 = vrot.lane.b32.xlu1 %v3802_v23, %s7558_s2  ;;  %s4743_s9 = sshll.u32 %s4739_s10, 4  ;;  %s4744_s9 = int_to_ptr.hbm [resolvable:$true] %s4743_s9 }
 0x77e   : > { %s5266_s7 = sshra.s32 %s4744_s9, 4  ;;  %s5267_s7 = int_to_ptr.hbm [resolvable:$true] %s5266_s7 }
 0x77f   : > { %s5268_s25 = scalar_lea.hbm %s5267_s7, 2  ;;  %p5273_p0 = scmp.lt.s32.totalorder %s5267_s7, %s7446_s19 }
 0x780   : > { %p5269_p11 = scmp.ne.s32.totalorder %s5267_s7, %s5268_s25 }
 0x782   : > { %p5270_p12 = pnand %p5269_p11, %p5500_p5 }
 0x784   : > { %3995 = vrot.lane.b32.xlu2 %v3803_v30, %s7559_s26  ;;  %3921 = vrot.lane.b32.xlu0 %v3803_v30, %s7558_s2  ;;  %p5271_p13 = pneg %p5270_p12 }
 0x785   : > { %4115 = vrot.lane.b32.xlu1 %v3803_v30, %s7594_s29 }
 0x78c   : > { %4035 = vrot.lane.b32.xlu2 %v3803_v30, %s7592_s20  ;;  %3993 = vrot.lane.b32.xlu0 %v3802_v23, %s7559_s26 }
 0x78d   : > { %4033 = vrot.lane.b32.xlu1 %v3802_v23, %s7592_s20  ;;  %s5272_s20 = scalar_lea.hbm %s7446_s19, 8 }
 0x78e   : > { %p5274_p1 = scmp.lt.s32.totalorder %s5272_s20, %s5268_s25 }
 0x790   : > { %p5275_p2 = por %p5274_p1, %p5273_p0 }
 0x792   : > { %p5276_p3 = pnand %p5275_p2, %p5271_p13 }
 0x794   : > { %4075 = vrot.lane.b32.xlu2 %v3803_v30, %s7593_s8  ;;  %4113 = vrot.lane.b32.xlu0 %v3802_v23, %s7594_s29  ;;  %s591_s29 = sand.u32 1, %s5306_s30  }
 0x795   : > { %4157 = vperm.xlu1 %5142, %v4153_v54   ;;  %s4807_s27 = sshll.u32 %s591_s29, 1  ;;  %s4729_s1 = scalar_lea.sflag [#allocation3], %s591_s29 }
 0x796   : > { %s7386_s5 = scalar_lea.vmem [#allocation2], %s4807_s27 }
 0x79c   : > { %4162 = vperm.xlu2 %5140, %v4154_v49   ;;  %4073 = vrot.lane.b32.xlu0 %v3802_v23, %s7593_s8 }
 0x7ce   : > { %v3807_v47 = vpop.permute.xlu2 %3806 }
 0x7cf   : > { %v3809_v14 = vmul.f32 %v6693_v5, %v3807_v47 }
 0x7d1   : > { %3870 = vmatpush.msra.mxu3 %v3809_v14 }
 0x7d6   : > { %v3880_v31 = vpop.permute.xlu2 %3879 }
 0x7d7   : > { %v3883_v57 = vmul.f32 %v6725_v19, %v3880_v31 }
 0x7de   : > { %v3813_v44 = vpop.permute.xlu1 %3812  ;;  %v3996_v61 = vpop.permute.xlu2 %3995 }
 0x7df   : > { %v3816_v6 = vmul.f32 %v6684_v27, %v3813_v44  ;;  %v3998_v34 = vmul.f32 %v6707_v1, %v3996_v61 }
 0x7e6   : > { %v3815_v29 = vpop.permute.xlu0 %3814  ;;  %v4036_v18 = vpop.permute.xlu2 %4035 }
 0x7e7   : > { %v3817_v16 = vmul.f32 %v6684_v27, %v3815_v29  ;;  %v3882_v53 = vpop.permute.xlu1 %3881  ;;  %v4038_v40 = vmul.f32 %v6753_v35, %v4036_v18 }
 0x7e8   : > { %v3884_v12 = vmul.f32 %v6725_v19, %v3882_v53 }
 0x7e9   : > { %3841 = vmatpush.msrb.mxu2 %v3817_v16 }
 0x7ea   : > { %3908 = vmatpush.msrb.mxu0 %v3884_v12 }
 0x7eb   : > { %3842 = vmatpush.msrb.mxu2 %v3816_v6 }
 0x7ec   : > { %3909 = vmatpush.msrb.mxu0 %v3883_v57  ;;  %4989 = vmatmul.msk.f32.vlgmr.msrb.gmra.mxu2 %vm3455_vm9, %v4987_v43 }
 0x7ed   : > { %3982 = vmatpush.msra.mxu2 %v3803_v30  ;;  %4995 = vmatmul.msk.f32.vlgmr.msrb.gmra.mxu0 %vm3455_vm9, %v4993_v3 }
 0x7ee   : > { %4062 = vmatpush.msra.mxu0 %v4038_v40  ;;  %v3805_v27 = vpop.permute.xlu0 %3804  ;;  %v4076_v15 = vpop.permute.xlu2 %4075 }
 0x7ef   : > { %3983 = vmatpush.msra.mxu2 %v3802_v23  ;;  %v3808_v19 = vmul.f32 %v6693_v5, %v3805_v27  ;;  %v3920_v32 = vpop.permute.xlu1 %3919  ;;  %v4078_v45 = vmul.f32 %v6748_v28, %v4076_v15 }
 0x7f0   : > { %v3923_v13 = vmul.f32 %v6720_v11, %v3920_v32 }
 0x7f1   : > { %3871 = vmatpush.msra.mxu3 %v3808_v19 }
 0x7f2   : > { %4991 = vmatmul.msk.f32.vlgmr.msra.gmra.mxu3 %vm3455_vm9, %v3810_v41 }
 0x7f3   : > { %4022 = vmatpush.msrb.mxu3 %v3998_v34 }
 0x7f4   : > { %4990 = vmatmul.msk.f32.gmra.mxu2 %vm3455_vm9, %v4988_v48 }
 0x7f5   : > { %4996 = vmatmul.msk.f32.gmra.mxu0 %vm3455_vm9, %v4994_v52 }
 0x7f6   : > { %v3922_v5 = vpop.permute.xlu0 %3921 }
 0x7f7   : > { %v3924_v0 = vmul.f32 %v6720_v11, %v3922_v5  ;;  %v4116_v2 = vpop.permute.xlu1 %4115 }
 0x7f8   : > { %v4118_v24 = vmul.f32 %v6773_v7, %v4116_v2 }
 0x7f9   : > { %3948 = vmatpush.msra.mxu1 %v3924_v0  ;;  %v4163_v0 = vpop.permute.xlu2 %4162 }
 0x7fa   : > { %4142 = vmatpush.msrb.mxu2 %v4118_v24  ;;  %4992 = vmatmul.msk.f32.gmra.mxu3 %vm3455_vm9, %v3811_v22 }
 0x7fb   : > { %3949 = vmatpush.msra.mxu1 %v3923_v13 }
 0x7fc   : > { %5003 = vmatmul.msk.f32.vlgmr.msra.gmra.mxu2 %vm3455_vm9, %v5001_v46  ;;  %4999 = vmatmul.msk.f32.vlgmr.msra.gmra.mxu1 %vm3455_vm9, %v4997_v51  ;;  %v4198_v51 = vld [vmem:[%s7431_s4 + $0x78] sm:$0xff] }
 0x7fd   : > { %4102 = vmatpush.msrb.mxu1 %v4078_v45 }
 0x7fe   : > { %v3994_v11 = vpop.permute.xlu0 %3993 }
 0x7ff   : > { %v3997_v63 = vmul.f32 %v6707_v1, %v3994_v11  ;;  %v4034_v8 = vpop.permute.xlu1 %4033  ;;  %v4998_v1 = vld [vmem:[%s7442_s15 + $0x38] sm:$0xff]  ;;  %v4197_v11 = vld [vmem:[%s7431_s4 + $0x70] sm:$0xff] }
 0x800   : > { %v4037_v56 = vmul.f32 %v6753_v35, %v4034_v8  ;;  %v4193_v8 = vld [vmem:[%s7431_s4 + $0x50] sm:$0xff] }
 0x801   : > { %4023 = vmatpush.msrb.mxu3 %v3997_v63  ;;  %v4194_v63 = vld [vmem:[%s7431_s4 + $0x58] sm:$0xff] }
 0x802   : > { %4063 = vmatpush.msra.mxu0 %v4037_v56  ;;  %5007 = vmatmul.msk.f32.vlgmr.msrb.gmra.mxu3 %vm3455_vm9, %v5005_v9  ;;  %v4192_v9 = vld [vmem:[%s7431_s4 + $0x48] sm:$0xff]  ;;  %v4191_v56 = vld [vmem:[%s7431_s4 + $0x40] sm:$0xff] }
 0x803   : > { %5011 = vmatmul.msk.f32.vlgmr.msra.gmra.mxu0 %vm3455_vm9, %v5009_v21  ;;  %4199 = vmatpush.msra.mxu3 %v4198_v51  ;;  %v4190_v21 = vld [vmem:[%s7431_s4 + $0x38] sm:$0xff]  ;;  %v7173_v51 = vld [vmem:[%s7444_s17 + $0x10] sm:$0xff] }
 0x804   : > { %5004 = vmatmul.msk.f32.gmra.mxu2 %vm3455_vm9, %v5002_v10  ;;  %5000 = vmatmul.msk.f32.gmra.mxu1 %vm3455_vm9, %v4998_v1  ;;  %v4189_v10 = vld [vmem:[%s7431_s4 + $0x30] sm:$0xff]  ;;  %v4188_v1 = vld [vmem:[%s7431_s4 + $0x28] sm:$0xff] }
 0x805   : > { %4200 = vmatpush.msra.mxu3 %v4197_v11  ;;  %v7182_v11 = vld [vmem:[%s7444_s17 + $0x20] sm:$0xff] }
 0x806   : > { %v4114_v35 = vpop.permute.xlu0 %4113 }
 0x807   : > { %v4117_v25 = vmul.f32 %v6773_v7, %v4114_v35  ;;  %v4158_v41 = vpop.permute.xlu1 %4157  ;;  %v4187_v35 = vld [vmem:[%s7431_s4 + $0x20] sm:$0xff] }
 0x809   : > { %4143 = vmatpush.msrb.mxu2 %v4117_v25  ;;  %v4186_v25 = vld [vmem:[%s7431_s4 + $0x18] sm:$0xff] }
 0x80a   : > { %5008 = vmatmul.msk.f32.gmra.mxu3 %vm3455_vm9, %v5006_v62  ;;  %v4185_v62 = vld [vmem:[%s7431_s4 + $0x10] sm:$0xff] }
 0x80b   : > { %5012 = vmatmul.msk.f32.gmra.mxu0 %vm3455_vm9, %v5010_v20 }
 0x80c   : > { %5019 = vmatmul.msk.f32.vlgmr.msrb.gmra.mxu2 %vm3455_vm9, %v5017_v58 }
 0x80e   : > { %v4074_v7 = vpop.permute.xlu0 %4073 }
 0x80f   : > { %v4077_v50 = vmul.f32 %v6748_v28, %v4074_v7 }
 0x811   : > { %4103 = vmatpush.msrb.mxu1 %v4077_v50 }
 0x812   : > { %5015 = vmatmul.msk.f32.vlgmr.msrb.gmra.mxu1 %vm3455_vm9, %v5013_v42 }
 0x814   : > { %5020 = vmatmul.msk.f32.gmra.mxu2 %vm3455_vm9, %v5018_v36 }
 0x81a   : > { %5016 = vmatmul.msk.f32.gmra.mxu1 %vm3455_vm9, %v5014_v59  ;;  %v4184_v59 = vld [vmem:[%s7431_s4 + $0x8] sm:$0xff] }
 0x86a   : > { %v3911_v38 = vpop.f32.mrf.mxu0 }
 0x86f   : > { %v3844_v28 = vpop.f32.mrf.mxu2 }
 0x872   : > { %v3914_v55 = vpop.f32.mrf.mxu0 }
 0x875   : > { %v3873_v33 = vpop.f32.mrf.mxu3 }
 0x876   : > { %v3874_v39 = vadd.f32 %v3873_v33, %v3844_v28  ;;  %v4183_v28 = vld [vmem:[%s7431_s4] sm:$0xff]  ;;  %v5331_v33 = vmov 2  }
 0x877   : > { %v3847_v23 = vpop.f32.mrf.mxu2  ;;  %5174 = vset.pattern.permute.xlu0 %v5331_v33 }
 0x878   : > { %v3917_v30 = vadd.f32 %v3911_v38, %v3874_v39  ;;  %v5332_v38 = vmov 1  }
 0x879   : > { %v3951_v26 = vpop.f32.mrf.mxu1  ;;  %5173 = vset.pattern.permute.xlu1 %v5332_v38 }
 0x87a   : > { %v3957_v47 = vadd.f32 %v3951_v26, %v3917_v30  ;;  %v5333_v30 = vmov 7  }
 0x87d   : > { %v3876_v17 = vpop.f32.mrf.mxu3 }
 0x87e   : > { %v3877_v49 = vadd.f32 %v3876_v17, %v3847_v23 }
 0x87f   : > { %v3985_v37 = vpop.f32.mrf.mxu2 }
 0x880   : > { %v3991_v31 = vadd.f32 %v3985_v37, %v3957_v47  ;;  %v4065_v61 = vpop.f32.mrf.mxu0  ;;  %v3918_v29 = vadd.f32 %v3914_v55, %v3877_v49  ;;  %v5335_v49 = vmov 3   ;;  %v5336_v47 = vmov 12  }
 0x881   : > { %v3954_v14 = vpop.f32.mrf.mxu1 }
 0x882   : > { %v3958_v53 = vadd.f32 %v3954_v14, %v3918_v29  ;;  %v5337_v14 = vmov 6   ;;  %v5341_v29 = vmov 8  }
 0x885   : > { %v4025_v54 = vpop.f32.mrf.mxu3 }
 0x886   : > { %v4031_v16 = vadd.f32 %v4025_v54, %v3991_v31  ;;  %v5334_v54 = vmov 5   ;;  %v5338_v31 = vmov 4  }
 0x887   : > { %v3988_v44 = vpop.f32.mrf.mxu2 }
 0x888   : > { %v4071_v12 = vadd.f32 %v4065_v61, %v4031_v16  ;;  %v3992_v57 = vadd.f32 %v3988_v44, %v3958_v53  ;;  %v4068_v27 = vpop.f32.mrf.mxu0  ;;  %v5339_v44 = vmov 16   ;;  %v5340_v61 = vmov 10  }
 0x889   : > { %v5342_v16 = vmov 17   ;;  %v5343_v53 = vmov 11  }
 0x88d   : > { %v4028_v18 = vpop.f32.mrf.mxu3 }
 0x88e   : > { %v4032_v3 = vadd.f32 %v4028_v18, %v3992_v57  ;;  %v5345_v18 = vmov 19   ;;  %v5347_v57 = vmov 13  }
 0x88f   : > { %v4105_v6 = vpop.f32.mrf.mxu1  ;;  %v4145_v40 = vpop.f32.mrf.mxu2 }
 0x890   : > { %v4111_v43 = vadd.f32 %v4105_v6, %v4071_v12  ;;  %v4072_v32 = vadd.f32 %v4068_v27, %v4032_v3  ;;  %v5344_v12 = vmov 9   ;;  %v5346_v6 = vmov 15  }
 0x891   : > { %v5350_v3 = vmov 14   ;;  %v5351_v27 = vmov 29  }
 0x892   : > { %v4151_v19 = vadd.f32 %v4145_v40, %v4111_v43  ;;  %v5348_v43 = vmov 24   ;;  %v5349_v40 = vmov 18  }
 0x894   : > { %v4165_v48 = vadd.f32 %v4158_v41, %v4151_v19  ;;  %v5352_v19 = vmov 20   ;;  %v7597_v41 = vmov 0  }
 0x896   : > { %v4167_v2 = vadd.f32 %v4165_v48, %v6801_v4  ;;  %v4196_v4 = vld [vmem:[%s7431_s4 + $0x68] sm:$0xff]  ;;  %v5355_v48 = vmov 23  }
 0x897   : > { %v4108_v34 = vpop.f32.mrf.mxu1  ;;  %v4148_v5 = vpop.f32.mrf.mxu2  ;;  %4201 = vmatpush.msra.mxu3 %v4196_v4 }
 0x898   : > { %v4112_v52 = vadd.f32 %v4108_v34, %v4072_v32  ;;  %v4169_v13 = vmax.f32 %v4167_v2, 0.0  ;;  %v5353_v32 = vmov 22   ;;  %v5354_v34 = vmov 21  }
 0x899   : > { %v5358_v2 = vmov 26  }
 0x89a   : > { %v4152_v15 = vadd.f32 %v4148_v5, %v4112_v52  ;;  %v5356_v5 = vmov 25  }
 0x89c   : > { %v4166_v22 = vadd.f32 %v4163_v0, %v4152_v15  ;;  %v5357_v15 = vmov 27  }
 0x89e   : > { %v4168_v24 = vadd.f32 %v4166_v22, %v6805_v60  ;;  %v4195_v60 = vld [vmem:[%s7431_s4 + $0x60] sm:$0xff]  ;;  %v5359_v22 = vmov 28  }
 0x89f   : > { %4202 = vmatpush.msra.mxu3 %v4195_v60 }
 0x8a0   : > { %v4170_v45 = vmax.f32 %v4168_v24, 0.0 }
 0x8a1   : > { %4203 = vmatpush.msra.mxu3 %v4194_v63 }
 0x8a2   : > { %v5163_v46 = vpack.i.bf16 %v4170_v45, %v4169_v13 }
 0x8a3   : > { %4204 = vmatpush.msra.mxu3 %v4193_v8 }
 0x8a4   : > { %5164 = vrot.lane.b32.xlu0 %v5163_v46, %s7559_s26  ;;  %v7167_v46 = vld [vmem:[%s7444_s17] sm:$0xff]  ;;  %s4741_s26 = sshll.u32 %s7386_s5, 4  ;;  %s4742_s26 = int_to_ptr.vmem [resolvable:$true] %s4741_s26 }
 0x8a5   : > { %4205 = vmatpush.msra.mxu3 %v4192_v9  ;;  %v7190_v9 = vld [vmem:[%s7444_s17 + $0x30] sm:$0xff] }
 0x8a7   : > { %4206 = vmatpush.msra.mxu3 %v4191_v56 }
 0x8a9   : > { %4207 = vmatpush.msra.mxu3 %v4190_v21 }
 0x8ab   : > { %4208 = vmatpush.msra.mxu3 %v4189_v10  ;;  %v7196_v10 = vld [vmem:[%s7444_s17 + $0x40] sm:$0xff] }
 0x8ad   : > { %4209 = vmatpush.msra.mxu3 %v4188_v1 }
 0x8af   : > { %4210 = vmatpush.msra.mxu3 %v4187_v35 }
 0x8b1   : > { %4211 = vmatpush.msra.mxu3 %v4186_v25 }
 0x8b3   : > { %4212 = vmatpush.msra.mxu3 %v4185_v62 }
 0x8b5   : > { %4213 = vmatpush.msra.mxu3 %v4184_v59 }
 0x8b7   : > { %4214 = vmatpush.msra.mxu3 %v4183_v28 }
 0x916   : > { %v5165_v20 = vpop.permute.xlu0 %5164 }
 0x917   : > { %v5167_v58 = vunpack.i.h.bf16 %v5165_v20  ;;  %v5166_v7 = vunpack.i.l.bf16 %v5165_v20 }
 0x919   : > { %v4176_v50 = vmax.f32 %v4170_v45, %v5167_v58  ;;  %v4175_v42 = vmax.f32 %v4169_v13, %v5166_v7  ;;  %v5360_v13 = vmov 30   ;;  %v7205_v58 = vld [vmem:[%s7444_s17 + $0x50] sm:$0xff] }
 0x91b   : > { %v5168_v36 = vpack.i.bf16 %v4176_v50, %v4175_v42 }
 0x91d   : > { %5169 = vrot.lane.b32.xlu1 %v5168_v36, %s7593_s8 }
 0x98f   : > { %v5170_v23 = vpop.permute.xlu1 %5169 }
 0x990   : > { %v5171_v17 = vunpack.i.l.bf16 %v5170_v23  ;;  %v5172_v39 = vunpack.i.h.bf16 %v5170_v23 }
 0x992   : > { %v4181_v26 = vmax.f32 %v4175_v42, %v5171_v17  ;;  %v4182_v55 = vmax.f32 %v4176_v50, %v5172_v39  ;;  %v7229_v39 = vld [vmem:[%s7444_s17 + $0x80] sm:$0xff] }
 0x994   : > { %4215 = vmatmul.f32.vlgmr.msra.gmra.mxu3 %v4181_v26 }
 0x99c   : > { %4218 = vmatmul.f32.gmra.mxu3 %v4182_v55 }
 0xa17   : > { %v7097_v37 = vpop.f32.mrf.mxu3 }
 0xa18   : > { %4257 = vperm.xlu0 %5174, %v7097_v37   ;;  %4242 = vperm.xlu1 %5173, %v7097_v37  }
 0xa19   : > { %4226 = vperm.xlu2 %5140, %v7097_v37  }
 0xa1f   : > { %v7144_v52 = vpop.f32.mrf.mxu3 }
 0xa20   : > { %5179 = vset.pattern.permute.xlu0 %v5333_v30  ;;  %5177 = vset.pattern.permute.xlu1 %v5334_v54 }
 0xa21   : > { %5175 = vset.pattern.permute.xlu2 %v5335_v49  ;;  %4332 = vperm.xlu0 %5179, %v7097_v37  }
 0xa22   : > { %4302 = vperm.xlu1 %5177, %v7097_v37   ;;  %4272 = vperm.xlu2 %5175, %v7097_v37  }
 0xa29   : > { %5184 = vset.pattern.permute.xlu0 %v5336_v47 }
 0xa2a   : > { %5178 = vset.pattern.permute.xlu1 %v5337_v14  ;;  %5176 = vset.pattern.permute.xlu2 %v5338_v31 }
 0xa2b   : > { %4407 = vperm.xlu0 %5184, %v7097_v37   ;;  %4317 = vperm.xlu1 %5178, %v7097_v37  }
 0xa2c   : > { %4287 = vperm.xlu2 %5176, %v7097_v37  }
 0xa33   : > { %5188 = vset.pattern.permute.xlu0 %v5339_v44  ;;  %5182 = vset.pattern.permute.xlu1 %v5340_v61 }
 0xa34   : > { %5180 = vset.pattern.permute.xlu2 %v5341_v29  ;;  %4501 = vperm.xlu0 %5188, %v7097_v37  }
 0xa35   : > { %4377 = vperm.xlu1 %5182, %v7097_v37   ;;  %4347 = vperm.xlu2 %5180, %v7097_v37  }
 0xa3c   : > { %5189 = vset.pattern.permute.xlu0 %v5342_v16 }
 0xa3d   : > { %5183 = vset.pattern.permute.xlu1 %v5343_v53  ;;  %5181 = vset.pattern.permute.xlu2 %v5344_v12 }
 0xa3e   : > { %4513 = vperm.xlu0 %5189, %v7097_v37   ;;  %4392 = vperm.xlu1 %5183, %v7097_v37  }
 0xa3f   : > { %4362 = vperm.xlu2 %5181, %v7097_v37  }
 0xa46   : > { %5191 = vset.pattern.permute.xlu0 %v5345_v18  ;;  %5187 = vset.pattern.permute.xlu1 %v5346_v6 }
 0xa47   : > { %5185 = vset.pattern.permute.xlu2 %v5347_v57  ;;  %4537 = vperm.xlu0 %5191, %v7097_v37  }
 0xa48   : > { %4452 = vperm.xlu1 %5187, %v7097_v37   ;;  %4422 = vperm.xlu2 %5185, %v7097_v37  }
 0xa4f   : > { %5196 = vset.pattern.permute.xlu0 %v5348_v43 }
 0xa50   : > { %5190 = vset.pattern.permute.xlu1 %v5349_v40  ;;  %5186 = vset.pattern.permute.xlu2 %v5350_v3 }
 0xa51   : > { %4597 = vperm.xlu0 %5196, %v7097_v37   ;;  %4525 = vperm.xlu1 %5190, %v7097_v37  }
 0xa52   : > { %4437 = vperm.xlu2 %5186, %v7097_v37  }
 0xa59   : > { %5201 = vset.pattern.permute.xlu0 %v5351_v27  ;;  %5192 = vset.pattern.permute.xlu1 %v5352_v19 }
 0xa5a   : > { %5194 = vset.pattern.permute.xlu2 %v5353_v32  ;;  %4657 = vperm.xlu0 %5201, %v7097_v37  }
 0xa5b   : > { %4549 = vperm.xlu1 %5192, %v7097_v37   ;;  %4573 = vperm.xlu2 %5194, %v7097_v37  }
 0xa62   : > { %5203 = vset.pattern.permute.xlu0 %v7597_v41 }
 0xa63   : > { %5193 = vset.pattern.permute.xlu1 %v5354_v34  ;;  %5195 = vset.pattern.permute.xlu2 %v5355_v48 }
 0xa64   : > { %4561 = vperm.xlu1 %5193, %v7097_v37   ;;  %4585 = vperm.xlu2 %5195, %v7097_v37  }
 0xa65   : > { %4231 = vperm.xlu0 %5203, %v7144_v52  }
 0xa6c   : > { %5197 = vset.pattern.permute.xlu1 %v5356_v5  ;;  %5199 = vset.pattern.permute.xlu2 %v5357_v15 }
 0xa6d   : > { %5207 = vset.pattern.permute.xlu0 %v5338_v31  ;;  %4609 = vperm.xlu1 %5197, %v7097_v37  }
 0xa6e   : > { %4633 = vperm.xlu2 %5199, %v7097_v37   ;;  %4291 = vperm.xlu0 %5207, %v7144_v52  }
 0xa73   : > { %v4227_v0 = vpop.permute.xlu2 %4226 }
 0xa74   : > { %v4234_v63 = vmul.f32 %v4227_v0, %v7167_v46 }
 0xa75   : > { %5198 = vset.pattern.permute.xlu1 %v5358_v2 }
 0xa76   : > { %5200 = vset.pattern.permute.xlu2 %v5359_v22  ;;  %5212 = vset.pattern.permute.xlu0 %v5344_v12  ;;  %v7244_v12 = vld [vmem:[%s7444_s17 + $0xa0] sm:$0xff] }
 0xa77   : > { %4621 = vperm.xlu1 %5198, %v7097_v37   ;;  %4645 = vperm.xlu2 %5200, %v7097_v37  }
 0xa78   : > { %4366 = vperm.xlu0 %5212, %v7144_v52  }
 0xa7c   : > { %v4273_v24 = vpop.permute.xlu2 %4272 }
 0xa7d   : > { %v4279_v1 = vmul.f32 %v7190_v9, %v4273_v24  ;;  %v5361_v24 = vmov 31  }
 0xa7f   : > { %5202 = vset.pattern.permute.xlu1 %v5360_v13  ;;  %5204 = vset.pattern.permute.xlu2 %v5332_v38  ;;  %v7221_v38 = vld [vmem:[%s7444_s17 + $0x70] sm:$0xff] }
 0xa80   : > { %5217 = vset.pattern.permute.xlu0 %v5350_v3  ;;  %4669 = vperm.xlu1 %5202, %v7097_v37  }
 0xa81   : > { %4246 = vperm.xlu2 %5204, %v7144_v52   ;;  %4441 = vperm.xlu0 %5217, %v7144_v52  }
 0xa86   : > { %v4288_v45 = vpop.permute.xlu2 %4287 }
 0xa87   : > { %v4294_v62 = vmul.f32 %v7196_v10, %v4288_v45  ;;  %v5043_v45 = vld [vmem:[%s7444_s17 + $0xc0] sm:$0xff] }
 0xa88   : > { %5205 = vset.pattern.permute.xlu1 %v5331_v33  ;;  %v5031_v33 = vld [vmem:[%s7444_s17 + $0x60] sm:$0xff] }
 0xa89   : > { %5208 = vset.pattern.permute.xlu2 %v5334_v54  ;;  %5219 = vset.pattern.permute.xlu0 %v5339_v44  ;;  %v7235_v54 = vld [vmem:[%s7444_s17 + $0x90] sm:$0xff] }
 0xa8a   : > { %4261 = vperm.xlu1 %5205, %v7144_v52   ;;  %4306 = vperm.xlu2 %5208, %v7144_v52   ;;  %v4258_v4 = vpop.permute.xlu0 %4257  ;;  %v4243_v60 = vpop.permute.xlu1 %4242 }
 0xa8b   : > { %4505 = vperm.xlu0 %5219, %v7144_v52   ;;  %v4249_v8 = vmul.f32 %v7173_v51, %v4243_v60  ;;  %v4264_v56 = vmul.f32 %v7182_v11, %v4258_v4 }
 0xa8d   : > { %v4251_v21 = vadd.f32 %v4249_v8, %v4234_v63 }
 0xa8f   : > { %v4266_v35 = vadd.f32 %v4264_v56, %v4251_v21  ;;  %v4348_v25 = vpop.permute.xlu2 %4347  ;;  %v7271_v21 = vld [vmem:[%s7444_s17 + $0xe0] sm:$0xff] }
 0xa91   : > { %v4281_v20 = vadd.f32 %v4279_v1, %v4266_v35 }
 0xa92   : > { %5206 = vset.pattern.permute.xlu1 %v5335_v49  ;;  %5209 = vset.pattern.permute.xlu2 %v5337_v14  ;;  %v4354_v49 = vmul.f32 %v7229_v39, %v4348_v25 }
 0xa93   : > { %5221 = vset.pattern.permute.xlu0 %v5349_v40  ;;  %4276 = vperm.xlu1 %5206, %v7144_v52   ;;  %v4333_v7 = vpop.permute.xlu0 %4332  ;;  %v4296_v50 = vadd.f32 %v4294_v62, %v4281_v20 }
 0xa94   : > { %4321 = vperm.xlu2 %5209, %v7144_v52   ;;  %4529 = vperm.xlu0 %5221, %v7144_v52   ;;  %v4303_v42 = vpop.permute.xlu1 %4302  ;;  %v4339_v55 = vmul.f32 %v7221_v38, %v4333_v7  ;;  %v7279_v7 = vld [vmem:[%s7444_s17 + $0xf0] sm:$0xff] }
 0xa95   : > { %v4309_v36 = vmul.f32 %v7205_v58, %v4303_v42 }
 0xa97   : > { %v4311_v59 = vadd.f32 %v4309_v36, %v4296_v50 }
 0xa99   : > { %v4363_v28 = vpop.permute.xlu2 %4362 }
 0xa9a   : > { %v4369_v44 = vmul.f32 %v7235_v54, %v4363_v28 }
 0xa9b   : > { %5210 = vset.pattern.permute.xlu1 %v5333_v30 }
 0xa9c   : > { %5213 = vset.pattern.permute.xlu2 %v5340_v61  ;;  %5224 = vset.pattern.permute.xlu0 %v5354_v34 }
 0xa9d   : > { %4336 = vperm.xlu1 %5210, %v7144_v52   ;;  %4381 = vperm.xlu2 %5213, %v7144_v52   ;;  %v4408_v23 = vpop.permute.xlu0 %4407  ;;  %v4318_v17 = vpop.permute.xlu1 %4317 }
 0xa9e   : > { %4565 = vperm.xlu0 %5224, %v7144_v52   ;;  %v4324_v26 = vmul.f32 %v5031_v33, %v4318_v17  ;;  %v4414_v63 = vmul.f32 %v5043_v45, %v4408_v23 }
 0xaa0   : > { %v4326_v30 = vadd.f32 %v4324_v26, %v4311_v59 }
 0xaa2   : > { %v4341_v14 = vadd.f32 %v4339_v55, %v4326_v30  ;;  %v4423_v31 = vpop.permute.xlu2 %4422 }
 0xaa4   : > { %v4356_v61 = vadd.f32 %v4354_v49, %v4341_v14 }
 0xaa5   : > { %5211 = vset.pattern.permute.xlu1 %v5341_v29  ;;  %5214 = vset.pattern.permute.xlu2 %v5343_v53 }
 0xaa6   : > { %5229 = vset.pattern.permute.xlu0 %v5358_v2  ;;  %4351 = vperm.xlu1 %5211, %v7144_v52   ;;  %v4502_v40 = vpop.permute.xlu0 %4501  ;;  %v4371_v3 = vadd.f32 %v4369_v44, %v4356_v61  ;;  %v5041_v2 = vld [vmem:[%s7444_s17 + $0xb0] sm:$0xff] }
 0xaa7   : > { %4396 = vperm.xlu2 %5214, %v7144_v52   ;;  %4625 = vperm.xlu0 %5229, %v7144_v52   ;;  %v4508_v41 = vmul.f32 %v4502_v40, %v7167_v46  ;;  %v4378_v29 = vpop.permute.xlu1 %4377 }
 0xaa8   : > { %v4384_v53 = vmul.f32 %v7244_v12, %v4378_v29 }
 0xaaa   : > { %v4386_v34 = vadd.f32 %v4384_v53, %v4371_v3 }
 0xaac   : > { %v4438_v0 = vpop.permute.xlu2 %4437 }
 0xaad   : > { %v4444_v20 = vmul.f32 %v7271_v21, %v4438_v0 }
 0xaae   : > { %5215 = vset.pattern.permute.xlu1 %v5336_v47 }
 0xaaf   : > { %5218 = vset.pattern.permute.xlu2 %v5346_v6  ;;  %5235 = vset.pattern.permute.xlu0 %v5361_v24  ;;  %v5045_v6 = vld [vmem:[%s7444_s17 + $0xd0] sm:$0xff] }
 0xab0   : > { %4411 = vperm.xlu1 %5215, %v7144_v52   ;;  %4456 = vperm.xlu2 %5218, %v7144_v52   ;;  %v4514_v46 = vpop.permute.xlu0 %4513  ;;  %v4393_v4 = vpop.permute.xlu1 %4392  ;;  %v4429_v1 = vmul.f32 %v5045_v6, %v4423_v31 }
 0xab1   : > { %4685 = vperm.xlu0 %5235, %v7144_v52   ;;  %v4520_v47 = vmul.f32 %v7173_v51, %v4514_v46  ;;  %v4399_v60 = vmul.f32 %v5041_v2, %v4393_v4 }
 0xab3   : > { %v4522_v8 = vadd.f32 %v4520_v47, %v4508_v41  ;;  %v4401_v56 = vadd.f32 %v4399_v60, %v4386_v34 }
 0xab5   : > { %v4416_v35 = vadd.f32 %v4414_v63, %v4401_v56  ;;  %v4574_v25 = vpop.permute.xlu2 %4573 }
 0xab6   : > { %v4580_v62 = vmul.f32 %v5031_v33, %v4574_v25 }
 0xab7   : > { %v4431_v51 = vadd.f32 %v4429_v1, %v4416_v35 }
 0xab8   : > { %5216 = vset.pattern.permute.xlu1 %v5347_v57  ;;  %5220 = vset.pattern.permute.xlu2 %v5342_v16 }
 0xab9   : > { %4426 = vperm.xlu1 %5216, %v7144_v52   ;;  %4517 = vperm.xlu2 %5220, %v7144_v52   ;;  %v4538_v50 = vpop.permute.xlu0 %4537  ;;  %v4446_v42 = vadd.f32 %v4444_v20, %v4431_v51 }
 0xaba   : > { %v4544_v36 = vmul.f32 %v7190_v9, %v4538_v50  ;;  %v4453_v59 = vpop.permute.xlu1 %4452  ;;  %v5028_v50 = vld [vmem:[%s7444_s17 + $0x48] sm:$0xff] }
 0xabb   : > { %v4459_v28 = vmul.f32 %v7279_v7, %v4453_v59 }
 0xabd   : > { %v7285_v33 = vadd.f32 %v4459_v28, %v4446_v42 }
 0xabe   : > { %v4586_v57 = vpop.permute.xlu2 %4585 }
 0xabf   : > { %v4592_v16 = vmul.f32 %v7221_v38, %v4586_v57  ;;  %v5030_v57 = vld [vmem:[%s7444_s17 + $0x58] sm:$0xff] }
 0xac1   : > { %5225 = vset.pattern.permute.xlu1 %v5353_v32  ;;  %5222 = vset.pattern.permute.xlu2 %v5345_v18 }
 0xac2   : > { %4577 = vperm.xlu1 %5225, %v7144_v52   ;;  %4541 = vperm.xlu2 %5222, %v7144_v52  }
 0xac3   : > { %v4598_v23 = vpop.permute.xlu0 %4597  ;;  %v4526_v17 = vpop.permute.xlu1 %4525 }
 0xac4   : > { %v4604_v9 = vmul.f32 %v7229_v39, %v4598_v23  ;;  %v4532_v26 = vmul.f32 %v7182_v11, %v4526_v17 }
 0xac6   : > { %v4534_v55 = vadd.f32 %v4532_v26, %v4522_v8 }
 0xac8   : > { %v4634_v30 = vpop.permute.xlu2 %4633  ;;  %v4546_v49 = vadd.f32 %v4544_v36, %v4534_v55 }
 0xac9   : > { %v4640_v14 = vmul.f32 %v5041_v2, %v4634_v30  ;;  %v5034_v30 = vld [vmem:[%s7444_s17 + $0x78] sm:$0xff] }
 0xaca   : > { %5226 = vset.pattern.permute.xlu1 %v5355_v48  ;;  %5223 = vset.pattern.permute.xlu2 %v5352_v19 }
 0xacb   : > { %4589 = vperm.xlu1 %5226, %v7144_v52   ;;  %4553 = vperm.xlu2 %5223, %v7144_v52  }
 0xacc   : > { %v4658_v18 = vpop.permute.xlu0 %4657 }
 0xacd   : > { %v4664_v32 = vmul.f32 %v5045_v6, %v4658_v18  ;;  %v4550_v38 = vpop.permute.xlu1 %4549 }
 0xace   : > { %v4556_v31 = vmul.f32 %v7196_v10, %v4550_v38 }
 0xad0   : > { %v4558_v39 = vadd.f32 %v4556_v31, %v4546_v49 }
 0xad1   : > { %v4646_v44 = vpop.permute.xlu2 %4645 }
 0xad2   : > { %v4652_v11 = vmul.f32 %v5043_v45, %v4646_v44 }
 0xad3   : > { %5230 = vset.pattern.permute.xlu1 %v5357_v15  ;;  %5227 = vset.pattern.permute.xlu2 %v5348_v43 }
 0xad4   : > { %4637 = vperm.xlu1 %5230, %v7144_v52   ;;  %4601 = vperm.xlu2 %5227, %v7144_v52  }
 0xad6   : > { %v4562_v19 = vpop.permute.xlu1 %4561 }
 0xad7   : > { %v4568_v48 = vmul.f32 %v7205_v58, %v4562_v19  ;;  %v4232_v29 = vpop.permute.xlu0 %4231 }
 0xad9   : > { %v4570_v61 = vadd.f32 %v4568_v48, %v4558_v39 }
 0xadb   : > { %v4582_v40 = vadd.f32 %v4580_v62, %v4570_v61  ;;  %v4247_v3 = vpop.permute.xlu2 %4246 }
 0xadc   : > { %5231 = vset.pattern.permute.xlu1 %v5359_v22  ;;  %5228 = vset.pattern.permute.xlu2 %v5356_v5 }
 0xadd   : > { %4649 = vperm.xlu1 %5231, %v7144_v52   ;;  %4613 = vperm.xlu2 %5228, %v7144_v52   ;;  %v4594_v15 = vadd.f32 %v4592_v16, %v4582_v40 }
 0xadf   : > { %v4610_v43 = vpop.permute.xlu1 %4609  ;;  %v4606_v10 = vadd.f32 %v4604_v9, %v4594_v15  ;;  %v5032_v9 = vld [vmem:[%s7444_s17 + $0x68] sm:$0xff] }
 0xae0   : > { %v4616_v41 = vmul.f32 %v7235_v54, %v4610_v43  ;;  %v4292_v58 = vpop.permute.xlu0 %4291 }
 0xae1   : > { %v4295_v28 = vmul.f32 %v5028_v50, %v4292_v58  ;;  %v5042_v58 = vld [vmem:[%s7444_s17 + $0xb8] sm:$0xff] }
 0xae2   : > { %v4618_v53 = vadd.f32 %v4616_v41, %v4606_v10 }
 0xae4   : > { %v4307_v34 = vpop.permute.xlu2 %4306 }
 0xae5   : > { %5232 = vset.pattern.permute.xlu2 %v5351_v27  ;;  %5234 = vset.pattern.permute.xlu1 %v5361_v24  ;;  %v4310_v17 = vmul.f32 %v5030_v57, %v4307_v34 }
 0xae6   : > { %4661 = vperm.xlu2 %5232, %v7144_v52  }
 0xae9   : > { %v4622_v22 = vpop.permute.xlu1 %4621 }
 0xaea   : > { %v4628_v5 = vmul.f32 %v7244_v12, %v4622_v22  ;;  %v4367_v47 = vpop.permute.xlu0 %4366  ;;  %v5022_v12 = vld [vmem:[%s7444_s17 + $0x18] sm:$0xff] }
 0xaeb   : > { %v4250_v56 = vmul.f32 %v5022_v12, %v4247_v3  ;;  %v5038_v3 = vld [vmem:[%s7444_s17 + $0x98] sm:$0xff] }
 0xaec   : > { %v4630_v0 = vadd.f32 %v4628_v5, %v4618_v53  ;;  %v4370_v41 = vmul.f32 %v5038_v3, %v4367_v47 }
 0xaee   : > { %v4642_v2 = vadd.f32 %v4640_v14, %v4630_v0  ;;  %5233 = vset.pattern.permute.xlu2 %v5360_v13  ;;  %v4322_v45 = vpop.permute.xlu2 %4321  ;;  %v5024_v13 = vld [vmem:[%s7444_s17 + $0x28] sm:$0xff] }
 0xaef   : > { %4673 = vperm.xlu2 %5233, %v7144_v52   ;;  %v4223_v52 = vld [vmem:[%s7444_s17 + $0x8] sm:$0xff]  ;;  %v4325_v14 = vmul.f32 %v5032_v9, %v4322_v45 }
 0xaf0   : > { %v4654_v54 = vadd.f32 %v4652_v11, %v4642_v2  ;;  %v4235_v1 = vmul.f32 %v4232_v29, %v4223_v52  ;;  %v5036_v11 = vld [vmem:[%s7444_s17 + $0x88] sm:$0xff] }
 0xaf1   : > { %v5040_v29 = vld [vmem:[%s7444_s17 + $0xa8] sm:$0xff] }
 0xaf2   : > { %v4670_v46 = vpop.permute.xlu1 %4669  ;;  %v4666_v4 = vadd.f32 %v4664_v32, %v4654_v54  ;;  %v4252_v62 = vadd.f32 %v4250_v56, %v4235_v1  ;;  %v5044_v45 = vld [vmem:[%s7444_s17 + $0xc8] sm:$0xff] }
 0xaf3   : > { %v4676_v27 = vmul.f32 %v7271_v21, %v4670_v46  ;;  %v7321_v63 = vpop.permute.xlu0 %4441  ;;  %v5026_v21 = vld [vmem:[%s7444_s17 + $0x38] sm:$0xff] }
 0xaf5   : > { %v7316_v24 = vadd.f32 %v4676_v27, %v4666_v4 }
 0xaf7   : > { %v4382_v60 = vpop.permute.xlu2 %4381 }
 0xaf8   : > { %v4385_v22 = vmul.f32 %v5040_v29, %v4382_v60  ;;  %v5046_v60 = vld [vmem:[%s7444_s17 + $0xd8] sm:$0xff] }
 0xafc   : > { %v4262_v6 = vpop.permute.xlu1 %4261 }
 0xafd   : > { %v4265_v35 = vmul.f32 %v5024_v13, %v4262_v6  ;;  %v4506_v42 = vpop.permute.xlu0 %4505 }
 0xafe   : > { %v4509_v18 = vmul.f32 %v4506_v42, %v4223_v52  ;;  %v4464_v42 = vsel %vm4463_vm10, %v7285_v33, 0.0  ;;  %v4473_v33 = vld [vmem:[%s7445_s18] sm:$0x1] }
 0xaff   : > { %v4267_v51 = vadd.f32 %v4265_v35, %v4252_v62 }
 0xb01   : > { %v4397_v8 = vpop.permute.xlu2 %4396 }
 0xb02   : > { %v4400_v46 = vmul.f32 %v5042_v58, %v4397_v8  ;;  %v5050_v8 = vld [vmem:[%s7444_s17 + $0xf8] sm:$0xff] }
 0xb05   : > { %v4277_v25 = vpop.permute.xlu1 %4276 }
 0xb06   : > { %v4280_v20 = vmul.f32 %v5026_v21, %v4277_v25  ;;  %v4530_v55 = vpop.permute.xlu0 %4529 }
 0xb07   : > { %v4533_v38 = vmul.f32 %v5024_v13, %v4530_v55  ;;  %v5048_v13 = vld [vmem:[%s7444_s17 + $0xe8] sm:$0xff] }
 0xb08   : > { %v4282_v36 = vadd.f32 %v4280_v20, %v4267_v51  ;;  %v4445_v35 = vmul.f32 %v5048_v13, %v7321_v63 }
 0xb0a   : > { %v4457_v59 = vpop.permute.xlu2 %4456  ;;  %v4297_v16 = vadd.f32 %v4295_v28, %v4282_v36 }
 0xb0b   : > { %v4460_v62 = vmul.f32 %v5050_v8, %v4457_v59 }
 0xb0c   : > { %v4312_v26 = vadd.f32 %v4310_v17, %v4297_v16 }
 0xb0e   : > { %v4327_v31 = vadd.f32 %v4325_v14, %v4312_v26 }
 0xb0f   : > { %v4337_v23 = vpop.permute.xlu1 %4336 }
 0xb10   : > { %v4340_v39 = vmul.f32 %v5034_v30, %v4337_v23  ;;  %v4566_v2 = vpop.permute.xlu0 %4565 }
 0xb11   : > { %v4569_v27 = vmul.f32 %v5030_v57, %v4566_v2 }
 0xb12   : > { %v4342_v40 = vadd.f32 %v4340_v39, %v4327_v31 }
 0xb13   : > { %v4518_v49 = vpop.permute.xlu2 %4517 }
 0xb14   : > { %v4521_v32 = vmul.f32 %v5022_v12, %v4518_v49 }
 0xb16   : > { %v4523_v44 = vadd.f32 %v4521_v32, %v4509_v18 }
 0xb18   : > { %v4352_v19 = vpop.permute.xlu1 %4351  ;;  %v4535_v48 = vadd.f32 %v4533_v38, %v4523_v44 }
 0xb19   : > { %v4355_v61 = vmul.f32 %v5036_v11, %v4352_v19  ;;  %v4626_v31 = vpop.permute.xlu0 %4625 }
 0xb1b   : > { %v4357_v15 = vadd.f32 %v4355_v61, %v4342_v40 }
 0xb1c   : > { %v4542_v43 = vpop.permute.xlu2 %4541 }
 0xb1d   : > { %v4545_v10 = vmul.f32 %v5026_v21, %v4542_v43  ;;  %v4372_v34 = vadd.f32 %v4370_v41, %v4357_v15 }
 0xb1f   : > { %v4547_v53 = vadd.f32 %v4545_v10, %v4535_v48  ;;  %v4387_v0 = vadd.f32 %v4385_v22, %v4372_v34 }
 0xb21   : > { %v4402_v47 = vadd.f32 %v4400_v46, %v4387_v0 }
 0xb22   : > { %v4412_v5 = vpop.permute.xlu1 %4411 }
 0xb23   : > { %v4415_v6 = vmul.f32 %v5044_v45, %v4412_v5  ;;  %v4686_v0 = vpop.permute.xlu0 %4685 }
 0xb25   : > { %v4554_v54 = vpop.permute.xlu2 %4553  ;;  %v4417_v21 = vadd.f32 %v4415_v6, %v4402_v47 }
 0xb26   : > { %v4557_v4 = vmul.f32 %v5028_v50, %v4554_v54  ;;  %v4689_v54 = vmul.f32 %v5050_v8, %v4686_v0 }
 0xb28   : > { %v4559_v12 = vadd.f32 %v4557_v4, %v4547_v53 }
 0xb2a   : > { %v4571_v52 = vadd.f32 %v4569_v27, %v4559_v12 }
 0xb2b   : > { %v4427_v56 = vpop.permute.xlu1 %4426 }
 0xb2c   : > { %v4430_v1 = vmul.f32 %v5046_v60, %v4427_v56 }
 0xb2e   : > { %v4432_v25 = vadd.f32 %v4430_v1, %v4417_v21  ;;  %v4602_v50 = vpop.permute.xlu2 %4601 }
 0xb2f   : > { %v4605_v32 = vmul.f32 %v5036_v11, %v4602_v50 }
 0xb30   : > { %v4447_v20 = vadd.f32 %v4445_v35, %v4432_v25 }
 0xb32   : > { %v4462_v51 = vadd.f32 %v4460_v62, %v4447_v20 }
 0xb34   : > { %v4465_v36 = vsel %vm4463_vm10, %v4462_v51, 0.0  ;;  %v4578_v28 = vpop.permute.xlu1 %4577 }
 0xb35   : > { %v4466_v57 = vadd.f32 %v4465_v36, %v4464_v42  ;;  %v4581_v17 = vmul.f32 %v5032_v9, %v4578_v28  ;;  %v4629_v9 = vmul.f32 %v5040_v29, %v4626_v31 }
 0xb37   : > { %v4467_v16 = vrot.slane %v4466_v57, 4  ;;  %v4614_v55 = vpop.permute.xlu2 %4613  ;;  %v4583_v14 = vadd.f32 %v4581_v17, %v4571_v52 }
 0xb38   : > { %v4617_v44 = vmul.f32 %v5038_v3, %v4614_v55 }
 0xb39   : > { %v4468_v23 = vadd.f32 %v4467_v16, %v4466_v57 }
 0xb3b   : > { %v4469_v26 = vrot.slane %v4468_v23, 2 }
 0xb3d   : > { %v4590_v49 = vpop.permute.xlu1 %4589  ;;  %v4470_v63 = vadd.f32 %v4469_v26, %v4468_v23 }
 0xb3e   : > { %v4593_v59 = vmul.f32 %v5034_v30, %v4590_v49 }
 0xb3f   : > { %v4471_v18 = vrot.slane %v4470_v63, 1 }
 0xb40   : > { %v4595_v38 = vadd.f32 %v4593_v59, %v4583_v14  ;;  %v4662_v30 = vpop.permute.xlu2 %4661 }
 0xb41   : > { %v4472_v39 = vadd.f32 %v4471_v18, %v4470_v63  ;;  %v4665_v22 = vmul.f32 %v5046_v60, %v4662_v30 }
 0xb42   : > { %v4607_v19 = vadd.f32 %v4605_v32, %v4595_v38 }
 0xb43   : > { %v4474_v48 = vadd.f32 %v4473_v33, %v4472_v39 }
 0xb44   : > { %v4619_v61 = vadd.f32 %v4617_v44, %v4607_v19 }
 0xb45   : > { %v4476_v40 = vsel %vm4475_vm11, %v4474_v48, -inf }
 0xb46   : > { %v4638_v15 = vpop.permute.xlu1 %4637  ;;  %v4631_v43 = vadd.f32 %v4629_v9, %v4619_v61  ;;  %4477 = vmax.xlane.f32.xlu1 %v4476_v40 }
 0xb47   : > { %v4641_v11 = vmul.f32 %v5042_v58, %v4638_v15 }
 0xb49   : > { %v4643_v41 = vadd.f32 %v4641_v11, %v4631_v43  ;;  %v4674_v34 = vpop.permute.xlu2 %4673 }
 0xb4a   : > { %v4677_v3 = vmul.f32 %v5048_v13, %v4674_v34 }
 0xb4f   : > { %v4650_v10 = vpop.permute.xlu1 %4649 }
 0xb50   : > { %v4653_v53 = vmul.f32 %v5044_v45, %v4650_v10 }
 0xb52   : > { %v4655_v5 = vadd.f32 %v4653_v53, %v4643_v41 }
 0xb54   : > { %v4667_v2 = vadd.f32 %v4665_v22, %v4655_v5 }
 0xb56   : > { %v4679_v46 = vadd.f32 %v4677_v3, %v4667_v2 }
 0xb58   : > { %v4691_v29 = vadd.f32 %v4689_v54, %v4679_v46 }
 0xb5a   : > { %v4693_v13 = vsel %vm4463_vm10, %v4691_v29, 0.0 }
 0xb5f   : > { %4681 = vperm.xlu1 %5234, %v7097_v37  }
 0xbb9   : > { %v4478_v4 = vpop.xlane.xlu1 %4477 }
 0xbba   : > { %v4479_v27 = vsub.f32 %v4474_v48, %v4478_v4 }
 0xbbc   : > { %v4480_v47 = vmul.f32 1.442695, %v4479_v27 }
 0xbbe   : > { %5244 = vpow2.f32 %v4480_v47 }
 0xbc4   : > { %v5245_v6 = vpop.eup %5244 }
 0xbc5   : > { %v4482_v58 = vsel %vm4475_vm11, %v5245_v6, 0.0 }
 0xbc6   : > { %4483 = vadd.xlane.f32.xlu2 %v4482_v58 }
 0xbd1   : > { %v4682_v45 = vpop.permute.xlu1 %4681 }
 0xbd2   : > { %v4688_v12 = vmul.f32 %v7279_v7, %v4682_v45 }
 0xbd4   : > { %v4690_v60 = vadd.f32 %v4688_v12, %v7316_v24 }
 0xbd6   : > { %v4692_v52 = vsel %vm4463_vm10, %v4690_v60, 0.0 }
 0xbd7   : > { %v4694_v56 = vadd.f32 %v4693_v13, %v4692_v52 }
 0xbd9   : > { %v4695_v37 = vrot.slane %v4694_v56, 4 }
 0xbdb   : > { %v4696_v21 = vadd.f32 %v4695_v37, %v4694_v56 }
 0xbdd   : > { %v4697_v1 = vrot.slane %v4696_v21, 2 }
 0xbdf   : > { %v4698_v8 = vadd.f32 %v4697_v1, %v4696_v21 }
 0xbe1   : > { %v4699_v35 = vrot.slane %v4698_v8, 1 }
 0xbe3   : > { %v4700_v25 = vadd.f32 %v4699_v35, %v4698_v8 }
 0xbe5   : > { %v4701_v62 = vadd.f32 %v4700_v25, %v4473_v33 }
 0xbe7   : > { %v4702_v20 = vsel %vm4475_vm11, %v4701_v62, -inf }
 0xbe8   : > { %4703 = vmax.xlane.f32.xlu2 %v4702_v20 }
 0xc39   : > { %v4484_v7 = vpop.xlane.xlu2 %4483 }
 0xc3a   : > { %5246 = vrcp.f32 %v4484_v7  ;;  %v4496_v42 = vand.u32 2147483648, %v4484_v7  ;;  %v4494_v28 = vand.u32 2147483647, %v4484_v7  ;;  %vm4490_vm13 = vweird.f32 %v4484_v7 }
 0xc3c   : > { %v4497_v16 = vor.u32 1.1754944e-38, %v4496_v42  ;;  %vm4495_vm15 = vcmp.eq.f32.partialorder %v4494_v28, 8.507059e+37 }
 0xc40   : > { %v5247_v24 = vpop.eup %5246 }
 0xc41   : > { %v4486_v51 = vmul.f32 %v5247_v24, %v4484_v7  ;;  %vm4491_vm12 = vweird.f32 %v5247_v24 }
 0xc42   : > { %vm4492_vm14 = vmor %vm4490_vm13, %vm4491_vm12 }
 0xc43   : > { %v4487_v50 = vsub.f32 1.0, %v4486_v51 }
 0xc45   : > { %v4488_v36 = vmul.f32 %v5247_v24, %v4487_v50 }
 0xc47   : > { %v4489_v57 = vadd.f32 %v5247_v24, %v4488_v36 }
 0xc49   : > { %v4493_v23 = vsel %vm4492_vm14, %v5247_v24, %v4489_v57 }
 0xc4a   : > { %v4498_v17 = vsel %vm4495_vm15, %v4497_v16, %v4493_v23 }
 0xc4b   : > { %v4499_v26 = vmul.f32 %v5245_v6, %v4498_v17 }
 0xc4d   : > { %4726 = vst.msk [vmem:[%s7386_s5] sm:$0x1] %vm4475_vm11, %v4499_v26 }
 0xc5b   : > { %v4704_v55 = vpop.xlane.xlu2 %4703 }
 0xc5c   : > { %v4705_v49 = vsub.f32 %v4701_v62, %v4704_v55 }
 0xc5e   : > { %v4706_v63 = vmul.f32 1.442695, %v4705_v49 }
 0xc60   : > { %5248 = vpow2.f32 %v4706_v63 }
 0xc66   : > { %v5249_v14 = vpop.eup %5248 }
 0xc67   : > { %v4708_v59 = vsel %vm4475_vm11, %v5249_v14, 0.0 }
 0xc68   : > { %4709 = vadd.xlane.f32.xlu1 %v4708_v59 }
 0xcdb   : > { %v4710_v18 = vpop.xlane.xlu1 %4709 }
 0xcdc   : > { %5250 = vrcp.f32 %v4710_v18  ;;  %v4722_v31 = vand.u32 2147483648, %v4710_v18  ;;  %v4720_v44 = vand.u32 2147483647, %v4710_v18  ;;  %vm4716_vm1 = vweird.f32 %v4710_v18 }
 0xcde   : > { %v4723_v48 = vor.u32 1.1754944e-38, %v4722_v31  ;;  %vm4721_vm3 = vcmp.eq.f32.partialorder %v4720_v44, 8.507059e+37 }
 0xce2   : > { %v5251_v32 = vpop.eup %5250 }
 0xce3   : > { %v4712_v38 = vmul.f32 %v5251_v32, %v4710_v18  ;;  %vm4717_vm0 = vweird.f32 %v5251_v32 }
 0xce4   : > { %vm4718_vm2 = vmor %vm4716_vm1, %vm4717_vm0 }
 0xce5   : > { %v4713_v33 = vsub.f32 1.0, %v4712_v38 }
 0xce7   : > { %v4714_v39 = vmul.f32 %v5251_v32, %v4713_v33 }
 0xce9   : > { %v4715_v19 = vadd.f32 %v5251_v32, %v4714_v39 }
 0xceb   : > { %v4719_v9 = vsel %vm4718_vm2, %v5251_v32, %v4715_v19 }
 0xcec   : > { %v4724_v61 = vsel %vm4721_vm3, %v4723_v48, %v4719_v9 }
 0xced   : > { %v4725_v40 = vmul.f32 %v5249_v14, %v4724_v61 }
 0xcef   : > { %4727 = vst.msk [vmem:[%s7386_s5 + $0x1] sm:$0x1] %vm4475_vm11, %v4725_v40 }
 0xcf0   : > { %5279 = shalt.err (!%p5276_p3)
}
 0xcf1   : > { %5055 = dma.vmem_to_hbm [thread:$0]  (%p5500_p5), %s4742_s26, 32, %s4744_s9, %s4729_s1  }
 0xcf2 PF: > { %p5061_p4 = scmp.ge.s32.totalorder %s5314_s21, 2  ;;  %s4755_s5 = sand.u32 1, %s5302_s0  }
 0xcf3   : > { %s4756_s8 = scalar_lea.sflag [#allocation3], %s4755_s5 }
 0xcf4   : > { %p5058_p7 = pnand %p5061_p4, %p5504_p6 }
 0xcf6   : > { %p5059_p8 = pneg %p5058_p7 }
 0xcf8   : > { %5297 = dma.done.wait (%p5059_p8), %s4756_s8, 32  }
 0xcf9   : > { %5299 = vsyncadd (%p5059_p8), %s4756_s8, 4294967264  ;;  %s7599_s21 = sld [smem:[#allocation6_spill]]  ;;  %s7602_s0 = smov %s5306_s30 }
 0xcfa   : > { %s7600_s6 = sld [smem:[#allocation5_spill]] }
 0xcfb   : > { %s7601_s20 = sld [smem:[#allocation7_spill]] }
 0xcff   : > { %p29_p9 = scmp.ge.s32.totalorder %s7599_s21, 6  }
 0xd00   : > { %s7603_s30 = smov %s7600_s6 }
 0xd01   :  { %31 = sbr.rel (!%p29_p9) target bundleno = 14 (0xe), region = 208 }
 0xd06   :  { %4762 = vsyncpa [#allocation3], 1 }
 0xd07   :  { %4764 = vsyncpa [#allocation3 + $0x1], 1 }

</bundles_post_ra>
